<compile_context>
chip_gen: v7x
topology: tpu7x:2x2x1
jax: 0.10.0
libtpu: 0.0.40
codegen_flags: <defaults>
</compile_context>

<pallas_src>
import functools

import jax
import jax.numpy as jnp
import numpy as np
from jax.experimental import pallas as pl
from jax.experimental.pallas import tpu as pltpu


def _round_up(x, m):
    return (x + m - 1) // m * m


# ----------------------------- Pallas kernel ------------------------------ #

def _bilstm_kernel(lens_ref, gxf_ref, gxb_ref, whhf_ref, whhb_ref,
                   yf_ref, yb_ref, hf_out_ref, hb_out_ref,
                   hf_scr, cf_scr, hb_scr, cb_scr,
                   *, t_chunk, hidden_pad):
    """Fused bidirectional LSTM recurrence.

    Grid axis 0 = time-chunk index (sequential / 'arbitrary').
    gx*_ref hold the precomputed input projections (x @ W_ih + b) for one chunk,
    so each timestep only does h_prev @ W_hh plus elementwise gate math.
    The forward direction walks chunks/timesteps ascending; the backward
    direction uses reversed block index maps and walks the chunk descending.
    """
    c_idx = pl.program_id(0)
    n_c = pl.num_programs(0)
    Hp = hidden_pad
    Bp = hf_scr.shape[0]

    @pl.when(c_idx == 0)
    def _init():
        hf_scr[...] = jnp.zeros_like(hf_scr)
        cf_scr[...] = jnp.zeros_like(cf_scr)
        hb_scr[...] = jnp.zeros_like(hb_scr)
        cb_scr[...] = jnp.zeros_like(cb_scr)

    # Hoisted out of the per-timestep loop: weight reads and the lens broadcast.
    whh_f = whhf_ref[...]                                    # (Hp, 4Hp)
    whh_b = whhb_ref[...]                                    # (Hp, 4Hp)
    lens_full = jnp.broadcast_to(lens_ref[...], (Bp, Hp))    # (Bp, Hp) int32

    fwd_base = c_idx * t_chunk                # forward: ascending time
    bwd_base = (n_c - 1 - c_idx) * t_chunk    # backward: reversed block order

    def _cell(gates, h_prev, c_prev, mask):
        # PyTorch gate order [i, f, g, o]; each slice is a 128-lane-aligned block.
        i_g = jax.nn.sigmoid(gates[:, 0 * Hp:1 * Hp])
        f_g = jax.nn.sigmoid(gates[:, 1 * Hp:2 * Hp])
        g_g = jnp.tanh(gates[:, 2 * Hp:3 * Hp])
        o_g = jax.nn.sigmoid(gates[:, 3 * Hp:4 * Hp])
        c_new = f_g * c_prev + i_g * g_g
        h_new = o_g * jnp.tanh(c_new)
        c_out = jnp.where(mask, c_new, c_prev)    # freeze state past seq end
        h_out = jnp.where(mask, h_new, h_prev)
        y_out = jnp.where(mask, h_new, 0.0)       # zero-pad packed output
        return h_out, c_out, y_out

    def _step(k, carry):
        # ---- forward direction: actual time t = fwd_base + k ----
        t_f = fwd_base + k
        gates_f = gxf_ref[k] + jnp.dot(hf_scr[...], whh_f,
                                       preferred_element_type=jnp.float32)
        h_f, c_f, y_f = _cell(gates_f, hf_scr[...], cf_scr[...],
                              lens_full > t_f)
        hf_scr[...] = h_f
        cf_scr[...] = c_f
        yf_ref[k] = y_f.astype(yf_ref.dtype)

        # ---- backward direction: actual time t = bwd_base + (t_chunk-1-k) ----
        kb = t_chunk - 1 - k
        t_b = bwd_base + kb
        gates_b = gxb_ref[kb] + jnp.dot(hb_scr[...], whh_b,
                                        preferred_element_type=jnp.float32)
        h_b, c_b, y_b = _cell(gates_b, hb_scr[...], cb_scr[...],
                              lens_full > t_b)
        hb_scr[...] = h_b
        cb_scr[...] = c_b
        yb_ref[kb] = y_b.astype(yb_ref.dtype)
        return carry

    jax.lax.fori_loop(0, t_chunk, _step, 0, unroll=True)

    @pl.when(c_idx == n_c - 1)
    def _final():
        hf_out_ref[...] = hf_scr[...].astype(hf_out_ref.dtype)   # h at t = len-1
        hb_out_ref[...] = hb_scr[...].astype(hb_out_ref.dtype)   # h at t = 0


# ------------------------------ model glue -------------------------------- #

def _pad_gate_cols(w, h, hp):
    """(rows, 4h) -> (rows, 4hp): zero-pad each gate's column block to hp lanes."""
    parts = []
    for g in range(4):
        blk = w[:, g * h:(g + 1) * h]
        parts.append(jnp.pad(blk, ((0, 0), (0, hp - h))))
    return jnp.concatenate(parts, axis=1)


def unordered_lstm_forward(x, x_len, params, *, t_chunk=8):
    """x: (B, T, I) f32; x_len: (B,) int. Returns (hidden (B, 2H), out (B, T, 2H))."""
    B, T, I = x.shape
    H = params['w_hh_f'].shape[0]

    Hp = _round_up(max(H, 1), 128)        # lane-align every gate block
    Bp = _round_up(max(B, 1), 8)          # sublane-align the batch
    tc = max(1, int(t_chunk))
    Tp = _round_up(max(T, 1), tc)
    n_chunks = Tp // tc

    # --- padded, gate-aligned weights (kernel uses the x @ W convention) ---
    wih_f = _pad_gate_cols(params['w_ih_f'], H, Hp)                        # (I, 4Hp)
    wih_b = _pad_gate_cols(params['w_ih_b'], H, Hp)
    whh_f = jnp.pad(_pad_gate_cols(params['w_hh_f'], H, Hp),
                    ((0, Hp - H), (0, 0)))                                 # (Hp, 4Hp)
    whh_b = jnp.pad(_pad_gate_cols(params['w_hh_b'], H, Hp),
                    ((0, Hp - H), (0, 0)))
    b_f = _pad_gate_cols(params['b_f'], H, Hp)                             # (1, 4Hp)
    b_b = _pad_gate_cols(params['b_b'], H, Hp)

    # --- time-major, padded input & lengths ---
    x_tbi = jnp.transpose(x, (1, 0, 2))                                    # (T, B, I)
    x_tbi = jnp.pad(x_tbi, ((0, Tp - T), (0, Bp - B), (0, 0)))
    lens = jnp.pad(x_len.astype(jnp.int32), (0, Bp - B)).reshape(Bp, 1)

    # --- hoisted input projection: ONE wide matmul over all timesteps and both
    # directions (N = 8*Hp). Embarrassingly parallel -> plain XLA matmul. ---
    wih_cat = jnp.concatenate([wih_f, wih_b], axis=1)                      # (I, 8Hp)
    b_cat = jnp.concatenate([b_f, b_b], axis=1)                            # (1, 8Hp)
    gx = jnp.dot(x_tbi, wih_cat, preferred_element_type=jnp.float32) + b_cat
    gx_f = gx[..., :4 * Hp]                                                # (Tp, Bp, 4Hp)
    gx_b = gx[..., 4 * Hp:]

    kernel = functools.partial(_bilstm_kernel, t_chunk=tc, hidden_pad=Hp)
    y_f, y_b, h_f, h_b = pl.pallas_call(
        kernel,
        out_shape=(jax.ShapeDtypeStruct((Tp, Bp, Hp), jnp.float32),
                   jax.ShapeDtypeStruct((Tp, Bp, Hp), jnp.float32),
                   jax.ShapeDtypeStruct((Bp, Hp), jnp.float32),
                   jax.ShapeDtypeStruct((Bp, Hp), jnp.float32)),
        grid_spec=pltpu.PrefetchScalarGridSpec(
            num_scalar_prefetch=0,
            grid=(n_chunks,),
            in_specs=[
                pl.BlockSpec((Bp, 1), lambda c: (0, 0)),                   # lengths
                pl.BlockSpec((tc, Bp, 4 * Hp), lambda c: (c, 0, 0)),       # gx fwd
                pl.BlockSpec((tc, Bp, 4 * Hp),
                             lambda c: (n_chunks - 1 - c, 0, 0)),          # gx bwd
                pl.BlockSpec((Hp, 4 * Hp), lambda c: (0, 0)),              # W_hh fwd
                pl.BlockSpec((Hp, 4 * Hp), lambda c: (0, 0)),              # W_hh bwd
            ],
            out_specs=[
                pl.BlockSpec((tc, Bp, Hp), lambda c: (c, 0, 0)),           # y fwd
                pl.BlockSpec((tc, Bp, Hp),
                             lambda c: (n_chunks - 1 - c, 0, 0)),          # y bwd
                pl.BlockSpec((Bp, Hp), lambda c: (0, 0)),                  # final h fwd
                pl.BlockSpec((Bp, Hp), lambda c: (0, 0)),                  # final h bwd
            ],
            scratch_shapes=[pltpu.VMEM((Bp, Hp), jnp.float32),             # h fwd
                            pltpu.VMEM((Bp, Hp), jnp.float32),             # c fwd
                            pltpu.VMEM((Bp, Hp), jnp.float32),             # h bwd
                            pltpu.VMEM((Bp, Hp), jnp.float32)],            # c bwd
        ),
        compiler_params=pltpu.CompilerParams(
            dimension_semantics=("arbitrary",)),    # time chunks are sequential
    )(lens, gx_f, gx_b, whh_f, whh_b)

    y = jnp.concatenate([y_f[:T, :B, :H], y_b[:T, :B, :H]], axis=-1)       # (T, B, 2H)
    y = jnp.transpose(y, (1, 0, 2))                                        # (B, T, 2H)
    hidden = jnp.concatenate([h_f[:B, :H], h_b[:B, :H]], axis=-1)          # (B, 2H)
    return hidden, y


def init_params(key, input_size, hidden_size):
    """Deterministic init matching the module's reset_params() recipe."""
    H = hidden_size
    k1, k2, k3, k4 = jax.random.split(key, 4)

    def kaiming_normal(k, shape):                        # fan_in = shape[1]
        return jax.random.normal(k, shape, jnp.float32) * jnp.sqrt(2.0 / shape[1])

    def orthogonal(k, shape):
        a = jax.random.normal(k, shape, jnp.float32)
        q, r = jnp.linalg.qr(a)
        return q * jnp.sign(jnp.diagonal(r))[None, :]

    w_ih_f = kaiming_normal(k1, (4 * H, input_size))
    w_ih_b = kaiming_normal(k2, (4 * H, input_size))
    w_hh_f = orthogonal(k3, (4 * H, H))
    w_hh_b = orthogonal(k4, (4 * H, H))
    bias_ih = jnp.zeros((4 * H,), jnp.float32)
    bias_hh = jnp.zeros((4 * H,), jnp.float32).at[H:2 * H].set(1.0)  # forget gate = 1
    b = (bias_ih + bias_hh).reshape(1, 4 * H)

    # Stored transposed for the (x @ W) convention used by the kernel.
    return dict(w_ih_f=w_ih_f.T, w_hh_f=w_hh_f.T, b_f=b,
                w_ih_b=w_ih_b.T, w_hh_b=w_hh_b.T, b_b=b)


# ------------------------- pure-JAX reference ------------------------------ #

def _ref_direction(x_tbi, lens, w_ih, w_hh, b, reverse):
    T, B, _ = x_tbi.shape
    H = w_hh.shape[0]

    def step(carry, inp):
        h, c = carry
        xt, t = inp
        gates = xt @ w_ih + h @ w_hh + b
        i = jax.nn.sigmoid(gates[:, :H])
        f = jax.nn.sigmoid(gates[:, H:2 * H])
        g = jnp.tanh(gates[:, 2 * H:3 * H])
        o = jax.nn.sigmoid(gates[:, 3 * H:])
        c_new = f * c + i * g
        h_new = o * jnp.tanh(c_new)
        m = (lens[:, 0] > t)[:, None]
        c = jnp.where(m, c_new, c)
        h = jnp.where(m, h_new, h)
        return (h, c), jnp.where(m, h_new, 0.0)

    ts = jnp.arange(T)
    xs = x_tbi
    if reverse:
        xs, ts = xs[::-1], ts[::-1]
    (h, _), ys = jax.lax.scan(step, (jnp.zeros((B, H)), jnp.zeros((B, H))), (xs, ts))
    if reverse:
        ys = ys[::-1]
    return ys, h


# --------------------------------- main ------------------------------------ #

if __name__ == "__main__":
    B, T, I, H = 4, 8, 16, 32
    key = jax.random.PRNGKey(0)
    kx, kp = jax.random.split(key)

    x = jax.random.normal(kx, (B, T, I), jnp.float32)
    x_len = jnp.array([8, 5, 3, 6], dtype=jnp.int32)
    params = init_params(kp, I, H)

    forward = jax.jit(unordered_lstm_forward)
    hidden, out = forward(x, x_len, params)
    hidden = jax.block_until_ready(hidden)
    out = jax.block_until_ready(out)

    # pad_packed_sequence pads only up to max(x_len).
    T_eff = int(jnp.max(x_len))
    out = out[:, :T_eff, :]

    # Cross-check against a pure-JAX lax.scan reference.
    x_tbi = jnp.transpose(x, (1, 0, 2))
    lens = x_len.reshape(B, 1)
    yf, hf = _ref_direction(x_tbi, lens, params['w_ih_f'], params['w_hh_f'],
                            params['b_f'], reverse=False)
    yb, hb = _ref_direction(x_tbi, lens, params['w_ih_b'], params['w_hh_b'],
                            params['b_b'], reverse=True)
    ref_out = jnp.transpose(jnp.concatenate([yf, yb], -1), (1, 0, 2))[:, :T_eff, :]
    ref_hidden = jnp.concatenate([hf, hb], -1)

    np.testing.assert_allclose(np.asarray(out), np.asarray(ref_out),
                               atol=2e-5, rtol=2e-5)
    np.testing.assert_allclose(np.asarray(hidden), np.asarray(ref_hidden),
                               atol=2e-5, rtol=2e-5)

    print("KERNEL_OK")
</pallas_src>

<mosaic_0001>
module attributes {stable_mosaic.version = 11 : i64} {
  func.func @_bilstm_kernel(%arg0: i32, %arg1: memref<8x1xi32, #tpu.memory_space<vmem>>, %arg2: memref<8x8x512xf32, #tpu.memory_space<vmem>>, %arg3: memref<8x8x512xf32, #tpu.memory_space<vmem>>, %arg4: memref<128x512xf32, #tpu.memory_space<vmem>>, %arg5: memref<128x512xf32, #tpu.memory_space<vmem>>, %arg6: memref<8x8x128xf32, #tpu.memory_space<vmem>>, %arg7: memref<8x8x128xf32, #tpu.memory_space<vmem>>, %arg8: memref<8x128xf32, #tpu.memory_space<vmem>>, %arg9: memref<8x128xf32, #tpu.memory_space<vmem>>, %arg10: memref<8x128xf32, #tpu.memory_space<vmem>>, %arg11: memref<8x128xf32, #tpu.memory_space<vmem>>, %arg12: memref<8x128xf32, #tpu.memory_space<vmem>>, %arg13: memref<8x128xf32, #tpu.memory_space<vmem>>) attributes {dimension_semantics = [#tpu.dimension_semantics<arbitrary>], iteration_bounds = array<i64: 1>, scalar_prefetch = 0 : i64, scratch_operands = 4 : i64, tpu.core_type = #tpu.core_type<tc>, window_params = [{pipeline_mode = #tpu.pipeline_mode<synchronous>, transform_indices = @transform_0, window_bounds = array<i64: 8, 1>}, {transform_indices = @transform_1, window_bounds = array<i64: 8, 8, 512>}, {transform_indices = @transform_2, window_bounds = array<i64: 8, 8, 512>}, {pipeline_mode = #tpu.pipeline_mode<synchronous>, transform_indices = @transform_3, window_bounds = array<i64: 128, 512>}, {pipeline_mode = #tpu.pipeline_mode<synchronous>, transform_indices = @transform_4, window_bounds = array<i64: 128, 512>}, {transform_indices = @transform_5, window_bounds = array<i64: 8, 8, 128>}, {transform_indices = @transform_6, window_bounds = array<i64: 8, 8, 128>}, {pipeline_mode = #tpu.pipeline_mode<synchronous>, transform_indices = @transform_7, window_bounds = array<i64: 8, 128>}, {pipeline_mode = #tpu.pipeline_mode<synchronous>, transform_indices = @transform_8, window_bounds = array<i64: 8, 128>}]} {
    %c0_i32 = arith.constant 0 : i32
    %0 = arith.cmpi eq, %arg0, %c0_i32 : i32
    %1 = arith.extui %0 : i1 to i32
    %c0_i32_0 = arith.constant 0 : i32
    %2 = arith.cmpi ne, %1, %c0_i32_0 : i32
    scf.if %2 {
      %cst_323 = arith.constant 0.000000e+00 : f32
      %758 = vector.broadcast %cst_323 : f32 to vector<8x128xf32>
      %c0_324 = arith.constant 0 : index
      %c0_325 = arith.constant 0 : index
      %759 = vector.load %arg10[%c0_324, %c0_325] : memref<8x128xf32, #tpu.memory_space<vmem>>, vector<8x128xf32>
      tpu.vector_store %arg10[%c0_324, %c0_325], %758 {strides = array<i32>} : memref<8x128xf32, #tpu.memory_space<vmem>>, vector<8x128xf32>,
      %cst_326 = arith.constant 0.000000e+00 : f32
      %760 = vector.broadcast %cst_326 : f32 to vector<8x128xf32>
      %c0_327 = arith.constant 0 : index
      %c0_328 = arith.constant 0 : index
      %761 = vector.load %arg11[%c0_327, %c0_328] : memref<8x128xf32, #tpu.memory_space<vmem>>, vector<8x128xf32>
      tpu.vector_store %arg11[%c0_327, %c0_328], %760 {strides = array<i32>} : memref<8x128xf32, #tpu.memory_space<vmem>>, vector<8x128xf32>,
      %cst_329 = arith.constant 0.000000e+00 : f32
      %762 = vector.broadcast %cst_329 : f32 to vector<8x128xf32>
      %c0_330 = arith.constant 0 : index
      %c0_331 = arith.constant 0 : index
      %763 = vector.load %arg12[%c0_330, %c0_331] : memref<8x128xf32, #tpu.memory_space<vmem>>, vector<8x128xf32>
      tpu.vector_store %arg12[%c0_330, %c0_331], %762 {strides = array<i32>} : memref<8x128xf32, #tpu.memory_space<vmem>>, vector<8x128xf32>,
      %cst_332 = arith.constant 0.000000e+00 : f32
      %764 = vector.broadcast %cst_332 : f32 to vector<8x128xf32>
      %c0_333 = arith.constant 0 : index
      %c0_334 = arith.constant 0 : index
      %765 = vector.load %arg13[%c0_333, %c0_334] : memref<8x128xf32, #tpu.memory_space<vmem>>, vector<8x128xf32>
      tpu.vector_store %arg13[%c0_333, %c0_334], %764 {strides = array<i32>} : memref<8x128xf32, #tpu.memory_space<vmem>>, vector<8x128xf32>,
    } else {
    }
    %c0 = arith.constant 0 : index
    %c0_1 = arith.constant 0 : index
    %3 = vector.load %arg4[%c0, %c0_1] : memref<128x512xf32, #tpu.memory_space<vmem>>, vector<128x512xf32>
    %c0_2 = arith.constant 0 : index
    %c0_3 = arith.constant 0 : index
    %4 = vector.load %arg5[%c0_2, %c0_3] : memref<128x512xf32, #tpu.memory_space<vmem>>, vector<128x512xf32>
    %c0_4 = arith.constant 0 : index
    %c0_5 = arith.constant 0 : index
    %5 = vector.load %arg1[%c0_4, %c0_5] : memref<8x1xi32, #tpu.memory_space<vmem>>, vector<8x1xi32>
    %6 = vector.shape_cast %5 : vector<8x1xi32> to vector<8x1xi32>
    %7 = vector.broadcast %6 : vector<8x1xi32> to vector<8x128xi32>
    %c8_i32 = arith.constant 8 : i32
    %8 = arith.muli %arg0, %c8_i32 : i32
    %c0_i32_6 = arith.constant 0 : i32
    %9 = arith.subi %c0_i32_6, %arg0 : i32
    %c8_i32_7 = arith.constant 8 : i32
    %10 = arith.muli %9, %c8_i32_7 : i32
    %c0_i32_8 = arith.constant 0 : i32
    %11 = arith.addi %8, %c0_i32_8 : i32
    %12 = arith.index_cast %c0_i32_8 : i32 to index
    %c0_9 = arith.constant 0 : index
    %c0_10 = arith.constant 0 : index
    %13 = vector.load %arg2[%12, %c0_9, %c0_10] : memref<8x8x512xf32, #tpu.memory_space<vmem>>, vector<1x8x512xf32>
    %14 = vector.shape_cast %13 : vector<1x8x512xf32> to vector<8x512xf32>
    %c0_11 = arith.constant 0 : index
    %c0_12 = arith.constant 0 : index
    %15 = vector.load %arg10[%c0_11, %c0_12] : memref<8x128xf32, #tpu.memory_space<vmem>>, vector<8x128xf32>
    %cst = arith.constant dense<0.000000e+00> : vector<8x512xf32>
    %16 = tpu.matmul %15, %3, %cst {dimension_numbers = #tpu.dot_dimension_numbers<[1], [0], [0], [1], [0, 0, 1, 1], [], []>} : vector<8x128xf32>, vector<128x512xf32>, vector<8x512xf32> -> vector<8x512xf32>
    %17 = arith.addf %14, %16 : vector<8x512xf32>
    %c0_13 = arith.constant 0 : index
    %c0_14 = arith.constant 0 : index
    %18 = vector.load %arg10[%c0_13, %c0_14] : memref<8x128xf32, #tpu.memory_space<vmem>>, vector<8x128xf32>
    %c0_15 = arith.constant 0 : index
    %c0_16 = arith.constant 0 : index
    %19 = vector.load %arg11[%c0_15, %c0_16] : memref<8x128xf32, #tpu.memory_space<vmem>>, vector<8x128xf32>
    %20 = vector.broadcast %11 : i32 to vector<8x128xi32>
    %21 = arith.cmpi sgt, %7, %20 : vector<8x128xi32>
    %22 = vector.extract_strided_slice %17 {offsets = [0, 0], sizes = [8, 128], strides = [1, 1]} : vector<8x512xf32> to vector<8x128xf32>
    %23 = arith.negf %22 : vector<8x128xf32>
    %24 = math.exp %23 : vector<8x128xf32>
    %cst_17 = arith.constant 1.000000e+00 : f32
    %25 = vector.broadcast %cst_17 : f32 to vector<8x128xf32>
    %26 = arith.addf %25, %24 : vector<8x128xf32>
    %27 = arith.divf %25, %26 : vector<8x128xf32>
    %28 = vector.extract_strided_slice %17 {offsets = [0, 128], sizes = [8, 128], strides = [1, 1]} : vector<8x512xf32> to vector<8x128xf32>
    %29 = arith.negf %28 : vector<8x128xf32>
    %30 = math.exp %29 : vector<8x128xf32>
    %cst_18 = arith.constant 1.000000e+00 : f32
    %31 = vector.broadcast %cst_18 : f32 to vector<8x128xf32>
    %32 = arith.addf %31, %30 : vector<8x128xf32>
    %33 = arith.divf %31, %32 : vector<8x128xf32>
    %34 = vector.extract_strided_slice %17 {offsets = [0, 256], sizes = [8, 128], strides = [1, 1]} : vector<8x512xf32> to vector<8x128xf32>
    %35 = math.tanh %34 : vector<8x128xf32>
    %36 = vector.extract_strided_slice %17 {offsets = [0, 384], sizes = [8, 128], strides = [1, 1]} : vector<8x512xf32> to vector<8x128xf32>
    %37 = arith.negf %36 : vector<8x128xf32>
    %38 = math.exp %37 : vector<8x128xf32>
    %cst_19 = arith.constant 1.000000e+00 : f32
    %39 = vector.broadcast %cst_19 : f32 to vector<8x128xf32>
    %40 = arith.addf %39, %38 : vector<8x128xf32>
    %41 = arith.divf %39, %40 : vector<8x128xf32>
    %42 = arith.mulf %33, %19 : vector<8x128xf32>
    %43 = arith.mulf %27, %35 : vector<8x128xf32>
    %44 = arith.addf %42, %43 : vector<8x128xf32>
    %45 = math.tanh %44 : vector<8x128xf32>
    %46 = arith.mulf %41, %45 : vector<8x128xf32>
    %47 = arith.select %21, %44, %19 : vector<8x128xi1>, vector<8x128xf32>
    %48 = arith.select %21, %46, %18 : vector<8x128xi1>, vector<8x128xf32>
    %cst_20 = arith.constant 0.000000e+00 : f32
    %49 = vector.broadcast %cst_20 : f32 to vector<8x128xf32>
    %50 = arith.select %21, %46, %49 : vector<8x128xi1>, vector<8x128xf32>
    %c0_21 = arith.constant 0 : index
    %c0_22 = arith.constant 0 : index
    %51 = vector.load %arg10[%c0_21, %c0_22] : memref<8x128xf32, #tpu.memory_space<vmem>>, vector<8x128xf32>
    tpu.vector_store %arg10[%c0_21, %c0_22], %48 {strides = array<i32>} : memref<8x128xf32, #tpu.memory_space<vmem>>, vector<8x128xf32>,
    %c0_23 = arith.constant 0 : index
    %c0_24 = arith.constant 0 : index
    %52 = vector.load %arg11[%c0_23, %c0_24] : memref<8x128xf32, #tpu.memory_space<vmem>>, vector<8x128xf32>
    tpu.vector_store %arg11[%c0_23, %c0_24], %47 {strides = array<i32>} : memref<8x128xf32, #tpu.memory_space<vmem>>, vector<8x128xf32>,
    %53 = arith.index_cast %c0_i32_8 : i32 to index
    %c0_25 = arith.constant 0 : index
    %c0_26 = arith.constant 0 : index
    %54 = vector.load %arg6[%53, %c0_25, %c0_26] : memref<8x8x128xf32, #tpu.memory_space<vmem>>, vector<1x8x128xf32>
    %55 = vector.shape_cast %54 : vector<1x8x128xf32> to vector<8x128xf32>
    %56 = vector.shape_cast %50 : vector<8x128xf32> to vector<1x8x128xf32>
    tpu.vector_store %arg6[%53, %c0_25, %c0_26], %56 {strides = array<i32>} : memref<8x8x128xf32, #tpu.memory_space<vmem>>, vector<1x8x128xf32>,
    %c7_i32 = arith.constant 7 : i32
    %57 = arith.subi %c7_i32, %c0_i32_8 : i32
    %58 = arith.addi %10, %57 : i32
    %59 = arith.index_cast %57 : i32 to index
    %c0_27 = arith.constant 0 : index
    %c0_28 = arith.constant 0 : index
    %60 = vector.load %arg3[%59, %c0_27, %c0_28] : memref<8x8x512xf32, #tpu.memory_space<vmem>>, vector<1x8x512xf32>
    %61 = vector.shape_cast %60 : vector<1x8x512xf32> to vector<8x512xf32>
    %c0_29 = arith.constant 0 : index
    %c0_30 = arith.constant 0 : index
    %62 = vector.load %arg12[%c0_29, %c0_30] : memref<8x128xf32, #tpu.memory_space<vmem>>, vector<8x128xf32>
    %cst_31 = arith.constant dense<0.000000e+00> : vector<8x512xf32>
    %63 = tpu.matmul %62, %4, %cst_31 {dimension_numbers = #tpu.dot_dimension_numbers<[1], [0], [0], [1], [0, 0, 1, 1], [], []>} : vector<8x128xf32>, vector<128x512xf32>, vector<8x512xf32> -> vector<8x512xf32>
    %64 = arith.addf %61, %63 : vector<8x512xf32>
    %c0_32 = arith.constant 0 : index
    %c0_33 = arith.constant 0 : index
    %65 = vector.load %arg12[%c0_32, %c0_33] : memref<8x128xf32, #tpu.memory_space<vmem>>, vector<8x128xf32>
    %c0_34 = arith.constant 0 : index
    %c0_35 = arith.constant 0 : index
    %66 = vector.load %arg13[%c0_34, %c0_35] : memref<8x128xf32, #tpu.memory_space<vmem>>, vector<8x128xf32>
    %67 = vector.broadcast %58 : i32 to vector<8x128xi32>
    %68 = arith.cmpi sgt, %7, %67 : vector<8x128xi32>
    %69 = vector.extract_strided_slice %64 {offsets = [0, 0], sizes = [8, 128], strides = [1, 1]} : vector<8x512xf32> to vector<8x128xf32>
    %70 = arith.negf %69 : vector<8x128xf32>
    %71 = math.exp %70 : vector<8x128xf32>
    %cst_36 = arith.constant 1.000000e+00 : f32
    %72 = vector.broadcast %cst_36 : f32 to vector<8x128xf32>
    %73 = arith.addf %72, %71 : vector<8x128xf32>
    %74 = arith.divf %72, %73 : vector<8x128xf32>
    %75 = vector.extract_strided_slice %64 {offsets = [0, 128], sizes = [8, 128], strides = [1, 1]} : vector<8x512xf32> to vector<8x128xf32>
    %76 = arith.negf %75 : vector<8x128xf32>
    %77 = math.exp %76 : vector<8x128xf32>
    %cst_37 = arith.constant 1.000000e+00 : f32
    %78 = vector.broadcast %cst_37 : f32 to vector<8x128xf32>
    %79 = arith.addf %78, %77 : vector<8x128xf32>
    %80 = arith.divf %78, %79 : vector<8x128xf32>
    %81 = vector.extract_strided_slice %64 {offsets = [0, 256], sizes = [8, 128], strides = [1, 1]} : vector<8x512xf32> to vector<8x128xf32>
    %82 = math.tanh %81 : vector<8x128xf32>
    %83 = vector.extract_strided_slice %64 {offsets = [0, 384], sizes = [8, 128], strides = [1, 1]} : vector<8x512xf32> to vector<8x128xf32>
    %84 = arith.negf %83 : vector<8x128xf32>
    %85 = math.exp %84 : vector<8x128xf32>
    %cst_38 = arith.constant 1.000000e+00 : f32
    %86 = vector.broadcast %cst_38 : f32 to vector<8x128xf32>
    %87 = arith.addf %86, %85 : vector<8x128xf32>
    %88 = arith.divf %86, %87 : vector<8x128xf32>
    %89 = arith.mulf %80, %66 : vector<8x128xf32>
    %90 = arith.mulf %74, %82 : vector<8x128xf32>
    %91 = arith.addf %89, %90 : vector<8x128xf32>
    %92 = math.tanh %91 : vector<8x128xf32>
    %93 = arith.mulf %88, %92 : vector<8x128xf32>
    %94 = arith.select %68, %91, %66 : vector<8x128xi1>, vector<8x128xf32>
    %95 = arith.select %68, %93, %65 : vector<8x128xi1>, vector<8x128xf32>
    %cst_39 = arith.constant 0.000000e+00 : f32
    %96 = vector.broadcast %cst_39 : f32 to vector<8x128xf32>
    %97 = arith.select %68, %93, %96 : vector<8x128xi1>, vector<8x128xf32>
    %c0_40 = arith.constant 0 : index
    %c0_41 = arith.constant 0 : index
    %98 = vector.load %arg12[%c0_40, %c0_41] : memref<8x128xf32, #tpu.memory_space<vmem>>, vector<8x128xf32>
    tpu.vector_store %arg12[%c0_40, %c0_41], %95 {strides = array<i32>} : memref<8x128xf32, #tpu.memory_space<vmem>>, vector<8x128xf32>,
    %c0_42 = arith.constant 0 : index
    %c0_43 = arith.constant 0 : index
    %99 = vector.load %arg13[%c0_42, %c0_43] : memref<8x128xf32, #tpu.memory_space<vmem>>, vector<8x128xf32>
    tpu.vector_store %arg13[%c0_42, %c0_43], %94 {strides = array<i32>} : memref<8x128xf32, #tpu.memory_space<vmem>>, vector<8x128xf32>,
    %100 = arith.index_cast %57 : i32 to index
    %c0_44 = arith.constant 0 : index
    %c0_45 = arith.constant 0 : index
    %101 = vector.load %arg7[%100, %c0_44, %c0_45] : memref<8x8x128xf32, #tpu.memory_space<vmem>>, vector<1x8x128xf32>
    %102 = vector.shape_cast %101 : vector<1x8x128xf32> to vector<8x128xf32>
    %103 = vector.shape_cast %97 : vector<8x128xf32> to vector<1x8x128xf32>
    tpu.vector_store %arg7[%100, %c0_44, %c0_45], %103 {strides = array<i32>} : memref<8x8x128xf32, #tpu.memory_space<vmem>>, vector<1x8x128xf32>,
    %c1_i32 = arith.constant 1 : i32
    %104 = arith.addi %8, %c1_i32 : i32
    %105 = arith.index_cast %c1_i32 : i32 to index
    %c0_46 = arith.constant 0 : index
    %c0_47 = arith.constant 0 : index
    %106 = vector.load %arg2[%105, %c0_46, %c0_47] : memref<8x8x512xf32, #tpu.memory_space<vmem>>, vector<1x8x512xf32>
    %107 = vector.shape_cast %106 : vector<1x8x512xf32> to vector<8x512xf32>
    %c0_48 = arith.constant 0 : index
    %c0_49 = arith.constant 0 : index
    %108 = vector.load %arg10[%c0_48, %c0_49] : memref<8x128xf32, #tpu.memory_space<vmem>>, vector<8x128xf32>
    %cst_50 = arith.constant dense<0.000000e+00> : vector<8x512xf32>
    %109 = tpu.matmul %108, %3, %cst_50 {dimension_numbers = #tpu.dot_dimension_numbers<[1], [0], [0], [1], [0, 0, 1, 1], [], []>} : vector<8x128xf32>, vector<128x512xf32>, vector<8x512xf32> -> vector<8x512xf32>
    %110 = arith.addf %107, %109 : vector<8x512xf32>
    %c0_51 = arith.constant 0 : index
    %c0_52 = arith.constant 0 : index
    %111 = vector.load %arg10[%c0_51, %c0_52] : memref<8x128xf32, #tpu.memory_space<vmem>>, vector<8x128xf32>
    %c0_53 = arith.constant 0 : index
    %c0_54 = arith.constant 0 : index
    %112 = vector.load %arg11[%c0_53, %c0_54] : memref<8x128xf32, #tpu.memory_space<vmem>>, vector<8x128xf32>
    %113 = vector.broadcast %104 : i32 to vector<8x128xi32>
    %114 = arith.cmpi sgt, %7, %113 : vector<8x128xi32>
    %115 = vector.extract_strided_slice %110 {offsets = [0, 0], sizes = [8, 128], strides = [1, 1]} : vector<8x512xf32> to vector<8x128xf32>
    %116 = arith.negf %115 : vector<8x128xf32>
    %117 = math.exp %116 : vector<8x128xf32>
    %cst_55 = arith.constant 1.000000e+00 : f32
    %118 = vector.broadcast %cst_55 : f32 to vector<8x128xf32>
    %119 = arith.addf %118, %117 : vector<8x128xf32>
    %120 = arith.divf %118, %119 : vector<8x128xf32>
    %121 = vector.extract_strided_slice %110 {offsets = [0, 128], sizes = [8, 128], strides = [1, 1]} : vector<8x512xf32> to vector<8x128xf32>
    %122 = arith.negf %121 : vector<8x128xf32>
    %123 = math.exp %122 : vector<8x128xf32>
    %cst_56 = arith.constant 1.000000e+00 : f32
    %124 = vector.broadcast %cst_56 : f32 to vector<8x128xf32>
    %125 = arith.addf %124, %123 : vector<8x128xf32>
    %126 = arith.divf %124, %125 : vector<8x128xf32>
    %127 = vector.extract_strided_slice %110 {offsets = [0, 256], sizes = [8, 128], strides = [1, 1]} : vector<8x512xf32> to vector<8x128xf32>
    %128 = math.tanh %127 : vector<8x128xf32>
    %129 = vector.extract_strided_slice %110 {offsets = [0, 384], sizes = [8, 128], strides = [1, 1]} : vector<8x512xf32> to vector<8x128xf32>
    %130 = arith.negf %129 : vector<8x128xf32>
    %131 = math.exp %130 : vector<8x128xf32>
    %cst_57 = arith.constant 1.000000e+00 : f32
    %132 = vector.broadcast %cst_57 : f32 to vector<8x128xf32>
    %133 = arith.addf %132, %131 : vector<8x128xf32>
    %134 = arith.divf %132, %133 : vector<8x128xf32>
    %135 = arith.mulf %126, %112 : vector<8x128xf32>
    %136 = arith.mulf %120, %128 : vector<8x128xf32>
    %137 = arith.addf %135, %136 : vector<8x128xf32>
    %138 = math.tanh %137 : vector<8x128xf32>
    %139 = arith.mulf %134, %138 : vector<8x128xf32>
    %140 = arith.select %114, %137, %112 : vector<8x128xi1>, vector<8x128xf32>
    %141 = arith.select %114, %139, %111 : vector<8x128xi1>, vector<8x128xf32>
    %cst_58 = arith.constant 0.000000e+00 : f32
    %142 = vector.broadcast %cst_58 : f32 to vector<8x128xf32>
    %143 = arith.select %114, %139, %142 : vector<8x128xi1>, vector<8x128xf32>
    %c0_59 = arith.constant 0 : index
    %c0_60 = arith.constant 0 : index
    %144 = vector.load %arg10[%c0_59, %c0_60] : memref<8x128xf32, #tpu.memory_space<vmem>>, vector<8x128xf32>
    tpu.vector_store %arg10[%c0_59, %c0_60], %141 {strides = array<i32>} : memref<8x128xf32, #tpu.memory_space<vmem>>, vector<8x128xf32>,
    %c0_61 = arith.constant 0 : index
    %c0_62 = arith.constant 0 : index
    %145 = vector.load %arg11[%c0_61, %c0_62] : memref<8x128xf32, #tpu.memory_space<vmem>>, vector<8x128xf32>
    tpu.vector_store %arg11[%c0_61, %c0_62], %140 {strides = array<i32>} : memref<8x128xf32, #tpu.memory_space<vmem>>, vector<8x128xf32>,
    %146 = arith.index_cast %c1_i32 : i32 to index
    %c0_63 = arith.constant 0 : index
    %c0_64 = arith.constant 0 : index
    %147 = vector.load %arg6[%146, %c0_63, %c0_64] : memref<8x8x128xf32, #tpu.memory_space<vmem>>, vector<1x8x128xf32>
    %148 = vector.shape_cast %147 : vector<1x8x128xf32> to vector<8x128xf32>
    %149 = vector.shape_cast %143 : vector<8x128xf32> to vector<1x8x128xf32>
    tpu.vector_store %arg6[%146, %c0_63, %c0_64], %149 {strides = array<i32>} : memref<8x8x128xf32, #tpu.memory_space<vmem>>, vector<1x8x128xf32>,
    %c7_i32_65 = arith.constant 7 : i32
    %150 = arith.subi %c7_i32_65, %c1_i32 : i32
    %151 = arith.addi %10, %150 : i32
    %152 = arith.index_cast %150 : i32 to index
    %c0_66 = arith.constant 0 : index
    %c0_67 = arith.constant 0 : index
    %153 = vector.load %arg3[%152, %c0_66, %c0_67] : memref<8x8x512xf32, #tpu.memory_space<vmem>>, vector<1x8x512xf32>
    %154 = vector.shape_cast %153 : vector<1x8x512xf32> to vector<8x512xf32>
    %c0_68 = arith.constant 0 : index
    %c0_69 = arith.constant 0 : index
    %155 = vector.load %arg12[%c0_68, %c0_69] : memref<8x128xf32, #tpu.memory_space<vmem>>, vector<8x128xf32>
    %cst_70 = arith.constant dense<0.000000e+00> : vector<8x512xf32>
    %156 = tpu.matmul %155, %4, %cst_70 {dimension_numbers = #tpu.dot_dimension_numbers<[1], [0], [0], [1], [0, 0, 1, 1], [], []>} : vector<8x128xf32>, vector<128x512xf32>, vector<8x512xf32> -> vector<8x512xf32>
    %157 = arith.addf %154, %156 : vector<8x512xf32>
    %c0_71 = arith.constant 0 : index
    %c0_72 = arith.constant 0 : index
    %158 = vector.load %arg12[%c0_71, %c0_72] : memref<8x128xf32, #tpu.memory_space<vmem>>, vector<8x128xf32>
    %c0_73 = arith.constant 0 : index
    %c0_74 = arith.constant 0 : index
    %159 = vector.load %arg13[%c0_73, %c0_74] : memref<8x128xf32, #tpu.memory_space<vmem>>, vector<8x128xf32>
    %160 = vector.broadcast %151 : i32 to vector<8x128xi32>
    %161 = arith.cmpi sgt, %7, %160 : vector<8x128xi32>
    %162 = vector.extract_strided_slice %157 {offsets = [0, 0], sizes = [8, 128], strides = [1, 1]} : vector<8x512xf32> to vector<8x128xf32>
    %163 = arith.negf %162 : vector<8x128xf32>
    %164 = math.exp %163 : vector<8x128xf32>
    %cst_75 = arith.constant 1.000000e+00 : f32
    %165 = vector.broadcast %cst_75 : f32 to vector<8x128xf32>
    %166 = arith.addf %165, %164 : vector<8x128xf32>
    %167 = arith.divf %165, %166 : vector<8x128xf32>
    %168 = vector.extract_strided_slice %157 {offsets = [0, 128], sizes = [8, 128], strides = [1, 1]} : vector<8x512xf32> to vector<8x128xf32>
    %169 = arith.negf %168 : vector<8x128xf32>
    %170 = math.exp %169 : vector<8x128xf32>
    %cst_76 = arith.constant 1.000000e+00 : f32
    %171 = vector.broadcast %cst_76 : f32 to vector<8x128xf32>
    %172 = arith.addf %171, %170 : vector<8x128xf32>
    %173 = arith.divf %171, %172 : vector<8x128xf32>
    %174 = vector.extract_strided_slice %157 {offsets = [0, 256], sizes = [8, 128], strides = [1, 1]} : vector<8x512xf32> to vector<8x128xf32>
    %175 = math.tanh %174 : vector<8x128xf32>
    %176 = vector.extract_strided_slice %157 {offsets = [0, 384], sizes = [8, 128], strides = [1, 1]} : vector<8x512xf32> to vector<8x128xf32>
    %177 = arith.negf %176 : vector<8x128xf32>
    %178 = math.exp %177 : vector<8x128xf32>
    %cst_77 = arith.constant 1.000000e+00 : f32
    %179 = vector.broadcast %cst_77 : f32 to vector<8x128xf32>
    %180 = arith.addf %179, %178 : vector<8x128xf32>
    %181 = arith.divf %179, %180 : vector<8x128xf32>
    %182 = arith.mulf %173, %159 : vector<8x128xf32>
    %183 = arith.mulf %167, %175 : vector<8x128xf32>
    %184 = arith.addf %182, %183 : vector<8x128xf32>
    %185 = math.tanh %184 : vector<8x128xf32>
    %186 = arith.mulf %181, %185 : vector<8x128xf32>
    %187 = arith.select %161, %184, %159 : vector<8x128xi1>, vector<8x128xf32>
    %188 = arith.select %161, %186, %158 : vector<8x128xi1>, vector<8x128xf32>
    %cst_78 = arith.constant 0.000000e+00 : f32
    %189 = vector.broadcast %cst_78 : f32 to vector<8x128xf32>
    %190 = arith.select %161, %186, %189 : vector<8x128xi1>, vector<8x128xf32>
    %c0_79 = arith.constant 0 : index
    %c0_80 = arith.constant 0 : index
    %191 = vector.load %arg12[%c0_79, %c0_80] : memref<8x128xf32, #tpu.memory_space<vmem>>, vector<8x128xf32>
    tpu.vector_store %arg12[%c0_79, %c0_80], %188 {strides = array<i32>} : memref<8x128xf32, #tpu.memory_space<vmem>>, vector<8x128xf32>,
    %c0_81 = arith.constant 0 : index
    %c0_82 = arith.constant 0 : index
    %192 = vector.load %arg13[%c0_81, %c0_82] : memref<8x128xf32, #tpu.memory_space<vmem>>, vector<8x128xf32>
    tpu.vector_store %arg13[%c0_81, %c0_82], %187 {strides = array<i32>} : memref<8x128xf32, #tpu.memory_space<vmem>>, vector<8x128xf32>,
    %193 = arith.index_cast %150 : i32 to index
    %c0_83 = arith.constant 0 : index
    %c0_84 = arith.constant 0 : index
    %194 = vector.load %arg7[%193, %c0_83, %c0_84] : memref<8x8x128xf32, #tpu.memory_space<vmem>>, vector<1x8x128xf32>
    %195 = vector.shape_cast %194 : vector<1x8x128xf32> to vector<8x128xf32>
    %196 = vector.shape_cast %190 : vector<8x128xf32> to vector<1x8x128xf32>
    tpu.vector_store %arg7[%193, %c0_83, %c0_84], %196 {strides = array<i32>} : memref<8x8x128xf32, #tpu.memory_space<vmem>>, vector<1x8x128xf32>,
    %c2_i32 = arith.constant 2 : i32
    %197 = arith.addi %8, %c2_i32 : i32
    %198 = arith.index_cast %c2_i32 : i32 to index
    %c0_85 = arith.constant 0 : index
    %c0_86 = arith.constant 0 : index
    %199 = vector.load %arg2[%198, %c0_85, %c0_86] : memref<8x8x512xf32, #tpu.memory_space<vmem>>, vector<1x8x512xf32>
    %200 = vector.shape_cast %199 : vector<1x8x512xf32> to vector<8x512xf32>
    %c0_87 = arith.constant 0 : index
    %c0_88 = arith.constant 0 : index
    %201 = vector.load %arg10[%c0_87, %c0_88] : memref<8x128xf32, #tpu.memory_space<vmem>>, vector<8x128xf32>
    %cst_89 = arith.constant dense<0.000000e+00> : vector<8x512xf32>
    %202 = tpu.matmul %201, %3, %cst_89 {dimension_numbers = #tpu.dot_dimension_numbers<[1], [0], [0], [1], [0, 0, 1, 1], [], []>} : vector<8x128xf32>, vector<128x512xf32>, vector<8x512xf32> -> vector<8x512xf32>
    %203 = arith.addf %200, %202 : vector<8x512xf32>
    %c0_90 = arith.constant 0 : index
    %c0_91 = arith.constant 0 : index
    %204 = vector.load %arg10[%c0_90, %c0_91] : memref<8x128xf32, #tpu.memory_space<vmem>>, vector<8x128xf32>
    %c0_92 = arith.constant 0 : index
    %c0_93 = arith.constant 0 : index
    %205 = vector.load %arg11[%c0_92, %c0_93] : memref<8x128xf32, #tpu.memory_space<vmem>>, vector<8x128xf32>
    %206 = vector.broadcast %197 : i32 to vector<8x128xi32>
    %207 = arith.cmpi sgt, %7, %206 : vector<8x128xi32>
    %208 = vector.extract_strided_slice %203 {offsets = [0, 0], sizes = [8, 128], strides = [1, 1]} : vector<8x512xf32> to vector<8x128xf32>
    %209 = arith.negf %208 : vector<8x128xf32>
    %210 = math.exp %209 : vector<8x128xf32>
    %cst_94 = arith.constant 1.000000e+00 : f32
    %211 = vector.broadcast %cst_94 : f32 to vector<8x128xf32>
    %212 = arith.addf %211, %210 : vector<8x128xf32>
    %213 = arith.divf %211, %212 : vector<8x128xf32>
    %214 = vector.extract_strided_slice %203 {offsets = [0, 128], sizes = [8, 128], strides = [1, 1]} : vector<8x512xf32> to vector<8x128xf32>
    %215 = arith.negf %214 : vector<8x128xf32>
    %216 = math.exp %215 : vector<8x128xf32>
    %cst_95 = arith.constant 1.000000e+00 : f32
    %217 = vector.broadcast %cst_95 : f32 to vector<8x128xf32>
    %218 = arith.addf %217, %216 : vector<8x128xf32>
    %219 = arith.divf %217, %218 : vector<8x128xf32>
    %220 = vector.extract_strided_slice %203 {offsets = [0, 256], sizes = [8, 128], strides = [1, 1]} : vector<8x512xf32> to vector<8x128xf32>
    %221 = math.tanh %220 : vector<8x128xf32>
    %222 = vector.extract_strided_slice %203 {offsets = [0, 384], sizes = [8, 128], strides = [1, 1]} : vector<8x512xf32> to vector<8x128xf32>
    %223 = arith.negf %222 : vector<8x128xf32>
    %224 = math.exp %223 : vector<8x128xf32>
    %cst_96 = arith.constant 1.000000e+00 : f32
    %225 = vector.broadcast %cst_96 : f32 to vector<8x128xf32>
    %226 = arith.addf %225, %224 : vector<8x128xf32>
    %227 = arith.divf %225, %226 : vector<8x128xf32>
    %228 = arith.mulf %219, %205 : vector<8x128xf32>
    %229 = arith.mulf %213, %221 : vector<8x128xf32>
    %230 = arith.addf %228, %229 : vector<8x128xf32>
    %231 = math.tanh %230 : vector<8x128xf32>
    %232 = arith.mulf %227, %231 : vector<8x128xf32>
    %233 = arith.select %207, %230, %205 : vector<8x128xi1>, vector<8x128xf32>
    %234 = arith.select %207, %232, %204 : vector<8x128xi1>, vector<8x128xf32>
    %cst_97 = arith.constant 0.000000e+00 : f32
    %235 = vector.broadcast %cst_97 : f32 to vector<8x128xf32>
    %236 = arith.select %207, %232, %235 : vector<8x128xi1>, vector<8x128xf32>
    %c0_98 = arith.constant 0 : index
    %c0_99 = arith.constant 0 : index
    %237 = vector.load %arg10[%c0_98, %c0_99] : memref<8x128xf32, #tpu.memory_space<vmem>>, vector<8x128xf32>
    tpu.vector_store %arg10[%c0_98, %c0_99], %234 {strides = array<i32>} : memref<8x128xf32, #tpu.memory_space<vmem>>, vector<8x128xf32>,
    %c0_100 = arith.constant 0 : index
    %c0_101 = arith.constant 0 : index
    %238 = vector.load %arg11[%c0_100, %c0_101] : memref<8x128xf32, #tpu.memory_space<vmem>>, vector<8x128xf32>
    tpu.vector_store %arg11[%c0_100, %c0_101], %233 {strides = array<i32>} : memref<8x128xf32, #tpu.memory_space<vmem>>, vector<8x128xf32>,
    %239 = arith.index_cast %c2_i32 : i32 to index
    %c0_102 = arith.constant 0 : index
    %c0_103 = arith.constant 0 : index
    %240 = vector.load %arg6[%239, %c0_102, %c0_103] : memref<8x8x128xf32, #tpu.memory_space<vmem>>, vector<1x8x128xf32>
    %241 = vector.shape_cast %240 : vector<1x8x128xf32> to vector<8x128xf32>
    %242 = vector.shape_cast %236 : vector<8x128xf32> to vector<1x8x128xf32>
    tpu.vector_store %arg6[%239, %c0_102, %c0_103], %242 {strides = array<i32>} : memref<8x8x128xf32, #tpu.memory_space<vmem>>, vector<1x8x128xf32>,
    %c7_i32_104 = arith.constant 7 : i32
    %243 = arith.subi %c7_i32_104, %c2_i32 : i32
    %244 = arith.addi %10, %243 : i32
    %245 = arith.index_cast %243 : i32 to index
    %c0_105 = arith.constant 0 : index
    %c0_106 = arith.constant 0 : index
    %246 = vector.load %arg3[%245, %c0_105, %c0_106] : memref<8x8x512xf32, #tpu.memory_space<vmem>>, vector<1x8x512xf32>
    %247 = vector.shape_cast %246 : vector<1x8x512xf32> to vector<8x512xf32>
    %c0_107 = arith.constant 0 : index
    %c0_108 = arith.constant 0 : index
    %248 = vector.load %arg12[%c0_107, %c0_108] : memref<8x128xf32, #tpu.memory_space<vmem>>, vector<8x128xf32>
    %cst_109 = arith.constant dense<0.000000e+00> : vector<8x512xf32>
    %249 = tpu.matmul %248, %4, %cst_109 {dimension_numbers = #tpu.dot_dimension_numbers<[1], [0], [0], [1], [0, 0, 1, 1], [], []>} : vector<8x128xf32>, vector<128x512xf32>, vector<8x512xf32> -> vector<8x512xf32>
    %250 = arith.addf %247, %249 : vector<8x512xf32>
    %c0_110 = arith.constant 0 : index
    %c0_111 = arith.constant 0 : index
    %251 = vector.load %arg12[%c0_110, %c0_111] : memref<8x128xf32, #tpu.memory_space<vmem>>, vector<8x128xf32>
    %c0_112 = arith.constant 0 : index
    %c0_113 = arith.constant 0 : index
    %252 = vector.load %arg13[%c0_112, %c0_113] : memref<8x128xf32, #tpu.memory_space<vmem>>, vector<8x128xf32>
    %253 = vector.broadcast %244 : i32 to vector<8x128xi32>
    %254 = arith.cmpi sgt, %7, %253 : vector<8x128xi32>
    %255 = vector.extract_strided_slice %250 {offsets = [0, 0], sizes = [8, 128], strides = [1, 1]} : vector<8x512xf32> to vector<8x128xf32>
    %256 = arith.negf %255 : vector<8x128xf32>
    %257 = math.exp %256 : vector<8x128xf32>
    %cst_114 = arith.constant 1.000000e+00 : f32
    %258 = vector.broadcast %cst_114 : f32 to vector<8x128xf32>
    %259 = arith.addf %258, %257 : vector<8x128xf32>
    %260 = arith.divf %258, %259 : vector<8x128xf32>
    %261 = vector.extract_strided_slice %250 {offsets = [0, 128], sizes = [8, 128], strides = [1, 1]} : vector<8x512xf32> to vector<8x128xf32>
    %262 = arith.negf %261 : vector<8x128xf32>
    %263 = math.exp %262 : vector<8x128xf32>
    %cst_115 = arith.constant 1.000000e+00 : f32
    %264 = vector.broadcast %cst_115 : f32 to vector<8x128xf32>
    %265 = arith.addf %264, %263 : vector<8x128xf32>
    %266 = arith.divf %264, %265 : vector<8x128xf32>
    %267 = vector.extract_strided_slice %250 {offsets = [0, 256], sizes = [8, 128], strides = [1, 1]} : vector<8x512xf32> to vector<8x128xf32>
    %268 = math.tanh %267 : vector<8x128xf32>
    %269 = vector.extract_strided_slice %250 {offsets = [0, 384], sizes = [8, 128], strides = [1, 1]} : vector<8x512xf32> to vector<8x128xf32>
    %270 = arith.negf %269 : vector<8x128xf32>
    %271 = math.exp %270 : vector<8x128xf32>
    %cst_116 = arith.constant 1.000000e+00 : f32
    %272 = vector.broadcast %cst_116 : f32 to vector<8x128xf32>
    %273 = arith.addf %272, %271 : vector<8x128xf32>
    %274 = arith.divf %272, %273 : vector<8x128xf32>
    %275 = arith.mulf %266, %252 : vector<8x128xf32>
    %276 = arith.mulf %260, %268 : vector<8x128xf32>
    %277 = arith.addf %275, %276 : vector<8x128xf32>
    %278 = math.tanh %277 : vector<8x128xf32>
    %279 = arith.mulf %274, %278 : vector<8x128xf32>
    %280 = arith.select %254, %277, %252 : vector<8x128xi1>, vector<8x128xf32>
    %281 = arith.select %254, %279, %251 : vector<8x128xi1>, vector<8x128xf32>
    %cst_117 = arith.constant 0.000000e+00 : f32
    %282 = vector.broadcast %cst_117 : f32 to vector<8x128xf32>
    %283 = arith.select %254, %279, %282 : vector<8x128xi1>, vector<8x128xf32>
    %c0_118 = arith.constant 0 : index
    %c0_119 = arith.constant 0 : index
    %284 = vector.load %arg12[%c0_118, %c0_119] : memref<8x128xf32, #tpu.memory_space<vmem>>, vector<8x128xf32>
    tpu.vector_store %arg12[%c0_118, %c0_119], %281 {strides = array<i32>} : memref<8x128xf32, #tpu.memory_space<vmem>>, vector<8x128xf32>,
    %c0_120 = arith.constant 0 : index
    %c0_121 = arith.constant 0 : index
    %285 = vector.load %arg13[%c0_120, %c0_121] : memref<8x128xf32, #tpu.memory_space<vmem>>, vector<8x128xf32>
    tpu.vector_store %arg13[%c0_120, %c0_121], %280 {strides = array<i32>} : memref<8x128xf32, #tpu.memory_space<vmem>>, vector<8x128xf32>,
    %286 = arith.index_cast %243 : i32 to index
    %c0_122 = arith.constant 0 : index
    %c0_123 = arith.constant 0 : index
    %287 = vector.load %arg7[%286, %c0_122, %c0_123] : memref<8x8x128xf32, #tpu.memory_space<vmem>>, vector<1x8x128xf32>
    %288 = vector.shape_cast %287 : vector<1x8x128xf32> to vector<8x128xf32>
    %289 = vector.shape_cast %283 : vector<8x128xf32> to vector<1x8x128xf32>
    tpu.vector_store %arg7[%286, %c0_122, %c0_123], %289 {strides = array<i32>} : memref<8x8x128xf32, #tpu.memory_space<vmem>>, vector<1x8x128xf32>,
    %c3_i32 = arith.constant 3 : i32
    %290 = arith.addi %8, %c3_i32 : i32
    %291 = arith.index_cast %c3_i32 : i32 to index
    %c0_124 = arith.constant 0 : index
    %c0_125 = arith.constant 0 : index
    %292 = vector.load %arg2[%291, %c0_124, %c0_125] : memref<8x8x512xf32, #tpu.memory_space<vmem>>, vector<1x8x512xf32>
    %293 = vector.shape_cast %292 : vector<1x8x512xf32> to vector<8x512xf32>
    %c0_126 = arith.constant 0 : index
    %c0_127 = arith.constant 0 : index
    %294 = vector.load %arg10[%c0_126, %c0_127] : memref<8x128xf32, #tpu.memory_space<vmem>>, vector<8x128xf32>
    %cst_128 = arith.constant dense<0.000000e+00> : vector<8x512xf32>
    %295 = tpu.matmul %294, %3, %cst_128 {dimension_numbers = #tpu.dot_dimension_numbers<[1], [0], [0], [1], [0, 0, 1, 1], [], []>} : vector<8x128xf32>, vector<128x512xf32>, vector<8x512xf32> -> vector<8x512xf32>
    %296 = arith.addf %293, %295 : vector<8x512xf32>
    %c0_129 = arith.constant 0 : index
    %c0_130 = arith.constant 0 : index
    %297 = vector.load %arg10[%c0_129, %c0_130] : memref<8x128xf32, #tpu.memory_space<vmem>>, vector<8x128xf32>
    %c0_131 = arith.constant 0 : index
    %c0_132 = arith.constant 0 : index
    %298 = vector.load %arg11[%c0_131, %c0_132] : memref<8x128xf32, #tpu.memory_space<vmem>>, vector<8x128xf32>
    %299 = vector.broadcast %290 : i32 to vector<8x128xi32>
    %300 = arith.cmpi sgt, %7, %299 : vector<8x128xi32>
    %301 = vector.extract_strided_slice %296 {offsets = [0, 0], sizes = [8, 128], strides = [1, 1]} : vector<8x512xf32> to vector<8x128xf32>
    %302 = arith.negf %301 : vector<8x128xf32>
    %303 = math.exp %302 : vector<8x128xf32>
    %cst_133 = arith.constant 1.000000e+00 : f32
    %304 = vector.broadcast %cst_133 : f32 to vector<8x128xf32>
    %305 = arith.addf %304, %303 : vector<8x128xf32>
    %306 = arith.divf %304, %305 : vector<8x128xf32>
    %307 = vector.extract_strided_slice %296 {offsets = [0, 128], sizes = [8, 128], strides = [1, 1]} : vector<8x512xf32> to vector<8x128xf32>
    %308 = arith.negf %307 : vector<8x128xf32>
    %309 = math.exp %308 : vector<8x128xf32>
    %cst_134 = arith.constant 1.000000e+00 : f32
    %310 = vector.broadcast %cst_134 : f32 to vector<8x128xf32>
    %311 = arith.addf %310, %309 : vector<8x128xf32>
    %312 = arith.divf %310, %311 : vector<8x128xf32>
    %313 = vector.extract_strided_slice %296 {offsets = [0, 256], sizes = [8, 128], strides = [1, 1]} : vector<8x512xf32> to vector<8x128xf32>
    %314 = math.tanh %313 : vector<8x128xf32>
    %315 = vector.extract_strided_slice %296 {offsets = [0, 384], sizes = [8, 128], strides = [1, 1]} : vector<8x512xf32> to vector<8x128xf32>
    %316 = arith.negf %315 : vector<8x128xf32>
    %317 = math.exp %316 : vector<8x128xf32>
    %cst_135 = arith.constant 1.000000e+00 : f32
    %318 = vector.broadcast %cst_135 : f32 to vector<8x128xf32>
    %319 = arith.addf %318, %317 : vector<8x128xf32>
    %320 = arith.divf %318, %319 : vector<8x128xf32>
    %321 = arith.mulf %312, %298 : vector<8x128xf32>
    %322 = arith.mulf %306, %314 : vector<8x128xf32>
    %323 = arith.addf %321, %322 : vector<8x128xf32>
    %324 = math.tanh %323 : vector<8x128xf32>
    %325 = arith.mulf %320, %324 : vector<8x128xf32>
    %326 = arith.select %300, %323, %298 : vector<8x128xi1>, vector<8x128xf32>
    %327 = arith.select %300, %325, %297 : vector<8x128xi1>, vector<8x128xf32>
    %cst_136 = arith.constant 0.000000e+00 : f32
    %328 = vector.broadcast %cst_136 : f32 to vector<8x128xf32>
    %329 = arith.select %300, %325, %328 : vector<8x128xi1>, vector<8x128xf32>
    %c0_137 = arith.constant 0 : index
    %c0_138 = arith.constant 0 : index
    %330 = vector.load %arg10[%c0_137, %c0_138] : memref<8x128xf32, #tpu.memory_space<vmem>>, vector<8x128xf32>
    tpu.vector_store %arg10[%c0_137, %c0_138], %327 {strides = array<i32>} : memref<8x128xf32, #tpu.memory_space<vmem>>, vector<8x128xf32>,
    %c0_139 = arith.constant 0 : index
    %c0_140 = arith.constant 0 : index
    %331 = vector.load %arg11[%c0_139, %c0_140] : memref<8x128xf32, #tpu.memory_space<vmem>>, vector<8x128xf32>
    tpu.vector_store %arg11[%c0_139, %c0_140], %326 {strides = array<i32>} : memref<8x128xf32, #tpu.memory_space<vmem>>, vector<8x128xf32>,
    %332 = arith.index_cast %c3_i32 : i32 to index
    %c0_141 = arith.constant 0 : index
    %c0_142 = arith.constant 0 : index
    %333 = vector.load %arg6[%332, %c0_141, %c0_142] : memref<8x8x128xf32, #tpu.memory_space<vmem>>, vector<1x8x128xf32>
    %334 = vector.shape_cast %333 : vector<1x8x128xf32> to vector<8x128xf32>
    %335 = vector.shape_cast %329 : vector<8x128xf32> to vector<1x8x128xf32>
    tpu.vector_store %arg6[%332, %c0_141, %c0_142], %335 {strides = array<i32>} : memref<8x8x128xf32, #tpu.memory_space<vmem>>, vector<1x8x128xf32>,
    %c7_i32_143 = arith.constant 7 : i32
    %336 = arith.subi %c7_i32_143, %c3_i32 : i32
    %337 = arith.addi %10, %336 : i32
    %338 = arith.index_cast %336 : i32 to index
    %c0_144 = arith.constant 0 : index
    %c0_145 = arith.constant 0 : index
    %339 = vector.load %arg3[%338, %c0_144, %c0_145] : memref<8x8x512xf32, #tpu.memory_space<vmem>>, vector<1x8x512xf32>
    %340 = vector.shape_cast %339 : vector<1x8x512xf32> to vector<8x512xf32>
    %c0_146 = arith.constant 0 : index
    %c0_147 = arith.constant 0 : index
    %341 = vector.load %arg12[%c0_146, %c0_147] : memref<8x128xf32, #tpu.memory_space<vmem>>, vector<8x128xf32>
    %cst_148 = arith.constant dense<0.000000e+00> : vector<8x512xf32>
    %342 = tpu.matmul %341, %4, %cst_148 {dimension_numbers = #tpu.dot_dimension_numbers<[1], [0], [0], [1], [0, 0, 1, 1], [], []>} : vector<8x128xf32>, vector<128x512xf32>, vector<8x512xf32> -> vector<8x512xf32>
    %343 = arith.addf %340, %342 : vector<8x512xf32>
    %c0_149 = arith.constant 0 : index
    %c0_150 = arith.constant 0 : index
    %344 = vector.load %arg12[%c0_149, %c0_150] : memref<8x128xf32, #tpu.memory_space<vmem>>, vector<8x128xf32>
    %c0_151 = arith.constant 0 : index
    %c0_152 = arith.constant 0 : index
    %345 = vector.load %arg13[%c0_151, %c0_152] : memref<8x128xf32, #tpu.memory_space<vmem>>, vector<8x128xf32>
    %346 = vector.broadcast %337 : i32 to vector<8x128xi32>
    %347 = arith.cmpi sgt, %7, %346 : vector<8x128xi32>
    %348 = vector.extract_strided_slice %343 {offsets = [0, 0], sizes = [8, 128], strides = [1, 1]} : vector<8x512xf32> to vector<8x128xf32>
    %349 = arith.negf %348 : vector<8x128xf32>
    %350 = math.exp %349 : vector<8x128xf32>
    %cst_153 = arith.constant 1.000000e+00 : f32
    %351 = vector.broadcast %cst_153 : f32 to vector<8x128xf32>
    %352 = arith.addf %351, %350 : vector<8x128xf32>
    %353 = arith.divf %351, %352 : vector<8x128xf32>
    %354 = vector.extract_strided_slice %343 {offsets = [0, 128], sizes = [8, 128], strides = [1, 1]} : vector<8x512xf32> to vector<8x128xf32>
    %355 = arith.negf %354 : vector<8x128xf32>
    %356 = math.exp %355 : vector<8x128xf32>
    %cst_154 = arith.constant 1.000000e+00 : f32
    %357 = vector.broadcast %cst_154 : f32 to vector<8x128xf32>
    %358 = arith.addf %357, %356 : vector<8x128xf32>
    %359 = arith.divf %357, %358 : vector<8x128xf32>
    %360 = vector.extract_strided_slice %343 {offsets = [0, 256], sizes = [8, 128], strides = [1, 1]} : vector<8x512xf32> to vector<8x128xf32>
    %361 = math.tanh %360 : vector<8x128xf32>
    %362 = vector.extract_strided_slice %343 {offsets = [0, 384], sizes = [8, 128], strides = [1, 1]} : vector<8x512xf32> to vector<8x128xf32>
    %363 = arith.negf %362 : vector<8x128xf32>
    %364 = math.exp %363 : vector<8x128xf32>
    %cst_155 = arith.constant 1.000000e+00 : f32
    %365 = vector.broadcast %cst_155 : f32 to vector<8x128xf32>
    %366 = arith.addf %365, %364 : vector<8x128xf32>
    %367 = arith.divf %365, %366 : vector<8x128xf32>
    %368 = arith.mulf %359, %345 : vector<8x128xf32>
    %369 = arith.mulf %353, %361 : vector<8x128xf32>
    %370 = arith.addf %368, %369 : vector<8x128xf32>
    %371 = math.tanh %370 : vector<8x128xf32>
    %372 = arith.mulf %367, %371 : vector<8x128xf32>
    %373 = arith.select %347, %370, %345 : vector<8x128xi1>, vector<8x128xf32>
    %374 = arith.select %347, %372, %344 : vector<8x128xi1>, vector<8x128xf32>
    %cst_156 = arith.constant 0.000000e+00 : f32
    %375 = vector.broadcast %cst_156 : f32 to vector<8x128xf32>
    %376 = arith.select %347, %372, %375 : vector<8x128xi1>, vector<8x128xf32>
    %c0_157 = arith.constant 0 : index
    %c0_158 = arith.constant 0 : index
    %377 = vector.load %arg12[%c0_157, %c0_158] : memref<8x128xf32, #tpu.memory_space<vmem>>, vector<8x128xf32>
    tpu.vector_store %arg12[%c0_157, %c0_158], %374 {strides = array<i32>} : memref<8x128xf32, #tpu.memory_space<vmem>>, vector<8x128xf32>,
    %c0_159 = arith.constant 0 : index
    %c0_160 = arith.constant 0 : index
    %378 = vector.load %arg13[%c0_159, %c0_160] : memref<8x128xf32, #tpu.memory_space<vmem>>, vector<8x128xf32>
    tpu.vector_store %arg13[%c0_159, %c0_160], %373 {strides = array<i32>} : memref<8x128xf32, #tpu.memory_space<vmem>>, vector<8x128xf32>,
    %379 = arith.index_cast %336 : i32 to index
    %c0_161 = arith.constant 0 : index
    %c0_162 = arith.constant 0 : index
    %380 = vector.load %arg7[%379, %c0_161, %c0_162] : memref<8x8x128xf32, #tpu.memory_space<vmem>>, vector<1x8x128xf32>
    %381 = vector.shape_cast %380 : vector<1x8x128xf32> to vector<8x128xf32>
    %382 = vector.shape_cast %376 : vector<8x128xf32> to vector<1x8x128xf32>
    tpu.vector_store %arg7[%379, %c0_161, %c0_162], %382 {strides = array<i32>} : memref<8x8x128xf32, #tpu.memory_space<vmem>>, vector<1x8x128xf32>,
    %c4_i32 = arith.constant 4 : i32
    %383 = arith.addi %8, %c4_i32 : i32
    %384 = arith.index_cast %c4_i32 : i32 to index
    %c0_163 = arith.constant 0 : index
    %c0_164 = arith.constant 0 : index
    %385 = vector.load %arg2[%384, %c0_163, %c0_164] : memref<8x8x512xf32, #tpu.memory_space<vmem>>, vector<1x8x512xf32>
    %386 = vector.shape_cast %385 : vector<1x8x512xf32> to vector<8x512xf32>
    %c0_165 = arith.constant 0 : index
    %c0_166 = arith.constant 0 : index
    %387 = vector.load %arg10[%c0_165, %c0_166] : memref<8x128xf32, #tpu.memory_space<vmem>>, vector<8x128xf32>
    %cst_167 = arith.constant dense<0.000000e+00> : vector<8x512xf32>
    %388 = tpu.matmul %387, %3, %cst_167 {dimension_numbers = #tpu.dot_dimension_numbers<[1], [0], [0], [1], [0, 0, 1, 1], [], []>} : vector<8x128xf32>, vector<128x512xf32>, vector<8x512xf32> -> vector<8x512xf32>
    %389 = arith.addf %386, %388 : vector<8x512xf32>
    %c0_168 = arith.constant 0 : index
    %c0_169 = arith.constant 0 : index
    %390 = vector.load %arg10[%c0_168, %c0_169] : memref<8x128xf32, #tpu.memory_space<vmem>>, vector<8x128xf32>
    %c0_170 = arith.constant 0 : index
    %c0_171 = arith.constant 0 : index
    %391 = vector.load %arg11[%c0_170, %c0_171] : memref<8x128xf32, #tpu.memory_space<vmem>>, vector<8x128xf32>
    %392 = vector.broadcast %383 : i32 to vector<8x128xi32>
    %393 = arith.cmpi sgt, %7, %392 : vector<8x128xi32>
    %394 = vector.extract_strided_slice %389 {offsets = [0, 0], sizes = [8, 128], strides = [1, 1]} : vector<8x512xf32> to vector<8x128xf32>
    %395 = arith.negf %394 : vector<8x128xf32>
    %396 = math.exp %395 : vector<8x128xf32>
    %cst_172 = arith.constant 1.000000e+00 : f32
    %397 = vector.broadcast %cst_172 : f32 to vector<8x128xf32>
    %398 = arith.addf %397, %396 : vector<8x128xf32>
    %399 = arith.divf %397, %398 : vector<8x128xf32>
    %400 = vector.extract_strided_slice %389 {offsets = [0, 128], sizes = [8, 128], strides = [1, 1]} : vector<8x512xf32> to vector<8x128xf32>
    %401 = arith.negf %400 : vector<8x128xf32>
    %402 = math.exp %401 : vector<8x128xf32>
    %cst_173 = arith.constant 1.000000e+00 : f32
    %403 = vector.broadcast %cst_173 : f32 to vector<8x128xf32>
    %404 = arith.addf %403, %402 : vector<8x128xf32>
    %405 = arith.divf %403, %404 : vector<8x128xf32>
    %406 = vector.extract_strided_slice %389 {offsets = [0, 256], sizes = [8, 128], strides = [1, 1]} : vector<8x512xf32> to vector<8x128xf32>
    %407 = math.tanh %406 : vector<8x128xf32>
    %408 = vector.extract_strided_slice %389 {offsets = [0, 384], sizes = [8, 128], strides = [1, 1]} : vector<8x512xf32> to vector<8x128xf32>
    %409 = arith.negf %408 : vector<8x128xf32>
    %410 = math.exp %409 : vector<8x128xf32>
    %cst_174 = arith.constant 1.000000e+00 : f32
    %411 = vector.broadcast %cst_174 : f32 to vector<8x128xf32>
    %412 = arith.addf %411, %410 : vector<8x128xf32>
    %413 = arith.divf %411, %412 : vector<8x128xf32>
    %414 = arith.mulf %405, %391 : vector<8x128xf32>
    %415 = arith.mulf %399, %407 : vector<8x128xf32>
    %416 = arith.addf %414, %415 : vector<8x128xf32>
    %417 = math.tanh %416 : vector<8x128xf32>
    %418 = arith.mulf %413, %417 : vector<8x128xf32>
    %419 = arith.select %393, %416, %391 : vector<8x128xi1>, vector<8x128xf32>
    %420 = arith.select %393, %418, %390 : vector<8x128xi1>, vector<8x128xf32>
    %cst_175 = arith.constant 0.000000e+00 : f32
    %421 = vector.broadcast %cst_175 : f32 to vector<8x128xf32>
    %422 = arith.select %393, %418, %421 : vector<8x128xi1>, vector<8x128xf32>
    %c0_176 = arith.constant 0 : index
    %c0_177 = arith.constant 0 : index
    %423 = vector.load %arg10[%c0_176, %c0_177] : memref<8x128xf32, #tpu.memory_space<vmem>>, vector<8x128xf32>
    tpu.vector_store %arg10[%c0_176, %c0_177], %420 {strides = array<i32>} : memref<8x128xf32, #tpu.memory_space<vmem>>, vector<8x128xf32>,
    %c0_178 = arith.constant 0 : index
    %c0_179 = arith.constant 0 : index
    %424 = vector.load %arg11[%c0_178, %c0_179] : memref<8x128xf32, #tpu.memory_space<vmem>>, vector<8x128xf32>
    tpu.vector_store %arg11[%c0_178, %c0_179], %419 {strides = array<i32>} : memref<8x128xf32, #tpu.memory_space<vmem>>, vector<8x128xf32>,
    %425 = arith.index_cast %c4_i32 : i32 to index
    %c0_180 = arith.constant 0 : index
    %c0_181 = arith.constant 0 : index
    %426 = vector.load %arg6[%425, %c0_180, %c0_181] : memref<8x8x128xf32, #tpu.memory_space<vmem>>, vector<1x8x128xf32>
    %427 = vector.shape_cast %426 : vector<1x8x128xf32> to vector<8x128xf32>
    %428 = vector.shape_cast %422 : vector<8x128xf32> to vector<1x8x128xf32>
    tpu.vector_store %arg6[%425, %c0_180, %c0_181], %428 {strides = array<i32>} : memref<8x8x128xf32, #tpu.memory_space<vmem>>, vector<1x8x128xf32>,
    %c7_i32_182 = arith.constant 7 : i32
    %429 = arith.subi %c7_i32_182, %c4_i32 : i32
    %430 = arith.addi %10, %429 : i32
    %431 = arith.index_cast %429 : i32 to index
    %c0_183 = arith.constant 0 : index
    %c0_184 = arith.constant 0 : index
    %432 = vector.load %arg3[%431, %c0_183, %c0_184] : memref<8x8x512xf32, #tpu.memory_space<vmem>>, vector<1x8x512xf32>
    %433 = vector.shape_cast %432 : vector<1x8x512xf32> to vector<8x512xf32>
    %c0_185 = arith.constant 0 : index
    %c0_186 = arith.constant 0 : index
    %434 = vector.load %arg12[%c0_185, %c0_186] : memref<8x128xf32, #tpu.memory_space<vmem>>, vector<8x128xf32>
    %cst_187 = arith.constant dense<0.000000e+00> : vector<8x512xf32>
    %435 = tpu.matmul %434, %4, %cst_187 {dimension_numbers = #tpu.dot_dimension_numbers<[1], [0], [0], [1], [0, 0, 1, 1], [], []>} : vector<8x128xf32>, vector<128x512xf32>, vector<8x512xf32> -> vector<8x512xf32>
    %436 = arith.addf %433, %435 : vector<8x512xf32>
    %c0_188 = arith.constant 0 : index
    %c0_189 = arith.constant 0 : index
    %437 = vector.load %arg12[%c0_188, %c0_189] : memref<8x128xf32, #tpu.memory_space<vmem>>, vector<8x128xf32>
    %c0_190 = arith.constant 0 : index
    %c0_191 = arith.constant 0 : index
    %438 = vector.load %arg13[%c0_190, %c0_191] : memref<8x128xf32, #tpu.memory_space<vmem>>, vector<8x128xf32>
    %439 = vector.broadcast %430 : i32 to vector<8x128xi32>
    %440 = arith.cmpi sgt, %7, %439 : vector<8x128xi32>
    %441 = vector.extract_strided_slice %436 {offsets = [0, 0], sizes = [8, 128], strides = [1, 1]} : vector<8x512xf32> to vector<8x128xf32>
    %442 = arith.negf %441 : vector<8x128xf32>
    %443 = math.exp %442 : vector<8x128xf32>
    %cst_192 = arith.constant 1.000000e+00 : f32
    %444 = vector.broadcast %cst_192 : f32 to vector<8x128xf32>
    %445 = arith.addf %444, %443 : vector<8x128xf32>
    %446 = arith.divf %444, %445 : vector<8x128xf32>
    %447 = vector.extract_strided_slice %436 {offsets = [0, 128], sizes = [8, 128], strides = [1, 1]} : vector<8x512xf32> to vector<8x128xf32>
    %448 = arith.negf %447 : vector<8x128xf32>
    %449 = math.exp %448 : vector<8x128xf32>
    %cst_193 = arith.constant 1.000000e+00 : f32
    %450 = vector.broadcast %cst_193 : f32 to vector<8x128xf32>
    %451 = arith.addf %450, %449 : vector<8x128xf32>
    %452 = arith.divf %450, %451 : vector<8x128xf32>
    %453 = vector.extract_strided_slice %436 {offsets = [0, 256], sizes = [8, 128], strides = [1, 1]} : vector<8x512xf32> to vector<8x128xf32>
    %454 = math.tanh %453 : vector<8x128xf32>
    %455 = vector.extract_strided_slice %436 {offsets = [0, 384], sizes = [8, 128], strides = [1, 1]} : vector<8x512xf32> to vector<8x128xf32>
    %456 = arith.negf %455 : vector<8x128xf32>
    %457 = math.exp %456 : vector<8x128xf32>
    %cst_194 = arith.constant 1.000000e+00 : f32
    %458 = vector.broadcast %cst_194 : f32 to vector<8x128xf32>
    %459 = arith.addf %458, %457 : vector<8x128xf32>
    %460 = arith.divf %458, %459 : vector<8x128xf32>
    %461 = arith.mulf %452, %438 : vector<8x128xf32>
    %462 = arith.mulf %446, %454 : vector<8x128xf32>
    %463 = arith.addf %461, %462 : vector<8x128xf32>
    %464 = math.tanh %463 : vector<8x128xf32>
    %465 = arith.mulf %460, %464 : vector<8x128xf32>
    %466 = arith.select %440, %463, %438 : vector<8x128xi1>, vector<8x128xf32>
    %467 = arith.select %440, %465, %437 : vector<8x128xi1>, vector<8x128xf32>
    %cst_195 = arith.constant 0.000000e+00 : f32
    %468 = vector.broadcast %cst_195 : f32 to vector<8x128xf32>
    %469 = arith.select %440, %465, %468 : vector<8x128xi1>, vector<8x128xf32>
    %c0_196 = arith.constant 0 : index
    %c0_197 = arith.constant 0 : index
    %470 = vector.load %arg12[%c0_196, %c0_197] : memref<8x128xf32, #tpu.memory_space<vmem>>, vector<8x128xf32>
    tpu.vector_store %arg12[%c0_196, %c0_197], %467 {strides = array<i32>} : memref<8x128xf32, #tpu.memory_space<vmem>>, vector<8x128xf32>,
    %c0_198 = arith.constant 0 : index
    %c0_199 = arith.constant 0 : index
    %471 = vector.load %arg13[%c0_198, %c0_199] : memref<8x128xf32, #tpu.memory_space<vmem>>, vector<8x128xf32>
    tpu.vector_store %arg13[%c0_198, %c0_199], %466 {strides = array<i32>} : memref<8x128xf32, #tpu.memory_space<vmem>>, vector<8x128xf32>,
    %472 = arith.index_cast %429 : i32 to index
    %c0_200 = arith.constant 0 : index
    %c0_201 = arith.constant 0 : index
    %473 = vector.load %arg7[%472, %c0_200, %c0_201] : memref<8x8x128xf32, #tpu.memory_space<vmem>>, vector<1x8x128xf32>
    %474 = vector.shape_cast %473 : vector<1x8x128xf32> to vector<8x128xf32>
    %475 = vector.shape_cast %469 : vector<8x128xf32> to vector<1x8x128xf32>
    tpu.vector_store %arg7[%472, %c0_200, %c0_201], %475 {strides = array<i32>} : memref<8x8x128xf32, #tpu.memory_space<vmem>>, vector<1x8x128xf32>,
    %c5_i32 = arith.constant 5 : i32
    %476 = arith.addi %8, %c5_i32 : i32
    %477 = arith.index_cast %c5_i32 : i32 to index
    %c0_202 = arith.constant 0 : index
    %c0_203 = arith.constant 0 : index
    %478 = vector.load %arg2[%477, %c0_202, %c0_203] : memref<8x8x512xf32, #tpu.memory_space<vmem>>, vector<1x8x512xf32>
    %479 = vector.shape_cast %478 : vector<1x8x512xf32> to vector<8x512xf32>
    %c0_204 = arith.constant 0 : index
    %c0_205 = arith.constant 0 : index
    %480 = vector.load %arg10[%c0_204, %c0_205] : memref<8x128xf32, #tpu.memory_space<vmem>>, vector<8x128xf32>
    %cst_206 = arith.constant dense<0.000000e+00> : vector<8x512xf32>
    %481 = tpu.matmul %480, %3, %cst_206 {dimension_numbers = #tpu.dot_dimension_numbers<[1], [0], [0], [1], [0, 0, 1, 1], [], []>} : vector<8x128xf32>, vector<128x512xf32>, vector<8x512xf32> -> vector<8x512xf32>
    %482 = arith.addf %479, %481 : vector<8x512xf32>
    %c0_207 = arith.constant 0 : index
    %c0_208 = arith.constant 0 : index
    %483 = vector.load %arg10[%c0_207, %c0_208] : memref<8x128xf32, #tpu.memory_space<vmem>>, vector<8x128xf32>
    %c0_209 = arith.constant 0 : index
    %c0_210 = arith.constant 0 : index
    %484 = vector.load %arg11[%c0_209, %c0_210] : memref<8x128xf32, #tpu.memory_space<vmem>>, vector<8x128xf32>
    %485 = vector.broadcast %476 : i32 to vector<8x128xi32>
    %486 = arith.cmpi sgt, %7, %485 : vector<8x128xi32>
    %487 = vector.extract_strided_slice %482 {offsets = [0, 0], sizes = [8, 128], strides = [1, 1]} : vector<8x512xf32> to vector<8x128xf32>
    %488 = arith.negf %487 : vector<8x128xf32>
    %489 = math.exp %488 : vector<8x128xf32>
    %cst_211 = arith.constant 1.000000e+00 : f32
    %490 = vector.broadcast %cst_211 : f32 to vector<8x128xf32>
    %491 = arith.addf %490, %489 : vector<8x128xf32>
    %492 = arith.divf %490, %491 : vector<8x128xf32>
    %493 = vector.extract_strided_slice %482 {offsets = [0, 128], sizes = [8, 128], strides = [1, 1]} : vector<8x512xf32> to vector<8x128xf32>
    %494 = arith.negf %493 : vector<8x128xf32>
    %495 = math.exp %494 : vector<8x128xf32>
    %cst_212 = arith.constant 1.000000e+00 : f32
    %496 = vector.broadcast %cst_212 : f32 to vector<8x128xf32>
    %497 = arith.addf %496, %495 : vector<8x128xf32>
    %498 = arith.divf %496, %497 : vector<8x128xf32>
    %499 = vector.extract_strided_slice %482 {offsets = [0, 256], sizes = [8, 128], strides = [1, 1]} : vector<8x512xf32> to vector<8x128xf32>
    %500 = math.tanh %499 : vector<8x128xf32>
    %501 = vector.extract_strided_slice %482 {offsets = [0, 384], sizes = [8, 128], strides = [1, 1]} : vector<8x512xf32> to vector<8x128xf32>
    %502 = arith.negf %501 : vector<8x128xf32>
    %503 = math.exp %502 : vector<8x128xf32>
    %cst_213 = arith.constant 1.000000e+00 : f32
    %504 = vector.broadcast %cst_213 : f32 to vector<8x128xf32>
    %505 = arith.addf %504, %503 : vector<8x128xf32>
    %506 = arith.divf %504, %505 : vector<8x128xf32>
    %507 = arith.mulf %498, %484 : vector<8x128xf32>
    %508 = arith.mulf %492, %500 : vector<8x128xf32>
    %509 = arith.addf %507, %508 : vector<8x128xf32>
    %510 = math.tanh %509 : vector<8x128xf32>
    %511 = arith.mulf %506, %510 : vector<8x128xf32>
    %512 = arith.select %486, %509, %484 : vector<8x128xi1>, vector<8x128xf32>
    %513 = arith.select %486, %511, %483 : vector<8x128xi1>, vector<8x128xf32>
    %cst_214 = arith.constant 0.000000e+00 : f32
    %514 = vector.broadcast %cst_214 : f32 to vector<8x128xf32>
    %515 = arith.select %486, %511, %514 : vector<8x128xi1>, vector<8x128xf32>
    %c0_215 = arith.constant 0 : index
    %c0_216 = arith.constant 0 : index
    %516 = vector.load %arg10[%c0_215, %c0_216] : memref<8x128xf32, #tpu.memory_space<vmem>>, vector<8x128xf32>
    tpu.vector_store %arg10[%c0_215, %c0_216], %513 {strides = array<i32>} : memref<8x128xf32, #tpu.memory_space<vmem>>, vector<8x128xf32>,
    %c0_217 = arith.constant 0 : index
    %c0_218 = arith.constant 0 : index
    %517 = vector.load %arg11[%c0_217, %c0_218] : memref<8x128xf32, #tpu.memory_space<vmem>>, vector<8x128xf32>
    tpu.vector_store %arg11[%c0_217, %c0_218], %512 {strides = array<i32>} : memref<8x128xf32, #tpu.memory_space<vmem>>, vector<8x128xf32>,
    %518 = arith.index_cast %c5_i32 : i32 to index
    %c0_219 = arith.constant 0 : index
    %c0_220 = arith.constant 0 : index
    %519 = vector.load %arg6[%518, %c0_219, %c0_220] : memref<8x8x128xf32, #tpu.memory_space<vmem>>, vector<1x8x128xf32>
    %520 = vector.shape_cast %519 : vector<1x8x128xf32> to vector<8x128xf32>
    %521 = vector.shape_cast %515 : vector<8x128xf32> to vector<1x8x128xf32>
    tpu.vector_store %arg6[%518, %c0_219, %c0_220], %521 {strides = array<i32>} : memref<8x8x128xf32, #tpu.memory_space<vmem>>, vector<1x8x128xf32>,
    %c7_i32_221 = arith.constant 7 : i32
    %522 = arith.subi %c7_i32_221, %c5_i32 : i32
    %523 = arith.addi %10, %522 : i32
    %524 = arith.index_cast %522 : i32 to index
    %c0_222 = arith.constant 0 : index
    %c0_223 = arith.constant 0 : index
    %525 = vector.load %arg3[%524, %c0_222, %c0_223] : memref<8x8x512xf32, #tpu.memory_space<vmem>>, vector<1x8x512xf32>
    %526 = vector.shape_cast %525 : vector<1x8x512xf32> to vector<8x512xf32>
    %c0_224 = arith.constant 0 : index
    %c0_225 = arith.constant 0 : index
    %527 = vector.load %arg12[%c0_224, %c0_225] : memref<8x128xf32, #tpu.memory_space<vmem>>, vector<8x128xf32>
    %cst_226 = arith.constant dense<0.000000e+00> : vector<8x512xf32>
    %528 = tpu.matmul %527, %4, %cst_226 {dimension_numbers = #tpu.dot_dimension_numbers<[1], [0], [0], [1], [0, 0, 1, 1], [], []>} : vector<8x128xf32>, vector<128x512xf32>, vector<8x512xf32> -> vector<8x512xf32>
    %529 = arith.addf %526, %528 : vector<8x512xf32>
    %c0_227 = arith.constant 0 : index
    %c0_228 = arith.constant 0 : index
    %530 = vector.load %arg12[%c0_227, %c0_228] : memref<8x128xf32, #tpu.memory_space<vmem>>, vector<8x128xf32>
    %c0_229 = arith.constant 0 : index
    %c0_230 = arith.constant 0 : index
    %531 = vector.load %arg13[%c0_229, %c0_230] : memref<8x128xf32, #tpu.memory_space<vmem>>, vector<8x128xf32>
    %532 = vector.broadcast %523 : i32 to vector<8x128xi32>
    %533 = arith.cmpi sgt, %7, %532 : vector<8x128xi32>
    %534 = vector.extract_strided_slice %529 {offsets = [0, 0], sizes = [8, 128], strides = [1, 1]} : vector<8x512xf32> to vector<8x128xf32>
    %535 = arith.negf %534 : vector<8x128xf32>
    %536 = math.exp %535 : vector<8x128xf32>
    %cst_231 = arith.constant 1.000000e+00 : f32
    %537 = vector.broadcast %cst_231 : f32 to vector<8x128xf32>
    %538 = arith.addf %537, %536 : vector<8x128xf32>
    %539 = arith.divf %537, %538 : vector<8x128xf32>
    %540 = vector.extract_strided_slice %529 {offsets = [0, 128], sizes = [8, 128], strides = [1, 1]} : vector<8x512xf32> to vector<8x128xf32>
    %541 = arith.negf %540 : vector<8x128xf32>
    %542 = math.exp %541 : vector<8x128xf32>
    %cst_232 = arith.constant 1.000000e+00 : f32
    %543 = vector.broadcast %cst_232 : f32 to vector<8x128xf32>
    %544 = arith.addf %543, %542 : vector<8x128xf32>
    %545 = arith.divf %543, %544 : vector<8x128xf32>
    %546 = vector.extract_strided_slice %529 {offsets = [0, 256], sizes = [8, 128], strides = [1, 1]} : vector<8x512xf32> to vector<8x128xf32>
    %547 = math.tanh %546 : vector<8x128xf32>
    %548 = vector.extract_strided_slice %529 {offsets = [0, 384], sizes = [8, 128], strides = [1, 1]} : vector<8x512xf32> to vector<8x128xf32>
    %549 = arith.negf %548 : vector<8x128xf32>
    %550 = math.exp %549 : vector<8x128xf32>
    %cst_233 = arith.constant 1.000000e+00 : f32
    %551 = vector.broadcast %cst_233 : f32 to vector<8x128xf32>
    %552 = arith.addf %551, %550 : vector<8x128xf32>
    %553 = arith.divf %551, %552 : vector<8x128xf32>
    %554 = arith.mulf %545, %531 : vector<8x128xf32>
    %555 = arith.mulf %539, %547 : vector<8x128xf32>
    %556 = arith.addf %554, %555 : vector<8x128xf32>
    %557 = math.tanh %556 : vector<8x128xf32>
    %558 = arith.mulf %553, %557 : vector<8x128xf32>
    %559 = arith.select %533, %556, %531 : vector<8x128xi1>, vector<8x128xf32>
    %560 = arith.select %533, %558, %530 : vector<8x128xi1>, vector<8x128xf32>
    %cst_234 = arith.constant 0.000000e+00 : f32
    %561 = vector.broadcast %cst_234 : f32 to vector<8x128xf32>
    %562 = arith.select %533, %558, %561 : vector<8x128xi1>, vector<8x128xf32>
    %c0_235 = arith.constant 0 : index
    %c0_236 = arith.constant 0 : index
    %563 = vector.load %arg12[%c0_235, %c0_236] : memref<8x128xf32, #tpu.memory_space<vmem>>, vector<8x128xf32>
    tpu.vector_store %arg12[%c0_235, %c0_236], %560 {strides = array<i32>} : memref<8x128xf32, #tpu.memory_space<vmem>>, vector<8x128xf32>,
    %c0_237 = arith.constant 0 : index
    %c0_238 = arith.constant 0 : index
    %564 = vector.load %arg13[%c0_237, %c0_238] : memref<8x128xf32, #tpu.memory_space<vmem>>, vector<8x128xf32>
    tpu.vector_store %arg13[%c0_237, %c0_238], %559 {strides = array<i32>} : memref<8x128xf32, #tpu.memory_space<vmem>>, vector<8x128xf32>,
    %565 = arith.index_cast %522 : i32 to index
    %c0_239 = arith.constant 0 : index
    %c0_240 = arith.constant 0 : index
    %566 = vector.load %arg7[%565, %c0_239, %c0_240] : memref<8x8x128xf32, #tpu.memory_space<vmem>>, vector<1x8x128xf32>
    %567 = vector.shape_cast %566 : vector<1x8x128xf32> to vector<8x128xf32>
    %568 = vector.shape_cast %562 : vector<8x128xf32> to vector<1x8x128xf32>
    tpu.vector_store %arg7[%565, %c0_239, %c0_240], %568 {strides = array<i32>} : memref<8x8x128xf32, #tpu.memory_space<vmem>>, vector<1x8x128xf32>,
    %c6_i32 = arith.constant 6 : i32
    %569 = arith.addi %8, %c6_i32 : i32
    %570 = arith.index_cast %c6_i32 : i32 to index
    %c0_241 = arith.constant 0 : index
    %c0_242 = arith.constant 0 : index
    %571 = vector.load %arg2[%570, %c0_241, %c0_242] : memref<8x8x512xf32, #tpu.memory_space<vmem>>, vector<1x8x512xf32>
    %572 = vector.shape_cast %571 : vector<1x8x512xf32> to vector<8x512xf32>
    %c0_243 = arith.constant 0 : index
    %c0_244 = arith.constant 0 : index
    %573 = vector.load %arg10[%c0_243, %c0_244] : memref<8x128xf32, #tpu.memory_space<vmem>>, vector<8x128xf32>
    %cst_245 = arith.constant dense<0.000000e+00> : vector<8x512xf32>
    %574 = tpu.matmul %573, %3, %cst_245 {dimension_numbers = #tpu.dot_dimension_numbers<[1], [0], [0], [1], [0, 0, 1, 1], [], []>} : vector<8x128xf32>, vector<128x512xf32>, vector<8x512xf32> -> vector<8x512xf32>
    %575 = arith.addf %572, %574 : vector<8x512xf32>
    %c0_246 = arith.constant 0 : index
    %c0_247 = arith.constant 0 : index
    %576 = vector.load %arg10[%c0_246, %c0_247] : memref<8x128xf32, #tpu.memory_space<vmem>>, vector<8x128xf32>
    %c0_248 = arith.constant 0 : index
    %c0_249 = arith.constant 0 : index
    %577 = vector.load %arg11[%c0_248, %c0_249] : memref<8x128xf32, #tpu.memory_space<vmem>>, vector<8x128xf32>
    %578 = vector.broadcast %569 : i32 to vector<8x128xi32>
    %579 = arith.cmpi sgt, %7, %578 : vector<8x128xi32>
    %580 = vector.extract_strided_slice %575 {offsets = [0, 0], sizes = [8, 128], strides = [1, 1]} : vector<8x512xf32> to vector<8x128xf32>
    %581 = arith.negf %580 : vector<8x128xf32>
    %582 = math.exp %581 : vector<8x128xf32>
    %cst_250 = arith.constant 1.000000e+00 : f32
    %583 = vector.broadcast %cst_250 : f32 to vector<8x128xf32>
    %584 = arith.addf %583, %582 : vector<8x128xf32>
    %585 = arith.divf %583, %584 : vector<8x128xf32>
    %586 = vector.extract_strided_slice %575 {offsets = [0, 128], sizes = [8, 128], strides = [1, 1]} : vector<8x512xf32> to vector<8x128xf32>
    %587 = arith.negf %586 : vector<8x128xf32>
    %588 = math.exp %587 : vector<8x128xf32>
    %cst_251 = arith.constant 1.000000e+00 : f32
    %589 = vector.broadcast %cst_251 : f32 to vector<8x128xf32>
    %590 = arith.addf %589, %588 : vector<8x128xf32>
    %591 = arith.divf %589, %590 : vector<8x128xf32>
    %592 = vector.extract_strided_slice %575 {offsets = [0, 256], sizes = [8, 128], strides = [1, 1]} : vector<8x512xf32> to vector<8x128xf32>
    %593 = math.tanh %592 : vector<8x128xf32>
    %594 = vector.extract_strided_slice %575 {offsets = [0, 384], sizes = [8, 128], strides = [1, 1]} : vector<8x512xf32> to vector<8x128xf32>
    %595 = arith.negf %594 : vector<8x128xf32>
    %596 = math.exp %595 : vector<8x128xf32>
    %cst_252 = arith.constant 1.000000e+00 : f32
    %597 = vector.broadcast %cst_252 : f32 to vector<8x128xf32>
    %598 = arith.addf %597, %596 : vector<8x128xf32>
    %599 = arith.divf %597, %598 : vector<8x128xf32>
    %600 = arith.mulf %591, %577 : vector<8x128xf32>
    %601 = arith.mulf %585, %593 : vector<8x128xf32>
    %602 = arith.addf %600, %601 : vector<8x128xf32>
    %603 = math.tanh %602 : vector<8x128xf32>
    %604 = arith.mulf %599, %603 : vector<8x128xf32>
    %605 = arith.select %579, %602, %577 : vector<8x128xi1>, vector<8x128xf32>
    %606 = arith.select %579, %604, %576 : vector<8x128xi1>, vector<8x128xf32>
    %cst_253 = arith.constant 0.000000e+00 : f32
    %607 = vector.broadcast %cst_253 : f32 to vector<8x128xf32>
    %608 = arith.select %579, %604, %607 : vector<8x128xi1>, vector<8x128xf32>
    %c0_254 = arith.constant 0 : index
    %c0_255 = arith.constant 0 : index
    %609 = vector.load %arg10[%c0_254, %c0_255] : memref<8x128xf32, #tpu.memory_space<vmem>>, vector<8x128xf32>
    tpu.vector_store %arg10[%c0_254, %c0_255], %606 {strides = array<i32>} : memref<8x128xf32, #tpu.memory_space<vmem>>, vector<8x128xf32>,
    %c0_256 = arith.constant 0 : index
    %c0_257 = arith.constant 0 : index
    %610 = vector.load %arg11[%c0_256, %c0_257] : memref<8x128xf32, #tpu.memory_space<vmem>>, vector<8x128xf32>
    tpu.vector_store %arg11[%c0_256, %c0_257], %605 {strides = array<i32>} : memref<8x128xf32, #tpu.memory_space<vmem>>, vector<8x128xf32>,
    %611 = arith.index_cast %c6_i32 : i32 to index
    %c0_258 = arith.constant 0 : index
    %c0_259 = arith.constant 0 : index
    %612 = vector.load %arg6[%611, %c0_258, %c0_259] : memref<8x8x128xf32, #tpu.memory_space<vmem>>, vector<1x8x128xf32>
    %613 = vector.shape_cast %612 : vector<1x8x128xf32> to vector<8x128xf32>
    %614 = vector.shape_cast %608 : vector<8x128xf32> to vector<1x8x128xf32>
    tpu.vector_store %arg6[%611, %c0_258, %c0_259], %614 {strides = array<i32>} : memref<8x8x128xf32, #tpu.memory_space<vmem>>, vector<1x8x128xf32>,
    %c7_i32_260 = arith.constant 7 : i32
    %615 = arith.subi %c7_i32_260, %c6_i32 : i32
    %616 = arith.addi %10, %615 : i32
    %617 = arith.index_cast %615 : i32 to index
    %c0_261 = arith.constant 0 : index
    %c0_262 = arith.constant 0 : index
    %618 = vector.load %arg3[%617, %c0_261, %c0_262] : memref<8x8x512xf32, #tpu.memory_space<vmem>>, vector<1x8x512xf32>
    %619 = vector.shape_cast %618 : vector<1x8x512xf32> to vector<8x512xf32>
    %c0_263 = arith.constant 0 : index
    %c0_264 = arith.constant 0 : index
    %620 = vector.load %arg12[%c0_263, %c0_264] : memref<8x128xf32, #tpu.memory_space<vmem>>, vector<8x128xf32>
    %cst_265 = arith.constant dense<0.000000e+00> : vector<8x512xf32>
    %621 = tpu.matmul %620, %4, %cst_265 {dimension_numbers = #tpu.dot_dimension_numbers<[1], [0], [0], [1], [0, 0, 1, 1], [], []>} : vector<8x128xf32>, vector<128x512xf32>, vector<8x512xf32> -> vector<8x512xf32>
    %622 = arith.addf %619, %621 : vector<8x512xf32>
    %c0_266 = arith.constant 0 : index
    %c0_267 = arith.constant 0 : index
    %623 = vector.load %arg12[%c0_266, %c0_267] : memref<8x128xf32, #tpu.memory_space<vmem>>, vector<8x128xf32>
    %c0_268 = arith.constant 0 : index
    %c0_269 = arith.constant 0 : index
    %624 = vector.load %arg13[%c0_268, %c0_269] : memref<8x128xf32, #tpu.memory_space<vmem>>, vector<8x128xf32>
    %625 = vector.broadcast %616 : i32 to vector<8x128xi32>
    %626 = arith.cmpi sgt, %7, %625 : vector<8x128xi32>
    %627 = vector.extract_strided_slice %622 {offsets = [0, 0], sizes = [8, 128], strides = [1, 1]} : vector<8x512xf32> to vector<8x128xf32>
    %628 = arith.negf %627 : vector<8x128xf32>
    %629 = math.exp %628 : vector<8x128xf32>
    %cst_270 = arith.constant 1.000000e+00 : f32
    %630 = vector.broadcast %cst_270 : f32 to vector<8x128xf32>
    %631 = arith.addf %630, %629 : vector<8x128xf32>
    %632 = arith.divf %630, %631 : vector<8x128xf32>
    %633 = vector.extract_strided_slice %622 {offsets = [0, 128], sizes = [8, 128], strides = [1, 1]} : vector<8x512xf32> to vector<8x128xf32>
    %634 = arith.negf %633 : vector<8x128xf32>
    %635 = math.exp %634 : vector<8x128xf32>
    %cst_271 = arith.constant 1.000000e+00 : f32
    %636 = vector.broadcast %cst_271 : f32 to vector<8x128xf32>
    %637 = arith.addf %636, %635 : vector<8x128xf32>
    %638 = arith.divf %636, %637 : vector<8x128xf32>
    %639 = vector.extract_strided_slice %622 {offsets = [0, 256], sizes = [8, 128], strides = [1, 1]} : vector<8x512xf32> to vector<8x128xf32>
    %640 = math.tanh %639 : vector<8x128xf32>
    %641 = vector.extract_strided_slice %622 {offsets = [0, 384], sizes = [8, 128], strides = [1, 1]} : vector<8x512xf32> to vector<8x128xf32>
    %642 = arith.negf %641 : vector<8x128xf32>
    %643 = math.exp %642 : vector<8x128xf32>
    %cst_272 = arith.constant 1.000000e+00 : f32
    %644 = vector.broadcast %cst_272 : f32 to vector<8x128xf32>
    %645 = arith.addf %644, %643 : vector<8x128xf32>
    %646 = arith.divf %644, %645 : vector<8x128xf32>
    %647 = arith.mulf %638, %624 : vector<8x128xf32>
    %648 = arith.mulf %632, %640 : vector<8x128xf32>
    %649 = arith.addf %647, %648 : vector<8x128xf32>
    %650 = math.tanh %649 : vector<8x128xf32>
    %651 = arith.mulf %646, %650 : vector<8x128xf32>
    %652 = arith.select %626, %649, %624 : vector<8x128xi1>, vector<8x128xf32>
    %653 = arith.select %626, %651, %623 : vector<8x128xi1>, vector<8x128xf32>
    %cst_273 = arith.constant 0.000000e+00 : f32
    %654 = vector.broadcast %cst_273 : f32 to vector<8x128xf32>
    %655 = arith.select %626, %651, %654 : vector<8x128xi1>, vector<8x128xf32>
    %c0_274 = arith.constant 0 : index
    %c0_275 = arith.constant 0 : index
    %656 = vector.load %arg12[%c0_274, %c0_275] : memref<8x128xf32, #tpu.memory_space<vmem>>, vector<8x128xf32>
    tpu.vector_store %arg12[%c0_274, %c0_275], %653 {strides = array<i32>} : memref<8x128xf32, #tpu.memory_space<vmem>>, vector<8x128xf32>,
    %c0_276 = arith.constant 0 : index
    %c0_277 = arith.constant 0 : index
    %657 = vector.load %arg13[%c0_276, %c0_277] : memref<8x128xf32, #tpu.memory_space<vmem>>, vector<8x128xf32>
    tpu.vector_store %arg13[%c0_276, %c0_277], %652 {strides = array<i32>} : memref<8x128xf32, #tpu.memory_space<vmem>>, vector<8x128xf32>,
    %658 = arith.index_cast %615 : i32 to index
    %c0_278 = arith.constant 0 : index
    %c0_279 = arith.constant 0 : index
    %659 = vector.load %arg7[%658, %c0_278, %c0_279] : memref<8x8x128xf32, #tpu.memory_space<vmem>>, vector<1x8x128xf32>
    %660 = vector.shape_cast %659 : vector<1x8x128xf32> to vector<8x128xf32>
    %661 = vector.shape_cast %655 : vector<8x128xf32> to vector<1x8x128xf32>
    tpu.vector_store %arg7[%658, %c0_278, %c0_279], %661 {strides = array<i32>} : memref<8x8x128xf32, #tpu.memory_space<vmem>>, vector<1x8x128xf32>,
    %c7_i32_280 = arith.constant 7 : i32
    %662 = arith.addi %8, %c7_i32_280 : i32
    %663 = arith.index_cast %c7_i32_280 : i32 to index
    %c0_281 = arith.constant 0 : index
    %c0_282 = arith.constant 0 : index
    %664 = vector.load %arg2[%663, %c0_281, %c0_282] : memref<8x8x512xf32, #tpu.memory_space<vmem>>, vector<1x8x512xf32>
    %665 = vector.shape_cast %664 : vector<1x8x512xf32> to vector<8x512xf32>
    %c0_283 = arith.constant 0 : index
    %c0_284 = arith.constant 0 : index
    %666 = vector.load %arg10[%c0_283, %c0_284] : memref<8x128xf32, #tpu.memory_space<vmem>>, vector<8x128xf32>
    %cst_285 = arith.constant dense<0.000000e+00> : vector<8x512xf32>
    %667 = tpu.matmul %666, %3, %cst_285 {dimension_numbers = #tpu.dot_dimension_numbers<[1], [0], [0], [1], [0, 0, 1, 1], [], []>} : vector<8x128xf32>, vector<128x512xf32>, vector<8x512xf32> -> vector<8x512xf32>
    %668 = arith.addf %665, %667 : vector<8x512xf32>
    %c0_286 = arith.constant 0 : index
    %c0_287 = arith.constant 0 : index
    %669 = vector.load %arg10[%c0_286, %c0_287] : memref<8x128xf32, #tpu.memory_space<vmem>>, vector<8x128xf32>
    %c0_288 = arith.constant 0 : index
    %c0_289 = arith.constant 0 : index
    %670 = vector.load %arg11[%c0_288, %c0_289] : memref<8x128xf32, #tpu.memory_space<vmem>>, vector<8x128xf32>
    %671 = vector.broadcast %662 : i32 to vector<8x128xi32>
    %672 = arith.cmpi sgt, %7, %671 : vector<8x128xi32>
    %673 = vector.extract_strided_slice %668 {offsets = [0, 0], sizes = [8, 128], strides = [1, 1]} : vector<8x512xf32> to vector<8x128xf32>
    %674 = arith.negf %673 : vector<8x128xf32>
    %675 = math.exp %674 : vector<8x128xf32>
    %cst_290 = arith.constant 1.000000e+00 : f32
    %676 = vector.broadcast %cst_290 : f32 to vector<8x128xf32>
    %677 = arith.addf %676, %675 : vector<8x128xf32>
    %678 = arith.divf %676, %677 : vector<8x128xf32>
    %679 = vector.extract_strided_slice %668 {offsets = [0, 128], sizes = [8, 128], strides = [1, 1]} : vector<8x512xf32> to vector<8x128xf32>
    %680 = arith.negf %679 : vector<8x128xf32>
    %681 = math.exp %680 : vector<8x128xf32>
    %cst_291 = arith.constant 1.000000e+00 : f32
    %682 = vector.broadcast %cst_291 : f32 to vector<8x128xf32>
    %683 = arith.addf %682, %681 : vector<8x128xf32>
    %684 = arith.divf %682, %683 : vector<8x128xf32>
    %685 = vector.extract_strided_slice %668 {offsets = [0, 256], sizes = [8, 128], strides = [1, 1]} : vector<8x512xf32> to vector<8x128xf32>
    %686 = math.tanh %685 : vector<8x128xf32>
    %687 = vector.extract_strided_slice %668 {offsets = [0, 384], sizes = [8, 128], strides = [1, 1]} : vector<8x512xf32> to vector<8x128xf32>
    %688 = arith.negf %687 : vector<8x128xf32>
    %689 = math.exp %688 : vector<8x128xf32>
    %cst_292 = arith.constant 1.000000e+00 : f32
    %690 = vector.broadcast %cst_292 : f32 to vector<8x128xf32>
    %691 = arith.addf %690, %689 : vector<8x128xf32>
    %692 = arith.divf %690, %691 : vector<8x128xf32>
    %693 = arith.mulf %684, %670 : vector<8x128xf32>
    %694 = arith.mulf %678, %686 : vector<8x128xf32>
    %695 = arith.addf %693, %694 : vector<8x128xf32>
    %696 = math.tanh %695 : vector<8x128xf32>
    %697 = arith.mulf %692, %696 : vector<8x128xf32>
    %698 = arith.select %672, %695, %670 : vector<8x128xi1>, vector<8x128xf32>
    %699 = arith.select %672, %697, %669 : vector<8x128xi1>, vector<8x128xf32>
    %cst_293 = arith.constant 0.000000e+00 : f32
    %700 = vector.broadcast %cst_293 : f32 to vector<8x128xf32>
    %701 = arith.select %672, %697, %700 : vector<8x128xi1>, vector<8x128xf32>
    %c0_294 = arith.constant 0 : index
    %c0_295 = arith.constant 0 : index
    %702 = vector.load %arg10[%c0_294, %c0_295] : memref<8x128xf32, #tpu.memory_space<vmem>>, vector<8x128xf32>
    tpu.vector_store %arg10[%c0_294, %c0_295], %699 {strides = array<i32>} : memref<8x128xf32, #tpu.memory_space<vmem>>, vector<8x128xf32>,
    %c0_296 = arith.constant 0 : index
    %c0_297 = arith.constant 0 : index
    %703 = vector.load %arg11[%c0_296, %c0_297] : memref<8x128xf32, #tpu.memory_space<vmem>>, vector<8x128xf32>
    tpu.vector_store %arg11[%c0_296, %c0_297], %698 {strides = array<i32>} : memref<8x128xf32, #tpu.memory_space<vmem>>, vector<8x128xf32>,
    %704 = arith.index_cast %c7_i32_280 : i32 to index
    %c0_298 = arith.constant 0 : index
    %c0_299 = arith.constant 0 : index
    %705 = vector.load %arg6[%704, %c0_298, %c0_299] : memref<8x8x128xf32, #tpu.memory_space<vmem>>, vector<1x8x128xf32>
    %706 = vector.shape_cast %705 : vector<1x8x128xf32> to vector<8x128xf32>
    %707 = vector.shape_cast %701 : vector<8x128xf32> to vector<1x8x128xf32>
    tpu.vector_store %arg6[%704, %c0_298, %c0_299], %707 {strides = array<i32>} : memref<8x8x128xf32, #tpu.memory_space<vmem>>, vector<1x8x128xf32>,
    %c7_i32_300 = arith.constant 7 : i32
    %708 = arith.subi %c7_i32_300, %c7_i32_280 : i32
    %709 = arith.addi %10, %708 : i32
    %710 = arith.index_cast %708 : i32 to index
    %c0_301 = arith.constant 0 : index
    %c0_302 = arith.constant 0 : index
    %711 = vector.load %arg3[%710, %c0_301, %c0_302] : memref<8x8x512xf32, #tpu.memory_space<vmem>>, vector<1x8x512xf32>
    %712 = vector.shape_cast %711 : vector<1x8x512xf32> to vector<8x512xf32>
    %c0_303 = arith.constant 0 : index
    %c0_304 = arith.constant 0 : index
    %713 = vector.load %arg12[%c0_303, %c0_304] : memref<8x128xf32, #tpu.memory_space<vmem>>, vector<8x128xf32>
    %cst_305 = arith.constant dense<0.000000e+00> : vector<8x512xf32>
    %714 = tpu.matmul %713, %4, %cst_305 {dimension_numbers = #tpu.dot_dimension_numbers<[1], [0], [0], [1], [0, 0, 1, 1], [], []>} : vector<8x128xf32>, vector<128x512xf32>, vector<8x512xf32> -> vector<8x512xf32>
    %715 = arith.addf %712, %714 : vector<8x512xf32>
    %c0_306 = arith.constant 0 : index
    %c0_307 = arith.constant 0 : index
    %716 = vector.load %arg12[%c0_306, %c0_307] : memref<8x128xf32, #tpu.memory_space<vmem>>, vector<8x128xf32>
    %c0_308 = arith.constant 0 : index
    %c0_309 = arith.constant 0 : index
    %717 = vector.load %arg13[%c0_308, %c0_309] : memref<8x128xf32, #tpu.memory_space<vmem>>, vector<8x128xf32>
    %718 = vector.broadcast %709 : i32 to vector<8x128xi32>
    %719 = arith.cmpi sgt, %7, %718 : vector<8x128xi32>
    %720 = vector.extract_strided_slice %715 {offsets = [0, 0], sizes = [8, 128], strides = [1, 1]} : vector<8x512xf32> to vector<8x128xf32>
    %721 = arith.negf %720 : vector<8x128xf32>
    %722 = math.exp %721 : vector<8x128xf32>
    %cst_310 = arith.constant 1.000000e+00 : f32
    %723 = vector.broadcast %cst_310 : f32 to vector<8x128xf32>
    %724 = arith.addf %723, %722 : vector<8x128xf32>
    %725 = arith.divf %723, %724 : vector<8x128xf32>
    %726 = vector.extract_strided_slice %715 {offsets = [0, 128], sizes = [8, 128], strides = [1, 1]} : vector<8x512xf32> to vector<8x128xf32>
    %727 = arith.negf %726 : vector<8x128xf32>
    %728 = math.exp %727 : vector<8x128xf32>
    %cst_311 = arith.constant 1.000000e+00 : f32
    %729 = vector.broadcast %cst_311 : f32 to vector<8x128xf32>
    %730 = arith.addf %729, %728 : vector<8x128xf32>
    %731 = arith.divf %729, %730 : vector<8x128xf32>
    %732 = vector.extract_strided_slice %715 {offsets = [0, 256], sizes = [8, 128], strides = [1, 1]} : vector<8x512xf32> to vector<8x128xf32>
    %733 = math.tanh %732 : vector<8x128xf32>
    %734 = vector.extract_strided_slice %715 {offsets = [0, 384], sizes = [8, 128], strides = [1, 1]} : vector<8x512xf32> to vector<8x128xf32>
    %735 = arith.negf %734 : vector<8x128xf32>
    %736 = math.exp %735 : vector<8x128xf32>
    %cst_312 = arith.constant 1.000000e+00 : f32
    %737 = vector.broadcast %cst_312 : f32 to vector<8x128xf32>
    %738 = arith.addf %737, %736 : vector<8x128xf32>
    %739 = arith.divf %737, %738 : vector<8x128xf32>
    %740 = arith.mulf %731, %717 : vector<8x128xf32>
    %741 = arith.mulf %725, %733 : vector<8x128xf32>
    %742 = arith.addf %740, %741 : vector<8x128xf32>
    %743 = math.tanh %742 : vector<8x128xf32>
    %744 = arith.mulf %739, %743 : vector<8x128xf32>
    %745 = arith.select %719, %742, %717 : vector<8x128xi1>, vector<8x128xf32>
    %746 = arith.select %719, %744, %716 : vector<8x128xi1>, vector<8x128xf32>
    %cst_313 = arith.constant 0.000000e+00 : f32
    %747 = vector.broadcast %cst_313 : f32 to vector<8x128xf32>
    %748 = arith.select %719, %744, %747 : vector<8x128xi1>, vector<8x128xf32>
    %c0_314 = arith.constant 0 : index
    %c0_315 = arith.constant 0 : index
    %749 = vector.load %arg12[%c0_314, %c0_315] : memref<8x128xf32, #tpu.memory_space<vmem>>, vector<8x128xf32>
    tpu.vector_store %arg12[%c0_314, %c0_315], %746 {strides = array<i32>} : memref<8x128xf32, #tpu.memory_space<vmem>>, vector<8x128xf32>,
    %c0_316 = arith.constant 0 : index
    %c0_317 = arith.constant 0 : index
    %750 = vector.load %arg13[%c0_316, %c0_317] : memref<8x128xf32, #tpu.memory_space<vmem>>, vector<8x128xf32>
    tpu.vector_store %arg13[%c0_316, %c0_317], %745 {strides = array<i32>} : memref<8x128xf32, #tpu.memory_space<vmem>>, vector<8x128xf32>,
    %751 = arith.index_cast %708 : i32 to index
    %c0_318 = arith.constant 0 : index
    %c0_319 = arith.constant 0 : index
    %752 = vector.load %arg7[%751, %c0_318, %c0_319] : memref<8x8x128xf32, #tpu.memory_space<vmem>>, vector<1x8x128xf32>
    %753 = vector.shape_cast %752 : vector<1x8x128xf32> to vector<8x128xf32>
    %754 = vector.shape_cast %748 : vector<8x128xf32> to vector<1x8x128xf32>
    tpu.vector_store %arg7[%751, %c0_318, %c0_319], %754 {strides = array<i32>} : memref<8x8x128xf32, #tpu.memory_space<vmem>>, vector<1x8x128xf32>,
    %c8_i32_320 = arith.constant 8 : i32
    %c0_i32_321 = arith.constant 0 : i32
    %755 = arith.cmpi eq, %arg0, %c0_i32_321 : i32
    %756 = arith.extui %755 : i1 to i32
    %c0_i32_322 = arith.constant 0 : i32
    %757 = arith.cmpi ne, %756, %c0_i32_322 : i32
    scf.if %757 {
      %c0_323 = arith.constant 0 : index
      %c0_324 = arith.constant 0 : index
      %758 = vector.load %arg10[%c0_323, %c0_324] : memref<8x128xf32, #tpu.memory_space<vmem>>, vector<8x128xf32>
      %c0_325 = arith.constant 0 : index
      %c0_326 = arith.constant 0 : index
      %759 = vector.load %arg8[%c0_325, %c0_326] : memref<8x128xf32, #tpu.memory_space<vmem>>, vector<8x128xf32>
      tpu.vector_store %arg8[%c0_325, %c0_326], %758 {strides = array<i32>} : memref<8x128xf32, #tpu.memory_space<vmem>>, vector<8x128xf32>,
      %c0_327 = arith.constant 0 : index
      %c0_328 = arith.constant 0 : index
      %760 = vector.load %arg12[%c0_327, %c0_328] : memref<8x128xf32, #tpu.memory_space<vmem>>, vector<8x128xf32>
      %c0_329 = arith.constant 0 : index
      %c0_330 = arith.constant 0 : index
      %761 = vector.load %arg9[%c0_329, %c0_330] : memref<8x128xf32, #tpu.memory_space<vmem>>, vector<8x128xf32>
      tpu.vector_store %arg9[%c0_329, %c0_330], %760 {strides = array<i32>} : memref<8x128xf32, #tpu.memory_space<vmem>>, vector<8x128xf32>,
    } else {
    }
    return
  }
  func.func @transform_0(%arg0: i32) -> (i32, i32) {
    %c0_i32 = arith.constant 0 : i32
    %c0_i32_0 = arith.constant 0 : i32
    %c0_i32_1 = arith.constant 0 : i32
    return %c0_i32, %c0_i32_0 : i32, i32
  }
  func.func @transform_1(%arg0: i32) -> (i32, i32, i32) {
    %c0_i32 = arith.constant 0 : i32
    %c0_i32_0 = arith.constant 0 : i32
    %c0_i32_1 = arith.constant 0 : i32
    return %arg0, %c0_i32, %c0_i32_0 : i32, i32, i32
  }
  func.func @transform_2(%arg0: i32) -> (i32, i32, i32) {
    %c0_i32 = arith.constant 0 : i32
    %0 = arith.subi %c0_i32, %arg0 : i32
    %c0_i32_0 = arith.constant 0 : i32
    %c0_i32_1 = arith.constant 0 : i32
    %c0_i32_2 = arith.constant 0 : i32
    return %0, %c0_i32_0, %c0_i32_1 : i32, i32, i32
  }
  func.func @transform_3(%arg0: i32) -> (i32, i32) {
    %c0_i32 = arith.constant 0 : i32
    %c0_i32_0 = arith.constant 0 : i32
    %c0_i32_1 = arith.constant 0 : i32
    return %c0_i32, %c0_i32_0 : i32, i32
  }
  func.func @transform_4(%arg0: i32) -> (i32, i32) {
    %c0_i32 = arith.constant 0 : i32
    %c0_i32_0 = arith.constant 0 : i32
    %c0_i32_1 = arith.constant 0 : i32
    return %c0_i32, %c0_i32_0 : i32, i32
  }
  func.func @transform_5(%arg0: i32) -> (i32, i32, i32) {
    %c0_i32 = arith.constant 0 : i32
    %c0_i32_0 = arith.constant 0 : i32
    %c0_i32_1 = arith.constant 0 : i32
    return %arg0, %c0_i32, %c0_i32_0 : i32, i32, i32
  }
  func.func @transform_6(%arg0: i32) -> (i32, i32, i32) {
    %c0_i32 = arith.constant 0 : i32
    %0 = arith.subi %c0_i32, %arg0 : i32
    %c0_i32_0 = arith.constant 0 : i32
    %c0_i32_1 = arith.constant 0 : i32
    %c0_i32_2 = arith.constant 0 : i32
    return %0, %c0_i32_0, %c0_i32_1 : i32, i32, i32
  }
  func.func @transform_7(%arg0: i32) -> (i32, i32) {
    %c0_i32 = arith.constant 0 : i32
    %c0_i32_0 = arith.constant 0 : i32
    %c0_i32_1 = arith.constant 0 : i32
    return %c0_i32, %c0_i32_0 : i32, i32
  }
  func.func @transform_8(%arg0: i32) -> (i32, i32) {
    %c0_i32 = arith.constant 0 : i32
    %c0_i32_0 = arith.constant 0 : i32
    %c0_i32_1 = arith.constant 0 : i32
    return %c0_i32, %c0_i32_0 : i32, i32
  }
}

</mosaic_0001>

<bundles_post_ra>
// kernel: unordered_lstm_forward.1
= control target key start
LH: loop header
LB: loop body
LE: loop exit
PB: predicated region body
PF: predicated region fallthrough
CT: control target
= control target key end

     0   :  { %v6241_v3 = vmov 0.0   ;;  %v4649_v8 = vmov 0   ;;  %s6232_s3 = inlined_call_operand.vmem [shape: f32[128,512], index: 3, kind: input, shape index: {}]   ;;  %s6233_s4 = inlined_call_operand.vmem [shape: f32[128,512], index: 4, kind: input, shape index: {}]   ;;  %s6234_s0 = inlined_call_operand.vmem [shape: s32[8,1], index: 0, kind: input, shape index: {}]   ;;  %s6235_s1 = inlined_call_operand.vmem [shape: f32[8,8,512], index: 1, kind: input, shape index: {}]   ;;  %s6236_s2 = inlined_call_operand.vmem [shape: f32[8,8,512], index: 2, kind: input, shape index: {}]   ;;  %s6237_s5 = inlined_call_operand.vmem [shape: f32[8,8,128], index: 5, kind: output, shape index: {0}]   ;;  %s6238_s6 = inlined_call_operand.vmem [shape: f32[8,8,128], index: 6, kind: output, shape index: {1}]   ;;  %s6239_s7 = inlined_call_operand.vmem [shape: f32[8,128], index: 7, kind: output, shape index: {2}]   ;;  %s6240_s8 = inlined_call_operand.vmem [shape: f32[8,128], index: 8, kind: output, shape index: {3}]  }
   0x1   :  { %v72_v0 = vld [vmem:[%s6232_s3 + $0x8] sm:$0xff]  ;;  %v71_v2 = vld [vmem:[%s6232_s3] sm:$0xff]  ;;  %275 = vmatprep.mubr.f32.mxu0 %v6241_v3  ;;  %346 = vmatprep.mubr.f32.mxu1 %v6241_v3  ;;  %v74_v20 = vld [vmem:[%s6232_s3 + $0x18] sm:$0xff] }
   0x2   :  { %v76_v1 = vld [vmem:[%s6232_s3 + $0x28] sm:$0xff]  ;;  %v75_v5 = vld [vmem:[%s6232_s3 + $0x20] sm:$0xff]  ;;  %4391 = vset.pattern.permute.xlu0 %v4649_v8  ;;  %v78_v21 = vld [vmem:[%s6232_s3 + $0x38] sm:$0xff] }
   0x3   :  { %v4706_v4 = vpack.c.bf16 %v76_v1, %v72_v0  ;;  %v80_v6 = vld [vmem:[%s6232_s3 + $0x48] sm:$0xff]  ;;  %v4717_v9 = vpack.c.bf16 %v75_v5, %v71_v2  ;;  %v79_v11 = vld [vmem:[%s6232_s3 + $0x40] sm:$0xff]  ;;  %v4758_v23 = vpack.c.bf16 %v78_v21, %v74_v20  ;;  %v73_v24 = vld [vmem:[%s6232_s3 + $0x10] sm:$0xff] }
   0x4   :  { %v84_v7 = vld [vmem:[%s6232_s3 + $0x68] sm:$0xff]  ;;  %v83_v12 = vld [vmem:[%s6232_s3 + $0x60] sm:$0xff]  ;;  %v77_v25 = vld [vmem:[%s6232_s3 + $0x30] sm:$0xff] }
   0x5   :  { %v4719_v10 = vpack.c.bf16 %v84_v7, %v80_v6  ;;  %v88_v13 = vld [vmem:[%s6232_s3 + $0x88] sm:$0xff]  ;;  %3366 = vmatprep.subr.bf16.mxu0 %v4706_v4  ;;  %v4735_v15 = vpack.c.bf16 %v83_v12, %v79_v11  ;;  %v87_v16 = vld [vmem:[%s6232_s3 + $0x80] sm:$0xff]  ;;  %v4766_v26 = vpack.c.bf16 %v77_v25, %v73_v24  ;;  %3398 = vmatprep.subr.bf16.mxu1 %v4758_v23  ;;  %v82_v28 = vld [vmem:[%s6232_s3 + $0x58] sm:$0xff] }
   0x6   :  { %v92_v14 = vld [vmem:[%s6232_s3 + $0xa8] sm:$0xff]  ;;  %3368 = vmatpush1.bf16.msra.mxu0 %v4717_v9  ;;  %v91_v17 = vld [vmem:[%s6232_s3 + $0xa0] sm:$0xff]  ;;  %v86_v29 = vld [vmem:[%s6232_s3 + $0x78] sm:$0xff] }
   0x7   :  { %3370 = vmatprep.subr.bf16.mxu0 %v4719_v10  ;;  %v4744_v18 = vpack.c.bf16 %v92_v14, %v88_v13  ;;  %v96_v19 = vld [vmem:[%s6232_s3 + $0xc8] sm:$0xff]  ;;  %v4769_v27 = vpack.c.bf16 %v91_v17, %v87_v16  ;;  %v81_v30 = vld [vmem:[%s6232_s3 + $0x50] sm:$0xff]  ;;  %v95_v32 = vld [vmem:[%s6232_s3 + $0xc0] sm:$0xff]  ;;  %3400 = vmatpush1.bf16.msra.mxu1 %v4766_v26  ;;  %v4791_v34 = vpack.c.bf16 %v86_v29, %v82_v28 }
   0x8   :  { %v100_v22 = vld [vmem:[%s6232_s3 + $0xe8] sm:$0xff]  ;;  %v99_v33 = vld [vmem:[%s6232_s3 + $0xe0] sm:$0xff]  ;;  %v85_v35 = vld [vmem:[%s6232_s3 + $0x70] sm:$0xff] }
   0x9   :  { %v4782_v31 = vpack.c.bf16 %v100_v22, %v96_v19  ;;  %v104_v36 = vld [vmem:[%s6232_s3 + $0x108] sm:$0xff]  ;;  %v4802_v38 = vpack.c.bf16 %v85_v35, %v81_v30  ;;  %v90_v39 = vld [vmem:[%s6232_s3 + $0x98] sm:$0xff]  ;;  %3402 = vmatprep.subr.bf16.mxu1 %v4791_v34  ;;  %v89_v41 = vld [vmem:[%s6232_s3 + $0x90] sm:$0xff]  ;;  %v4818_v43 = vpack.c.bf16 %v99_v33, %v95_v32 }
   0xa   :  { %3372 = vmatpush1.bf16.msra.mxu0 %v4735_v15  ;;  %v108_v37 = vld [vmem:[%s6232_s3 + $0x128] sm:$0xff]  ;;  %v94_v40 = vld [vmem:[%s6232_s3 + $0xb8] sm:$0xff]  ;;  %v93_v42 = vld [vmem:[%s6232_s3 + $0xb0] sm:$0xff] }
   0xb   :  { %3374 = vmatprep.subr.bf16.mxu0 %v4744_v18  ;;  %6301 = vst [vmem:[#allocation6_spill] sm:$0xff] %v4782_v31  ;;  %6302 = vst [vmem:[#allocation7_spill] sm:$0xff] %v4818_v43  ;;  %v103_v44 = vld [vmem:[%s6232_s3 + $0x100] sm:$0xff]  ;;  %v4826_v46 = vpack.c.bf16 %v94_v40, %v90_v39  ;;  %v4829_v47 = vpack.c.bf16 %v108_v37, %v104_v36  ;;  %3404 = vmatpush1.bf16.msra.mxu1 %v4802_v38  ;;  %v112_v48 = vld [vmem:[%s6232_s3 + $0x148] sm:$0xff] }
   0xc   :  { %v107_v45 = vld [vmem:[%s6232_s3 + $0x120] sm:$0xff]  ;;  %v4835_v49 = vpack.c.bf16 %v93_v42, %v89_v41  ;;  %v98_v50 = vld [vmem:[%s6232_s3 + $0xd8] sm:$0xff]  ;;  %v116_v52 = vld [vmem:[%s6232_s3 + $0x168] sm:$0xff] }
   0xd   :  { %6303 = vst [vmem:[#allocation8_spill] sm:$0xff] %v4829_v47  ;;  %v102_v51 = vld [vmem:[%s6232_s3 + $0xf8] sm:$0xff]  ;;  %3406 = vmatprep.subr.bf16.mxu1 %v4826_v46  ;;  %v97_v54 = vld [vmem:[%s6232_s3 + $0xd0] sm:$0xff]  ;;  %v4856_v56 = vpack.c.bf16 %v107_v45, %v103_v44  ;;  %v4865_v59 = vpack.c.bf16 %v116_v52, %v112_v48  ;;  %v111_v60 = vld [vmem:[%s6232_s3 + $0x140] sm:$0xff] }
   0xe   :  { %3376 = vmatpush1.bf16.msra.mxu0 %v4769_v27  ;;  %v4847_v53 = vpack.c.bf16 %v102_v51, %v98_v50  ;;  %v101_v55 = vld [vmem:[%s6232_s3 + $0xf0] sm:$0xff]  ;;  %v106_v57 = vld [vmem:[%s6232_s3 + $0x118] sm:$0xff]  ;;  %v115_v61 = vld [vmem:[%s6232_s3 + $0x160] sm:$0xff] }
   0xf   :  { %3378 = vmatprep.subr.bf16.mxu0 %v4782_v31  ;;  %6305 = vst [vmem:[#allocation10_spill] sm:$0xff] %v4856_v56  ;;  %v110_v58 = vld [vmem:[%s6232_s3 + $0x138] sm:$0xff]  ;;  %6306 = vst [vmem:[#allocation11_spill] sm:$0xff] %v4865_v59  ;;  %3408 = vmatpush1.bf16.msra.mxu1 %v4835_v49  ;;  %v120_v62 = vld [vmem:[%s6232_s3 + $0x188] sm:$0xff]  ;;  %v4877_v63 = vpack.c.bf16 %v101_v55, %v97_v54  ;;  %v4898_v8 = vpack.c.bf16 %v115_v61, %v111_v60 }
  0x10   :  { %6304 = vst [vmem:[#allocation9_spill] sm:$0xff] %v4847_v53  ;;  %v124_v0 = vld [vmem:[%s6232_s3 + $0x1a8] sm:$0xff]  ;;  %3410 = vmatprep.subr.bf16.mxu1 %v4847_v53  ;;  %v4883_v1 = vpack.c.bf16 %v110_v58, %v106_v57  ;;  %v105_v2 = vld [vmem:[%s6232_s3 + $0x110] sm:$0xff]  ;;  %v114_v6 = vld [vmem:[%s6232_s3 + $0x158] sm:$0xff] }
  0x11   :  { %6307 = vst [vmem:[#allocation12_spill] sm:$0xff] %v4877_v63  ;;  %v109_v5 = vld [vmem:[%s6232_s3 + $0x130] sm:$0xff]  ;;  %v118_v7 = vld [vmem:[%s6232_s3 + $0x178] sm:$0xff]  ;;  %6309 = vst [vmem:[#allocation14_spill] sm:$0xff] %v4898_v8  ;;  %v4901_v11 = vpack.c.bf16 %v124_v0, %v120_v62 }
  0x12   :  { %3380 = vmatpush1.bf16.msra.mxu0 %v4818_v43  ;;  %6308 = vst [vmem:[#allocation13_spill] sm:$0xff] %v4883_v1  ;;  %v119_v12 = vld [vmem:[%s6232_s3 + $0x180] sm:$0xff]  ;;  %v128_v14 = vld [vmem:[%s6232_s3 + $0x1c8] sm:$0xff]  ;;  %v4913_v16 = vpack.c.bf16 %v109_v5, %v105_v2  ;;  %v4919_v19 = vpack.c.bf16 %v118_v7, %v114_v6  ;;  %v113_v20 = vld [vmem:[%s6232_s3 + $0x150] sm:$0xff] }
  0x13   :  { %3382 = vmatprep.subr.bf16.mxu0 %v4829_v47  ;;  %6310 = vst [vmem:[#allocation15_spill] sm:$0xff] %v4901_v11  ;;  %v123_v13 = vld [vmem:[%s6232_s3 + $0x1a0] sm:$0xff]  ;;  %3412 = vmatpush1.bf16.msra.mxu1 %v4877_v63  ;;  %v132_v17 = vld [vmem:[%s6232_s3 + $0x1e8] sm:$0xff]  ;;  %v117_v21 = vld [vmem:[%s6232_s3 + $0x170] sm:$0xff] }
  0x14   :  { %6311 = vst [vmem:[#allocation16_spill] sm:$0xff] %v4913_v16  ;;  %3414 = vmatprep.subr.bf16.mxu1 %v4883_v1  ;;  %6312 = vst [vmem:[#allocation17_spill] sm:$0xff] %v4919_v19  ;;  %v122_v22 = vld [vmem:[%s6232_s3 + $0x198] sm:$0xff]  ;;  %v4934_v25 = vpack.c.bf16 %v123_v13, %v119_v12  ;;  %v4937_v28 = vpack.c.bf16 %v132_v17, %v128_v14  ;;  %v127_v29 = vld [vmem:[%s6232_s3 + $0x1c0] sm:$0xff]  ;;  %v4949_v33 = vpack.c.bf16 %v117_v21, %v113_v20 }
  0x15   :  { %v126_v24 = vld [vmem:[%s6232_s3 + $0x1b8] sm:$0xff]  ;;  %v131_v30 = vld [vmem:[%s6232_s3 + $0x1e0] sm:$0xff]  ;;  %v136_v32 = vld [vmem:[%s6233_s4 + $0x8] sm:$0xff] }
  0x16   :  { %3384 = vmatpush1.bf16.msra.mxu0 %v4856_v56  ;;  %6313 = vst [vmem:[#allocation18_spill] sm:$0xff] %v4934_v25  ;;  %6314 = vst [vmem:[#allocation19_spill] sm:$0xff] %v4937_v28  ;;  %v140_v35 = vld [vmem:[%s6233_s4 + $0x28] sm:$0xff]  ;;  %v4955_v36 = vpack.c.bf16 %v126_v24, %v122_v22  ;;  %v121_v37 = vld [vmem:[%s6232_s3 + $0x190] sm:$0xff]  ;;  %v4970_v42 = vpack.c.bf16 %v131_v30, %v127_v29 }
  0x17   :  { %3386 = vmatprep.subr.bf16.mxu0 %v4865_v59  ;;  %3416 = vmatpush1.bf16.msra.mxu1 %v4913_v16  ;;  %6315 = vst [vmem:[#allocation20_spill] sm:$0xff] %v4949_v33  ;;  %v125_v39 = vld [vmem:[%s6232_s3 + $0x1b0] sm:$0xff]  ;;  %v130_v40 = vld [vmem:[%s6232_s3 + $0x1d8] sm:$0xff]  ;;  %v4973_v44 = vpack.c.bf16 %v140_v35, %v136_v32  ;;  %v135_v45 = vld [vmem:[%s6233_s4] sm:$0xff] }
  0x18   :  { %3418 = vmatprep.subr.bf16.mxu1 %v4919_v19  ;;  %6316 = vst [vmem:[#allocation21_spill] sm:$0xff] %v4955_v36  ;;  %v134_v41 = vld [vmem:[%s6232_s3 + $0x1f8] sm:$0xff]  ;;  %6317 = vst [vmem:[#allocation22_spill] sm:$0xff] %v4970_v42  ;;  %v139_v48 = vld [vmem:[%s6233_s4 + $0x20] sm:$0xff]  ;;  %v4985_v51 = vpack.c.bf16 %v125_v39, %v121_v37 }
  0x19   :  { %6318 = vst [vmem:[#allocation23_spill] sm:$0xff] %v4973_v44  ;;  %v144_v50 = vld [vmem:[%s6233_s4 + $0x48] sm:$0xff]  ;;  %v4991_v54 = vpack.c.bf16 %v134_v41, %v130_v40  ;;  %v129_v55 = vld [vmem:[%s6232_s3 + $0x1d0] sm:$0xff]  ;;  %v138_v58 = vld [vmem:[%s6233_s4 + $0x18] sm:$0xff]  ;;  %v5006_v61 = vpack.c.bf16 %v139_v48, %v135_v45 }
  0x1a   :  { %3388 = vmatpush1.bf16.msra.mxu0 %v4898_v8  ;;  %6319 = vst [vmem:[#allocation24_spill] sm:$0xff] %v4985_v51  ;;  %v148_v52 = vld [vmem:[%s6233_s4 + $0x68] sm:$0xff]  ;;  %v133_v57 = vld [vmem:[%s6232_s3 + $0x1f0] sm:$0xff]  ;;  %v142_v60 = vld [vmem:[%s6233_s4 + $0x38] sm:$0xff] }
  0x1b   :  { %3390 = vmatprep.subr.bf16.mxu0 %v4901_v11  ;;  %3420 = vmatpush1.bf16.msra.mxu1 %v4949_v33  ;;  %6320 = vst [vmem:[#allocation25_spill] sm:$0xff] %v4991_v54  ;;  %v5009_v62 = vpack.c.bf16 %v148_v52, %v144_v50  ;;  %v143_v0 = vld [vmem:[%s6233_s4 + $0x40] sm:$0xff]  ;;  %v152_v5 = vld [vmem:[%s6233_s4 + $0x88] sm:$0xff]  ;;  %v5021_v6 = vpack.c.bf16 %v133_v57, %v129_v55  ;;  %v137_v13 = vld [vmem:[%s6233_s4 + $0x10] sm:$0xff] }
  0x1c   :  { %3422 = vmatprep.subr.bf16.mxu1 %v4955_v36  ;;  %v147_v2 = vld [vmem:[%s6233_s4 + $0x60] sm:$0xff]  ;;  %v156_v7 = vld [vmem:[%s6233_s4 + $0xa8] sm:$0xff]  ;;  %v5027_v12 = vpack.c.bf16 %v142_v60, %v138_v58  ;;  %v141_v14 = vld [vmem:[%s6233_s4 + $0x30] sm:$0xff] }
  0x1d   :  { %6321 = vst [vmem:[#allocation26_spill] sm:$0xff] %v5021_v6  ;;  %v146_v17 = vld [vmem:[%s6233_s4 + $0x58] sm:$0xff]  ;;  %v5043_v21 = vpack.c.bf16 %v147_v2, %v143_v0  ;;  %v5047_v22 = vpack.c.bf16 %v156_v7, %v152_v5  ;;  %v151_v24 = vld [vmem:[%s6233_s4 + $0x80] sm:$0xff]  ;;  %v160_v30 = vld [vmem:[%s6233_s4 + $0xc8] sm:$0xff]  ;;  %v5059_v32 = vpack.c.bf16 %v141_v14, %v137_v13 }
  0x1e   :  { %3392 = vmatpush1.bf16.msra.mxu0 %v4934_v25  ;;  %6322 = vst [vmem:[#allocation27_spill] sm:$0xff] %v5027_v12  ;;  %v150_v20 = vld [vmem:[%s6233_s4 + $0x78] sm:$0xff]  ;;  %v155_v29 = vld [vmem:[%s6233_s4 + $0xa0] sm:$0xff]  ;;  %v164_v35 = vld [vmem:[%s6233_s4 + $0xe8] sm:$0xff] }
  0x1f   :  { %3394 = vmatprep.subr.bf16.mxu0 %v4937_v28  ;;  %3424 = vmatpush1.bf16.msra.mxu1 %v4985_v51  ;;  %v5065_v37 = vpack.c.bf16 %v150_v20, %v146_v17  ;;  %v145_v39 = vld [vmem:[%s6233_s4 + $0x50] sm:$0xff]  ;;  %v154_v41 = vld [vmem:[%s6233_s4 + $0x98] sm:$0xff]  ;;  %v5080_v48 = vpack.c.bf16 %v155_v29, %v151_v24  ;;  %v159_v50 = vld [vmem:[%s6233_s4 + $0xc0] sm:$0xff]  ;;  %v5087_v52 = vpack.c.bf16 %v164_v35, %v160_v30 }
  0x20   :  { %3426 = vmatprep.subr.bf16.mxu1 %v4991_v54  ;;  %v149_v40 = vld [vmem:[%s6233_s4 + $0x70] sm:$0xff]  ;;  %v158_v45 = vld [vmem:[%s6233_s4 + $0xb8] sm:$0xff]  ;;  %v163_v55 = vld [vmem:[%s6233_s4 + $0xe0] sm:$0xff] }
  0x21   :  { %v168_v57 = vld [vmem:[%s6233_s4 + $0x108] sm:$0xff]  ;;  %v5099_v60 = vpack.c.bf16 %v149_v40, %v145_v39  ;;  %v5102_v0 = vpack.c.bf16 %v158_v45, %v154_v41  ;;  %v153_v2 = vld [vmem:[%s6233_s4 + $0x90] sm:$0xff]  ;;  %v199_v7 = vld [vmem:[%s6234_s0] sm:$0xff]  ;;  %v5121_v17 = vpack.c.bf16 %v163_v55, %v159_v50 }
  0x22   :  { %3396 = vmatpush1.bf16.msra.mxu0 %v4970_v42  ;;  %v172_v58 = vld [vmem:[%s6233_s4 + $0x128] sm:$0xff]  ;;  %v157_v5 = vld [vmem:[%s6233_s4 + $0xb0] sm:$0xff]  ;;  %v162_v13 = vld [vmem:[%s6233_s4 + $0xd8] sm:$0xff]  ;;  %201 = vperm.xlu0 %4391, %v199_v7  }
  0x23   :  { %3430 = vmatprep.subr.bf16.mxu0 %v4973_v44  ;;  %3428 = vmatpush1.bf16.msra.mxu1 %v5021_v6  ;;  %v166_v14 = vld [vmem:[%s6233_s4 + $0xf8] sm:$0xff]  ;;  %v5124_v20 = vpack.c.bf16 %v172_v58, %v168_v57  ;;  %v167_v24 = vld [vmem:[%s6233_s4 + $0x100] sm:$0xff]  ;;  %v176_v30 = vld [vmem:[%s6233_s4 + $0x148] sm:$0xff]  ;;  %v5136_v35 = vpack.c.bf16 %v157_v5, %v153_v2 }
  0x24   :  { %3462 = vmatprep.subr.bf16.mxu1 %v5027_v12  ;;  %v171_v29 = vld [vmem:[%s6233_s4 + $0x120] sm:$0xff]  ;;  %v180_v39 = vld [vmem:[%s6233_s4 + $0x168] sm:$0xff]  ;;  %v5142_v40 = vpack.c.bf16 %v166_v14, %v162_v13  ;;  %v161_v41 = vld [vmem:[%s6233_s4 + $0xd0] sm:$0xff] }
  0x25   :  { %276 = vmatmul.mubr.f32.vlgmr.msra.gmra.mrb[0].mxu0 %v6241_v3  ;;  %6323 = vst [vmem:[#allocation28_spill] sm:$0xff] %v5124_v20  ;;  %v165_v45 = vld [vmem:[%s6233_s4 + $0xf0] sm:$0xff]  ;;  %v170_v50 = vld [vmem:[%s6233_s4 + $0x118] sm:$0xff]  ;;  %v5157_v57 = vpack.c.bf16 %v171_v29, %v167_v24  ;;  %v5160_v58 = vpack.c.bf16 %v180_v39, %v176_v30  ;;  %v175_v2 = vld [vmem:[%s6233_s4 + $0x140] sm:$0xff] }
  0x26   :  { %3432 = vmatpush1.bf16.msra.mxu0 %v5006_v61  ;;  %461 = vmatprep.mubr.f32.mxu0 %v6241_v3  ;;  %v174_v55 = vld [vmem:[%s6233_s4 + $0x138] sm:$0xff]  ;;  %v179_v5 = vld [vmem:[%s6233_s4 + $0x160] sm:$0xff]  ;;  %v184_v7 = vld [vmem:[%s6233_s4 + $0x188] sm:$0xff]  ;;  %v5172_v13 = vpack.c.bf16 %v165_v45, %v161_v41 }
  0x27   :  { %3434 = vmatprep.subr.bf16.mxu0 %v5009_v62  ;;  %347 = vmatmul.mubr.f32.vlgmr.msra.gmra.mrb[0].mxu1 %v6241_v3  ;;  %6324 = vst [vmem:[#allocation29_spill] sm:$0xff] %v5157_v57  ;;  %6325 = vst [vmem:[#allocation30_spill] sm:$0xff] %v5160_v58  ;;  %v188_v14 = vld [vmem:[%s6233_s4 + $0x1a8] sm:$0xff]  ;;  %v5178_v24 = vpack.c.bf16 %v174_v55, %v170_v50  ;;  %v169_v29 = vld [vmem:[%s6233_s4 + $0x110] sm:$0xff]  ;;  %v5193_v45 = vpack.c.bf16 %v179_v5, %v175_v2 }
  0x28   :  { %3464 = vmatpush1.bf16.msra.mxu1 %v5059_v32  ;;  %532 = vmatprep.mubr.f32.mxu1 %v6241_v3  ;;  %6326 = vst [vmem:[#allocation31_spill] sm:$0xff] %v5172_v13  ;;  %v173_v30 = vld [vmem:[%s6233_s4 + $0x130] sm:$0xff]  ;;  %v178_v39 = vld [vmem:[%s6233_s4 + $0x158] sm:$0xff]  ;;  %v5196_v50 = vpack.c.bf16 %v188_v14, %v184_v7  ;;  %v183_v55 = vld [vmem:[%s6233_s4 + $0x180] sm:$0xff] }
  0x29   :  { %3466 = vmatprep.subr.bf16.mxu1 %v5065_v37  ;;  %6327 = vst [vmem:[#allocation32_spill] sm:$0xff] %v5178_v24  ;;  %v182_v41 = vld [vmem:[%s6233_s4 + $0x178] sm:$0xff]  ;;  %v187_v3 = vld [vmem:[%s6233_s4 + $0x1a0] sm:$0xff]  ;;  %v5208_v2 = vpack.c.bf16 %v173_v30, %v169_v29  ;;  %v196_v5 = vld [vmem:[%s6233_s4 + $0x1e8] sm:$0xff] }
  0x2a   :  { %3436 = vmatpush1.bf16.msra.mxu0 %v5043_v21  ;;  %6328 = vst [vmem:[#allocation33_spill] sm:$0xff] %v5196_v50  ;;  %v5214_v7 = vpack.c.bf16 %v182_v41, %v178_v39  ;;  %v177_v14 = vld [vmem:[%s6233_s4 + $0x150] sm:$0xff]  ;;  %v186_v29 = vld [vmem:[%s6233_s4 + $0x198] sm:$0xff]  ;;  %v5229_v39 = vpack.c.bf16 %v187_v3, %v183_v55 }
  0x2b   :  { %3438 = vmatprep.subr.bf16.mxu0 %v5047_v22  ;;  %v190_v30 = vld [vmem:[%s6233_s4 + $0x1b8] sm:$0xff]  ;;  %v189_v55 = vld [vmem:[%s6233_s4 + $0x1b0] sm:$0xff] }
  0x2c   :  { %3468 = vmatpush1.bf16.msra.mxu1 %v5099_v60  ;;  %6329 = vst [vmem:[#allocation34_spill] sm:$0xff] %v5229_v39  ;;  %v5244_v3 = vpack.c.bf16 %v190_v30, %v186_v29 }
  0x2d   :  { %3470 = vmatprep.subr.bf16.mxu1 %v5102_v0 }
  0x2e   :  { %3440 = vmatpush1.bf16.msra.mxu0 %v5080_v48 }
  0x2f   :  { %3442 = vmatprep.subr.bf16.mxu0 %v5087_v52 }
  0x30   :  { %3472 = vmatpush1.bf16.msra.mxu1 %v5136_v35 }
  0x31   :  { %3474 = vmatprep.subr.bf16.mxu1 %v5142_v40 }
  0x32   :  { %3444 = vmatpush1.bf16.msra.mxu0 %v5121_v17 }
  0x33   :  { %3446 = vmatprep.subr.bf16.mxu0 %v5124_v20  ;;  %v195_v20 = vld [vmem:[%s6233_s4 + $0x1e0] sm:$0xff] }
  0x34   :  { %3476 = vmatpush1.bf16.msra.mxu1 %v5172_v13 }
  0x35   :  { %3478 = vmatprep.subr.bf16.mxu1 %v5178_v24  ;;  %v191_v24 = vld [vmem:[%s6233_s4 + $0x1c0] sm:$0xff] }
  0x36   :  { %3448 = vmatpush1.bf16.msra.mxu0 %v5157_v57  ;;  %v192_v57 = vld [vmem:[%s6233_s4 + $0x1c8] sm:$0xff] }
  0x37   :  { %3450 = vmatprep.subr.bf16.mxu0 %v5160_v58  ;;  %v181_v58 = vld [vmem:[%s6233_s4 + $0x170] sm:$0xff]  ;;  %v5232_v41 = vpack.c.bf16 %v196_v5, %v192_v57  ;;  %v194_v5 = vld [vmem:[%s6233_s4 + $0x1d8] sm:$0xff] }
  0x38   :  { %3480 = vmatpush1.bf16.msra.mxu1 %v5208_v2  ;;  %v5241_v13 = vpack.c.bf16 %v181_v58, %v177_v14  ;;  %v185_v57 = vld [vmem:[%s6233_s4 + $0x190] sm:$0xff]  ;;  %v198_v58 = vld [vmem:[%s6233_s4 + $0x1f8] sm:$0xff]  ;;  %v5259_v14 = vpack.c.bf16 %v195_v20, %v191_v24  ;;  %v6330_v24 = vmov 0.0  }
  0x39   :  { %3482 = vmatprep.subr.bf16.mxu1 %v5214_v7  ;;  %v5263_v29 = vpack.c.bf16 %v189_v55, %v185_v57  ;;  %v5266_v30 = vpack.c.bf16 %v198_v58, %v194_v5 }
  0x3a   :  { %3452 = vmatpush1.bf16.msra.mxu0 %v5193_v45 }
  0x3b   :  { %3454 = vmatprep.subr.bf16.mxu0 %v5196_v50  ;;  %v193_v50 = vld [vmem:[%s6233_s4 + $0x1d0] sm:$0xff] }
  0x3c   :  { %3484 = vmatpush1.bf16.msra.mxu1 %v5241_v13 }
  0x3d   :  { %3486 = vmatprep.subr.bf16.mxu1 %v5244_v3 }
  0x3e   :  { %3456 = vmatpush1.bf16.msra.mxu0 %v5229_v39  ;;  %v197_v39 = vld [vmem:[%s6233_s4 + $0x1f0] sm:$0xff] }
  0x3f   :  { %3458 = vmatprep.subr.bf16.mxu0 %v5232_v41  ;;  %v5276_v20 = vpack.c.bf16 %v197_v39, %v193_v50  ;;  %v206_v50 = vld [vmem:[%s6235_s1] sm:$0xff]  ;;  %v207_v39 = vld [vmem:[%s6235_s1 + $0x8] sm:$0xff] }
  0x40   :  { %3488 = vmatpush1.bf16.msra.mxu1 %v5263_v29 }
  0x41   :  { %3490 = vmatprep.subr.bf16.mxu1 %v5266_v30 }
  0x42   :  { %3460 = vmatpush1.bf16.msra.mxu0 %v5259_v14 }
  0x43   :  { %3494 = vmatprep.subr.bf16.mxu0 %v4706_v4 }
  0x44   :  { %3492 = vmatpush1.bf16.msra.mxu1 %v5276_v20 }
  0x45   :  { %462 = vmatmul.mubr.f32.vlgmr.msra.gmra.mrb[2].mxu0 %v6330_v24  ;;  %3526 = vmatprep.subr.bf16.mxu1 %v4758_v23 }
  0x46   :  { %3496 = vmatpush1.bf16.msra.mxu0 %v4717_v9  ;;  %648 = vmatprep.mubr.f32.mxu0 %v6330_v24 }
  0x47   :  { %3498 = vmatprep.subr.bf16.mxu0 %v4719_v10  ;;  %533 = vmatmul.mubr.f32.vlgmr.msra.gmra.mrb[2].mxu1 %v6330_v24 }
  0x48   :  { %3528 = vmatpush1.bf16.msra.mxu1 %v4766_v26  ;;  %719 = vmatprep.mubr.f32.mxu1 %v6330_v24 }
  0x49   :  { %3530 = vmatprep.subr.bf16.mxu1 %v4791_v34 }
  0x4a   :  { %3500 = vmatpush1.bf16.msra.mxu0 %v4735_v15 }
  0x4b   :  { %3502 = vmatprep.subr.bf16.mxu0 %v4744_v18 }
  0x4c   :  { %3532 = vmatpush1.bf16.msra.mxu1 %v4802_v38 }
  0x4d   :  { %3534 = vmatprep.subr.bf16.mxu1 %v4826_v46 }
  0x4e   :  { %3504 = vmatpush1.bf16.msra.mxu0 %v4769_v27 }
  0x4f   :  { %3506 = vmatprep.subr.bf16.mxu0 %v4782_v31 }
  0x50   :  { %3536 = vmatpush1.bf16.msra.mxu1 %v4835_v49 }
  0x51   :  { %3538 = vmatprep.subr.bf16.mxu1 %v4847_v53 }
  0x52   :  { %3508 = vmatpush1.bf16.msra.mxu0 %v4818_v43 }
  0x53   :  { %3510 = vmatprep.subr.bf16.mxu0 %v4829_v47 }
  0x54   :  { %3540 = vmatpush1.bf16.msra.mxu1 %v4877_v63 }
  0x55   :  { %3542 = vmatprep.subr.bf16.mxu1 %v4883_v1 }
  0x56   :  { %3512 = vmatpush1.bf16.msra.mxu0 %v4856_v56 }
  0x57   :  { %3514 = vmatprep.subr.bf16.mxu0 %v4865_v59 }
  0x58   :  { %3544 = vmatpush1.bf16.msra.mxu1 %v4913_v16 }
  0x59   :  { %3546 = vmatprep.subr.bf16.mxu1 %v4919_v19 }
  0x5a   :  { %3516 = vmatpush1.bf16.msra.mxu0 %v4898_v8 }
  0x5b   :  { %3518 = vmatprep.subr.bf16.mxu0 %v4901_v11 }
  0x5c   :  { %3548 = vmatpush1.bf16.msra.mxu1 %v4949_v33 }
  0x5d   :  { %3550 = vmatprep.subr.bf16.mxu1 %v4955_v36 }
  0x5e   :  { %3520 = vmatpush1.bf16.msra.mxu0 %v4934_v25 }
  0x5f   :  { %3522 = vmatprep.subr.bf16.mxu0 %v4937_v28 }
  0x60   :  { %3552 = vmatpush1.bf16.msra.mxu1 %v4985_v51  ;;  %v208_v51 = vld [vmem:[%s6235_s1 + $0x10] sm:$0xff] }
  0x61   :  { %3554 = vmatprep.subr.bf16.mxu1 %v4991_v54 }
  0x62   :  { %3524 = vmatpush1.bf16.msra.mxu0 %v4970_v42 }
  0x63   :  { %3558 = vmatprep.subr.bf16.mxu0 %v4973_v44 }
  0x64   :  { %3556 = vmatpush1.bf16.msra.mxu1 %v5021_v6  ;;  %v209_v6 = vld [vmem:[%s6235_s1 + $0x18] sm:$0xff] }
  0x65   :  { %3590 = vmatprep.subr.bf16.mxu1 %v5027_v12 }
  0xf8   :  { %v277_v57 = vpop.f32.mrb[0].mxu0 }
  0xf9   :  { %v353_v55 = vadd.f32 %v277_v57, %v206_v50  ;;  %v279_v5 = vpop.f32.mrb[1].mxu0 }
  0xfa   :  { %v354_v58 = vadd.f32 %v279_v5, %v207_v39  ;;  %v348_v12 = vpop.f32.mrb[0].mxu1 }
  0xfb   :  { %v3243_v42 = vmul.f32 -1.442695, %v353_v55  ;;  %v350_v54 = vpop.f32.mrb[1].mxu1  ;;  %v355_v36 = vadd.f32 %v348_v12, %v208_v51 }
  0xfc   :  { %v3244_v44 = vmul.f32 -1.442695, %v354_v58  ;;  %v356_v28 = vadd.f32 %v350_v54, %v209_v6 }
  0xfd   :  { %4392 = vpow2.f32 %v3243_v42 }
  0xfe   :  { %4394 = vpow2.f32 %v3244_v44  ;;  %v3245_v25 = vmul.f32 -1.442695, %v356_v28  ;;  %v3246_v28 = vld [vmem:[%s6236_s2 + $0xe0] sm:$0xff] }
 0x100   :  { %4396 = vpow2.f32 %v3245_v25  ;;  %v3247_v25 = vld [vmem:[%s6236_s2 + $0xe8] sm:$0xff] }
 0x101   :  { %4398 = vtanh.f32 %v355_v36 }
 0x107   :  { %v4393_v50 = vpop.eup %4392 }
 0x108   :  { %v4395_v39 = vpop.eup %4394  ;;  %v363_v57 = vadd.f32 1.0, %v4393_v50 }
 0x109   :  { %v369_v55 = vadd.f32 1.0, %v4395_v39 }
 0x10a   :  { %4400 = vrcp.f32 %v363_v57  ;;  %v4397_v5 = vpop.eup %4396 }
 0x10b   :  { %4402 = vrcp.f32 %v369_v55  ;;  %v4399_v42 = vpop.eup %4398  ;;  %v376_v44 = vadd.f32 1.0, %v4397_v5 }
 0x10d   :  { %4404 = vrcp.f32 %v376_v44  ;;  %v3248_v44 = vld [vmem:[%s6236_s2 + $0xf0] sm:$0xff] }
 0x114   :  { %v4401_v58 = vpop.eup %4400 }
 0x115   :  { %v4403_v11 = vpop.eup %4402  ;;  %v380_v54 = vmul.f32 %v4401_v58, %v4399_v42 }
 0x116   :  { %v379_v6 = vmul.f32 0.0, %v4403_v11  ;;  %v3249_v11 = vld [vmem:[%s6236_s2 + $0xf8] sm:$0xff] }
 0x118   :  { %v5336_v51 = vadd.f32 %v380_v54, %v379_v6  ;;  %v463_v36 = vpop.f32.mrb[2].mxu0  ;;  %v4405_v54 = vpop.eup %4404 }
 0x119   :  { %v539_v12 = vadd.f32 %v3246_v28, %v463_v36  ;;  %v465_v50 = vpop.f32.mrb[3].mxu0  ;;  %v5345_v6 = vpop.permute.xlu0 %201 }
 0x11a   :  { %4406 = vtanh.f32 %v5336_v51  ;;  %v540_v39 = vadd.f32 %v3247_v25, %v465_v50  ;;  %v534_v5 = vpop.f32.mrb[2].mxu1  ;;  %vm359_vm0 = vcmp.gt.s32.totalorder %v5345_v6, 0  ;;  %vm545_vm1 = vcmp.gt.s32.totalorder %v5345_v6, 7 }
 0x11b   :  { %v3250_v57 = vmul.f32 -1.442695, %v539_v12  ;;  %v536_v42 = vpop.f32.mrb[3].mxu1  ;;  %v541_v36 = vadd.f32 %v3248_v44, %v534_v5  ;;  %vm732_vm2 = vcmp.gt.s32.totalorder %v5345_v6, 1  ;;  %vm919_vm3 = vcmp.gt.s32.totalorder %v5345_v6, 6 }
 0x11c   :  { %v3251_v55 = vmul.f32 -1.442695, %v540_v39  ;;  %v542_v58 = vadd.f32 %v3249_v11, %v536_v42  ;;  %vm1106_vm4 = vcmp.gt.s32.totalorder %v5345_v6, 2  ;;  %vm1293_vm5 = vcmp.gt.s32.totalorder %v5345_v6, 5 }
 0x11d   :  { %4408 = vpow2.f32 %v3250_v57  ;;  %vm1480_vm6 = vcmp.gt.s32.totalorder %v5345_v6, 3  ;;  %vm1667_vm7 = vcmp.gt.s32.totalorder %v5345_v6, 4 }
 0x11e   :  { %4410 = vpow2.f32 %v3251_v55  ;;  %v3252_v28 = vmul.f32 -1.442695, %v542_v58 }
 0x120   :  { %4412 = vpow2.f32 %v3252_v28 }
 0x121   :  { %4414 = vtanh.f32 %v541_v36  ;;  %v6332_v36 = vld [vmem:[#allocation28_spill] sm:$0xff] }
 0x124   :  { %v4407_v25 = vpop.eup %4406 }
 0x125   :  { %v383_v12 = vmul.f32 %v4407_v25, %v4405_v54  ;;  %v6331_v54 = vld [vmem:[#allocation31_spill] sm:$0xff] }
 0x127   :  { %v4409_v50 = vpop.eup %4408  ;;  %3361 = vmatmul.mubr.msk.f32.vlgmr.msra.gmra.mrb[4].mxu0 %vm359_vm0, %v383_v12  ;;  %3362 = vmatmul.mubr.msk.f32.vlgmr.msra.gmra.mrb[4].mxu1 %vm359_vm0, %v383_v12  ;;  %v5354_v39 = vsel %vm359_vm0, %v383_v12, 0.0  ;;  %v6333_v12 = vld [vmem:[#allocation32_spill] sm:$0xff] }
 0x128   :  { %v4411_v57 = vpop.eup %4410  ;;  %v549_v55 = vadd.f32 1.0, %v4409_v50  ;;  %3560 = vmatpush1.bf16.msra.mxu0 %v5006_v61  ;;  %3592 = vmatpush1.bf16.msra.mxu1 %v5059_v32  ;;  %389 = vst [vmem:[%s6237_s5] sm:$0xff] %v5354_v39 }
 0x129   :  { %v555_v11 = vadd.f32 1.0, %v4411_v57  ;;  %3562 = vmatprep.subr.bf16.mxu0 %v5009_v62  ;;  %3594 = vmatprep.subr.bf16.mxu1 %v5065_v37 }
 0x12a   :  { %4416 = vrcp.f32 %v549_v55  ;;  %835 = vmatprep.mubr.f32.mxu0 %v6330_v24  ;;  %906 = vmatprep.mubr.f32.mxu1 %v6330_v24  ;;  %v4413_v5 = vpop.eup %4412  ;;  %v6334_v55 = vld [vmem:[#allocation29_spill] sm:$0xff] }
 0x12b   :  { %4418 = vrcp.f32 %v555_v11  ;;  %v4415_v42 = vpop.eup %4414  ;;  %v562_v44 = vadd.f32 1.0, %v4413_v5  ;;  %v6335_v11 = vld [vmem:[#allocation30_spill] sm:$0xff]  ;;  %v6336_v5 = vld [vmem:[#allocation33_spill] sm:$0xff] }
 0x12c   :  { %3564 = vmatpush1.bf16.msra.mxu0 %v5043_v21  ;;  %3596 = vmatpush1.bf16.msra.mxu1 %v5099_v60 }
 0x12d   :  { %3566 = vmatprep.subr.bf16.mxu0 %v5047_v22  ;;  %3598 = vmatprep.subr.bf16.mxu1 %v5102_v0  ;;  %4420 = vrcp.f32 %v562_v44 }
 0x130   :  { %3568 = vmatpush1.bf16.msra.mxu0 %v5080_v48  ;;  %3600 = vmatpush1.bf16.msra.mxu1 %v5136_v35 }
 0x131   :  { %3570 = vmatprep.subr.bf16.mxu0 %v5087_v52  ;;  %3602 = vmatprep.subr.bf16.mxu1 %v5142_v40 }
 0x134   :  { %v4417_v58 = vpop.eup %4416  ;;  %3572 = vmatpush1.bf16.msra.mxu0 %v5121_v17  ;;  %3604 = vmatpush1.bf16.msra.mxu1 %v6331_v54 }
 0x135   :  { %v4419_v28 = vpop.eup %4418  ;;  %v566_v25 = vmul.f32 %v4417_v58, %v4415_v42  ;;  %3574 = vmatprep.subr.bf16.mxu0 %v6332_v36  ;;  %3606 = vmatprep.subr.bf16.mxu1 %v6333_v12  ;;  %v6337_v42 = vld [vmem:[#allocation34_spill] sm:$0xff] }
 0x136   :  { %v565_v50 = vmul.f32 0.0, %v4419_v28 }
 0x137   :  { %v4421_v58 = vpop.eup %4420 }
 0x138   :  { %v5378_v57 = vadd.f32 %v566_v25, %v565_v50  ;;  %3576 = vmatpush1.bf16.msra.mxu0 %v6334_v55  ;;  %3608 = vmatpush1.bf16.msra.mxu1 %v5208_v2  ;;  %v6338_v50 = vld [vmem:[#allocation15_spill] sm:$0xff] }
 0x139   :  { %3578 = vmatprep.subr.bf16.mxu0 %v6335_v11  ;;  %3610 = vmatprep.subr.bf16.mxu1 %v5214_v7 }
 0x13a   :  { %4422 = vtanh.f32 %v5378_v57 }
 0x13c   :  { %3580 = vmatpush1.bf16.msra.mxu0 %v5193_v45  ;;  %3612 = vmatpush1.bf16.msra.mxu1 %v5241_v13 }
 0x13d   :  { %3582 = vmatprep.subr.bf16.mxu0 %v6336_v5  ;;  %3614 = vmatprep.subr.bf16.mxu1 %v5244_v3 }
 0x140   :  { %3584 = vmatpush1.bf16.msra.mxu0 %v6337_v42  ;;  %3616 = vmatpush1.bf16.msra.mxu1 %v5263_v29 }
 0x141   :  { %3586 = vmatprep.subr.bf16.mxu0 %v5232_v41  ;;  %3618 = vmatprep.subr.bf16.mxu1 %v5266_v30 }
 0x144   :  { %v4423_v44 = vpop.eup %4422  ;;  %3588 = vmatpush1.bf16.msra.mxu0 %v5259_v14  ;;  %3620 = vmatpush1.bf16.msra.mxu1 %v5276_v20 }
 0x145   :  { %v569_v28 = vmul.f32 %v4423_v44, %v4421_v58  ;;  %3622 = vmatprep.subr.bf16.mxu0 %v4706_v4  ;;  %3654 = vmatprep.subr.bf16.mxu1 %v4758_v23  ;;  %v6339_v58 = vld [vmem:[#allocation21_spill] sm:$0xff]  ;;  %v6340_v44 = vld [vmem:[#allocation18_spill] sm:$0xff] }
 0x147   :  { %3363 = vmatmul.mubr.msk.f32.vlgmr.msra.gmra.mrb[6].mxu0 %vm545_vm1, %v569_v28  ;;  %3364 = vmatmul.mubr.msk.f32.vlgmr.msra.gmra.mrb[6].mxu1 %vm545_vm1, %v569_v28  ;;  %v5404_v25 = vsel %vm545_vm1, %v569_v28, 0.0  ;;  %v6341_v28 = vld [vmem:[#allocation24_spill] sm:$0xff] }
 0x148   :  { %3624 = vmatpush1.bf16.msra.mxu0 %v4717_v9  ;;  %3656 = vmatpush1.bf16.msra.mxu1 %v4766_v26  ;;  %3253 = vst [vmem:[%s6238_s6 + $0x38] sm:$0xff] %v5404_v25 }
 0x149   :  { %3626 = vmatprep.subr.bf16.mxu0 %v4719_v10  ;;  %3658 = vmatprep.subr.bf16.mxu1 %v4791_v34 }
 0x14a   :  { %1022 = vmatprep.mubr.f32.mxu0 %v6330_v24  ;;  %1093 = vmatprep.mubr.f32.mxu1 %v6330_v24 }
 0x14c   :  { %3628 = vmatpush1.bf16.msra.mxu0 %v4735_v15  ;;  %3660 = vmatpush1.bf16.msra.mxu1 %v4802_v38 }
 0x14d   :  { %3630 = vmatprep.subr.bf16.mxu0 %v4744_v18  ;;  %3662 = vmatprep.subr.bf16.mxu1 %v4826_v46 }
 0x150   :  { %3632 = vmatpush1.bf16.msra.mxu0 %v4769_v27  ;;  %3664 = vmatpush1.bf16.msra.mxu1 %v4835_v49 }
 0x151   :  { %3634 = vmatprep.subr.bf16.mxu0 %v4782_v31  ;;  %3666 = vmatprep.subr.bf16.mxu1 %v4847_v53 }
 0x154   :  { %3636 = vmatpush1.bf16.msra.mxu0 %v4818_v43  ;;  %3668 = vmatpush1.bf16.msra.mxu1 %v4877_v63  ;;  %v3256_v63 = vld [vmem:[%s6235_s1 + $0x30] sm:$0xff] }
 0x155   :  { %3638 = vmatprep.subr.bf16.mxu0 %v4829_v47  ;;  %3670 = vmatprep.subr.bf16.mxu1 %v4883_v1  ;;  %v6342_v1 = vld [vmem:[#allocation19_spill] sm:$0xff] }
 0x158   :  { %3640 = vmatpush1.bf16.msra.mxu0 %v4856_v56  ;;  %3672 = vmatpush1.bf16.msra.mxu1 %v4913_v16  ;;  %v6343_v56 = vld [vmem:[#allocation25_spill] sm:$0xff]  ;;  %v6344_v16 = vld [vmem:[#allocation22_spill] sm:$0xff] }
 0x159   :  { %3642 = vmatprep.subr.bf16.mxu0 %v4865_v59  ;;  %3674 = vmatprep.subr.bf16.mxu1 %v4919_v19  ;;  %v6345_v59 = vld [vmem:[#allocation26_spill] sm:$0xff]  ;;  %v6346_v19 = vld [vmem:[#allocation23_spill] sm:$0xff] }
 0x15c   :  { %3644 = vmatpush1.bf16.msra.mxu0 %v4898_v8  ;;  %3676 = vmatpush1.bf16.msra.mxu1 %v4949_v33  ;;  %v6347_v8 = vld [vmem:[#allocation27_spill] sm:$0xff] }
 0x15d   :  { %3646 = vmatprep.subr.bf16.mxu0 %v6338_v50  ;;  %3678 = vmatprep.subr.bf16.mxu1 %v6339_v58  ;;  %v3254_v58 = vld [vmem:[%s6235_s1 + $0x20] sm:$0xff] }
 0x160   :  { %3648 = vmatpush1.bf16.msra.mxu0 %v6340_v44  ;;  %3680 = vmatpush1.bf16.msra.mxu1 %v6341_v28  ;;  %v3255_v28 = vld [vmem:[%s6235_s1 + $0x28] sm:$0xff] }
 0x161   :  { %3650 = vmatprep.subr.bf16.mxu0 %v6342_v1  ;;  %3682 = vmatprep.subr.bf16.mxu1 %v6343_v56 }
 0x164   :  { %3652 = vmatpush1.bf16.msra.mxu0 %v6344_v16  ;;  %3684 = vmatpush1.bf16.msra.mxu1 %v6345_v59 }
 0x165   :  { %3686 = vmatprep.subr.bf16.mxu0 %v6346_v19  ;;  %3718 = vmatprep.subr.bf16.mxu1 %v6347_v8  ;;  %v3257_v8 = vld [vmem:[%s6235_s1 + $0x38] sm:$0xff] }
 0x1fa   :  { %v650_v44 = vpop.f32.mrb[4].mxu0  ;;  %v721_v1 = vpop.f32.mrb[4].mxu1 }
 0x1fb   :  { %v726_v50 = vadd.f32 %v3254_v58, %v650_v44  ;;  %v652_v56 = vpop.f32.mrb[5].mxu0  ;;  %v723_v33 = vpop.f32.mrb[5].mxu1  ;;  %v728_v53 = vadd.f32 %v3256_v63, %v721_v1 }
 0x1fc   :  { %v727_v16 = vadd.f32 %v3255_v28, %v652_v56  ;;  %v729_v19 = vadd.f32 %v3257_v8, %v723_v33  ;;  %v384_v8 = vsel %vm359_vm0, %v5336_v51, 0.0 }
 0x1fd   :  { %v3258_v47 = vmul.f32 -1.442695, %v726_v50 }
 0x1fe   :  { %v3259_v59 = vmul.f32 -1.442695, %v727_v16  ;;  %v3260_v43 = vmul.f32 -1.442695, %v729_v19 }
 0x1ff   :  { %4424 = vpow2.f32 %v3258_v47 }
 0x200   :  { %4426 = vpow2.f32 %v3259_v59 }
 0x201   :  { %4428 = vpow2.f32 %v3260_v43  ;;  %v3263_v43 = vld [vmem:[%s6236_s2 + $0xc8] sm:$0xff] }
 0x202   :  { %4430 = vtanh.f32 %v728_v53 }
 0x209   :  { %v4425_v31 = vpop.eup %4424 }
 0x20a   :  { %v4427_v58 = vpop.eup %4426  ;;  %v736_v44 = vadd.f32 1.0, %v4425_v31  ;;  %v3262_v31 = vld [vmem:[%s6236_s2 + $0xc0] sm:$0xff] }
 0x20b   :  { %v742_v56 = vadd.f32 1.0, %v4427_v58  ;;  %v4429_v47 = vpop.eup %4428 }
 0x20c   :  { %4432 = vrcp.f32 %v736_v44  ;;  %v4431_v16 = vpop.eup %4430  ;;  %v749_v33 = vadd.f32 1.0, %v4429_v47 }
 0x20d   :  { %4434 = vrcp.f32 %v742_v56 }
 0x20e   :  { %4436 = vrcp.f32 %v749_v33  ;;  %v3264_v33 = vld [vmem:[%s6236_s2 + $0xd0] sm:$0xff] }
 0x216   :  { %v4433_v50 = vpop.eup %4432 }
 0x217   :  { %v4435_v28 = vpop.eup %4434  ;;  %v753_v59 = vmul.f32 %v4433_v50, %v4431_v16 }
 0x218   :  { %v752_v19 = vmul.f32 %v4435_v28, %v384_v8  ;;  %v3265_v28 = vld [vmem:[%s6236_s2 + $0xd8] sm:$0xff] }
 0x21a   :  { %v754_v53 = vadd.f32 %v753_v59, %v752_v19  ;;  %v837_v63 = vpop.f32.mrb[6].mxu0  ;;  %v908_v1 = vpop.f32.mrb[6].mxu1 }
 0x21b   :  { %v913_v58 = vadd.f32 %v3262_v31, %v837_v63  ;;  %v839_v44 = vpop.f32.mrb[7].mxu0  ;;  %v910_v56 = vpop.f32.mrb[7].mxu1  ;;  %v915_v63 = vadd.f32 %v3264_v33, %v908_v1  ;;  %v570_v33 = vsel %vm545_vm1, %v5378_v57, 0.0 }
 0x21c   :  { %v914_v51 = vadd.f32 %v3263_v43, %v839_v44  ;;  %4438 = vtanh.f32 %v754_v53  ;;  %v5468_v47 = vsel %vm732_vm2, %v754_v53, %v384_v8  ;;  %v916_v59 = vadd.f32 %v3265_v28, %v910_v56  ;;  %v4437_v19 = vpop.eup %4436 }
 0x21d   :  { %v3266_v16 = vmul.f32 -1.442695, %v913_v58 }
 0x21e   :  { %v3267_v50 = vmul.f32 -1.442695, %v914_v51  ;;  %v3268_v43 = vmul.f32 -1.442695, %v916_v59 }
 0x21f   :  { %4440 = vpow2.f32 %v3266_v16 }
 0x220   :  { %4442 = vpow2.f32 %v3267_v50 }
 0x221   :  { %4444 = vpow2.f32 %v3268_v43 }
 0x222   :  { %4446 = vtanh.f32 %v915_v63 }
 0x226   :  { %v4439_v31 = vpop.eup %4438 }
 0x227   :  { %v756_v44 = vmul.f32 %v4439_v31, %v4437_v19 }
 0x229   :  { %v4441_v8 = vpop.eup %4440  ;;  %v5479_v53 = vsel %vm732_vm2, %v756_v44, %v5354_v39  ;;  %v759_v58 = vsel %vm732_vm2, %v756_v44, 0.0 }
 0x22a   :  { %v4443_v51 = vpop.eup %4442  ;;  %v923_v56 = vadd.f32 1.0, %v4441_v8  ;;  %3261 = vst [vmem:[%s6237_s5 + $0x8] sm:$0xff] %v759_v58  ;;  %1023 = vmatmul.mubr.f32.vlgmr.msra.gmra.mrb[8].mxu0 %v5479_v53  ;;  %1094 = vmatmul.mubr.f32.vlgmr.msra.gmra.mrb[8].mxu1 %v5479_v53 }
 0x22b   :  { %v929_v1 = vadd.f32 1.0, %v4443_v51  ;;  %3688 = vmatpush1.bf16.msra.mxu0 %v5006_v61  ;;  %3720 = vmatpush1.bf16.msra.mxu1 %v5059_v32  ;;  %v4445_v39 = vpop.eup %4444 }
 0x22c   :  { %4448 = vrcp.f32 %v923_v56  ;;  %3690 = vmatprep.subr.bf16.mxu0 %v5009_v62  ;;  %3722 = vmatprep.subr.bf16.mxu1 %v5065_v37  ;;  %v4447_v16 = vpop.eup %4446  ;;  %v936_v19 = vadd.f32 1.0, %v4445_v39  ;;  %v6349_v56 = vld [vmem:[#allocation9_spill] sm:$0xff]  ;;  %v6351_v39 = vld [vmem:[#allocation12_spill] sm:$0xff] }
 0x22d   :  { %4450 = vrcp.f32 %v929_v1  ;;  %1209 = vmatprep.mubr.f32.mxu0 %v6330_v24  ;;  %1280 = vmatprep.mubr.f32.mxu1 %v6330_v24  ;;  %v6350_v1 = vld [vmem:[#allocation7_spill] sm:$0xff] }
 0x22e   :  { %4452 = vrcp.f32 %v936_v19  ;;  %v6357_v19 = vld [vmem:[#allocation17_spill] sm:$0xff] }
 0x22f   :  { %3692 = vmatpush1.bf16.msra.mxu0 %v5043_v21  ;;  %3724 = vmatpush1.bf16.msra.mxu1 %v5099_v60 }
 0x230   :  { %3694 = vmatprep.subr.bf16.mxu0 %v5047_v22  ;;  %3726 = vmatprep.subr.bf16.mxu1 %v5102_v0 }
 0x233   :  { %3696 = vmatpush1.bf16.msra.mxu0 %v5080_v48  ;;  %3728 = vmatpush1.bf16.msra.mxu1 %v5136_v35 }
 0x234   :  { %3698 = vmatprep.subr.bf16.mxu0 %v5087_v52  ;;  %3730 = vmatprep.subr.bf16.mxu1 %v5142_v40 }
 0x236   :  { %v4449_v50 = vpop.eup %4448 }
 0x237   :  { %v4451_v28 = vpop.eup %4450  ;;  %v940_v59 = vmul.f32 %v4449_v50, %v4447_v16  ;;  %3700 = vmatpush1.bf16.msra.mxu0 %v5121_v17  ;;  %3732 = vmatpush1.bf16.msra.mxu1 %v6331_v54  ;;  %v6352_v16 = vld [vmem:[#allocation8_spill] sm:$0xff]  ;;  %v6353_v50 = vld [vmem:[#allocation13_spill] sm:$0xff] }
 0x238   :  { %v939_v31 = vmul.f32 %v4451_v28, %v570_v33  ;;  %3702 = vmatprep.subr.bf16.mxu0 %v6332_v36  ;;  %3734 = vmatprep.subr.bf16.mxu1 %v6333_v12  ;;  %v4453_v63 = vpop.eup %4452  ;;  %v6354_v28 = vld [vmem:[#allocation10_spill] sm:$0xff] }
 0x23a   :  { %v941_v43 = vadd.f32 %v940_v59, %v939_v31  ;;  %v6355_v59 = vld [vmem:[#allocation16_spill] sm:$0xff]  ;;  %v6358_v31 = vld [vmem:[#allocation14_spill] sm:$0xff] }
 0x23b   :  { %3704 = vmatpush1.bf16.msra.mxu0 %v6334_v55  ;;  %3736 = vmatpush1.bf16.msra.mxu1 %v5208_v2 }
 0x23c   :  { %3706 = vmatprep.subr.bf16.mxu0 %v6335_v11  ;;  %3738 = vmatprep.subr.bf16.mxu1 %v5214_v7  ;;  %4454 = vtanh.f32 %v941_v43  ;;  %v5516_v57 = vsel %vm919_vm3, %v941_v43, %v570_v33  ;;  %v6356_v33 = vld [vmem:[#allocation11_spill] sm:$0xff]  ;;  %v6359_v43 = vld [vmem:[#allocation20_spill] sm:$0xff] }
 0x23f   :  { %3708 = vmatpush1.bf16.msra.mxu0 %v5193_v45  ;;  %3740 = vmatpush1.bf16.msra.mxu1 %v5241_v13 }
 0x240   :  { %3710 = vmatprep.subr.bf16.mxu0 %v6336_v5  ;;  %3742 = vmatprep.subr.bf16.mxu1 %v5244_v3 }
 0x243   :  { %3712 = vmatpush1.bf16.msra.mxu0 %v6337_v42  ;;  %3744 = vmatpush1.bf16.msra.mxu1 %v5263_v29 }
 0x244   :  { %3714 = vmatprep.subr.bf16.mxu0 %v5232_v41  ;;  %3746 = vmatprep.subr.bf16.mxu1 %v5266_v30 }
 0x246   :  { %v4455_v44 = vpop.eup %4454 }
 0x247   :  { %3716 = vmatpush1.bf16.msra.mxu0 %v5259_v14  ;;  %3748 = vmatpush1.bf16.msra.mxu1 %v5276_v20  ;;  %v943_v8 = vmul.f32 %v4455_v44, %v4453_v63  ;;  %v6360_v63 = vld [vmem:[#allocation15_spill] sm:$0xff]  ;;  %v6361_v44 = vld [vmem:[#allocation21_spill] sm:$0xff] }
 0x248   :  { %3750 = vmatprep.subr.bf16.mxu0 %v4706_v4  ;;  %3782 = vmatprep.subr.bf16.mxu1 %v4758_v23 }
 0x249   :  { %v5533_v58 = vsel %vm919_vm3, %v943_v8, %v5404_v25  ;;  %v946_v51 = vsel %vm919_vm3, %v943_v8, 0.0  ;;  %v6348_v25 = vld [vmem:[#allocation6_spill] sm:$0xff] }
 0x24a   :  { %3269 = vst [vmem:[%s6238_s6 + $0x30] sm:$0xff] %v946_v51  ;;  %1210 = vmatmul.mubr.f32.vlgmr.msra.gmra.mrb[10].mxu0 %v5533_v58  ;;  %1281 = vmatmul.mubr.f32.vlgmr.msra.gmra.mrb[10].mxu1 %v5533_v58  ;;  %v6362_v8 = vld [vmem:[#allocation18_spill] sm:$0xff]  ;;  %v6363_v51 = vld [vmem:[#allocation24_spill] sm:$0xff] }
 0x24b   :  { %3752 = vmatpush1.bf16.msra.mxu0 %v4717_v9  ;;  %3784 = vmatpush1.bf16.msra.mxu1 %v4766_v26 }
 0x24c   :  { %3754 = vmatprep.subr.bf16.mxu0 %v4719_v10  ;;  %3786 = vmatprep.subr.bf16.mxu1 %v4791_v34 }
 0x24d   :  { %1396 = vmatprep.mubr.f32.mxu0 %v6330_v24  ;;  %1467 = vmatprep.mubr.f32.mxu1 %v6330_v24 }
 0x24f   :  { %3756 = vmatpush1.bf16.msra.mxu0 %v4735_v15  ;;  %3788 = vmatpush1.bf16.msra.mxu1 %v4802_v38 }
 0x250   :  { %3758 = vmatprep.subr.bf16.mxu0 %v4744_v18  ;;  %3790 = vmatprep.subr.bf16.mxu1 %v4826_v46 }
 0x253   :  { %3760 = vmatpush1.bf16.msra.mxu0 %v4769_v27  ;;  %3792 = vmatpush1.bf16.msra.mxu1 %v4835_v49 }
 0x254   :  { %3762 = vmatprep.subr.bf16.mxu0 %v6348_v25  ;;  %3794 = vmatprep.subr.bf16.mxu1 %v6349_v56 }
 0x257   :  { %3764 = vmatpush1.bf16.msra.mxu0 %v6350_v1  ;;  %3796 = vmatpush1.bf16.msra.mxu1 %v6351_v39  ;;  %v3272_v39 = vld [vmem:[%s6235_s1 + $0x50] sm:$0xff] }
 0x258   :  { %3766 = vmatprep.subr.bf16.mxu0 %v6352_v16  ;;  %3798 = vmatprep.subr.bf16.mxu1 %v6353_v50  ;;  %v6364_v50 = vld [vmem:[#allocation19_spill] sm:$0xff] }
 0x25b   :  { %3768 = vmatpush1.bf16.msra.mxu0 %v6354_v28  ;;  %3800 = vmatpush1.bf16.msra.mxu1 %v6355_v59  ;;  %v6365_v28 = vld [vmem:[#allocation25_spill] sm:$0xff]  ;;  %v6366_v59 = vld [vmem:[#allocation22_spill] sm:$0xff] }
 0x25c   :  { %3770 = vmatprep.subr.bf16.mxu0 %v6356_v33  ;;  %3802 = vmatprep.subr.bf16.mxu1 %v6357_v19  ;;  %v6367_v33 = vld [vmem:[#allocation26_spill] sm:$0xff]  ;;  %v6368_v19 = vld [vmem:[#allocation23_spill] sm:$0xff] }
 0x25f   :  { %3772 = vmatpush1.bf16.msra.mxu0 %v6358_v31  ;;  %3804 = vmatpush1.bf16.msra.mxu1 %v6359_v43  ;;  %v6369_v31 = vld [vmem:[#allocation27_spill] sm:$0xff] }
 0x260   :  { %3774 = vmatprep.subr.bf16.mxu0 %v6360_v63  ;;  %3806 = vmatprep.subr.bf16.mxu1 %v6361_v44  ;;  %v3270_v44 = vld [vmem:[%s6235_s1 + $0x40] sm:$0xff] }
 0x263   :  { %3776 = vmatpush1.bf16.msra.mxu0 %v6362_v8  ;;  %3808 = vmatpush1.bf16.msra.mxu1 %v6363_v51  ;;  %v3271_v51 = vld [vmem:[%s6235_s1 + $0x48] sm:$0xff] }
 0x264   :  { %3778 = vmatprep.subr.bf16.mxu0 %v6364_v50  ;;  %3810 = vmatprep.subr.bf16.mxu1 %v6365_v28 }
 0x267   :  { %3780 = vmatpush1.bf16.msra.mxu0 %v6366_v59  ;;  %3812 = vmatpush1.bf16.msra.mxu1 %v6367_v33 }
 0x268   :  { %3814 = vmatprep.subr.bf16.mxu0 %v6368_v19  ;;  %3846 = vmatprep.subr.bf16.mxu1 %v6369_v31  ;;  %v3273_v31 = vld [vmem:[%s6235_s1 + $0x58] sm:$0xff] }
 0x2fd   :  { %v1024_v8 = vpop.f32.mrb[8].mxu0  ;;  %v1095_v50 = vpop.f32.mrb[8].mxu1 }
 0x2fe   :  { %v1100_v63 = vadd.f32 %v3270_v44, %v1024_v8  ;;  %v1026_v28 = vpop.f32.mrb[9].mxu0  ;;  %v1097_v43 = vpop.f32.mrb[9].mxu1  ;;  %v1102_v56 = vadd.f32 %v3272_v39, %v1095_v50  ;;  %v3278_v39 = vld [vmem:[%s6236_s2 + $0xa0] sm:$0xff] }
 0x2ff   :  { %v1101_v59 = vadd.f32 %v3271_v51, %v1026_v28  ;;  %v1103_v19 = vadd.f32 %v3273_v31, %v1097_v43 }
 0x300   :  { %v3274_v16 = vmul.f32 -1.442695, %v1100_v63 }
 0x301   :  { %v3275_v33 = vmul.f32 -1.442695, %v1101_v59  ;;  %v3276_v1 = vmul.f32 -1.442695, %v1103_v19 }
 0x302   :  { %4456 = vpow2.f32 %v3274_v16 }
 0x303   :  { %4458 = vpow2.f32 %v3275_v33 }
 0x304   :  { %4460 = vpow2.f32 %v3276_v1 }
 0x305   :  { %4462 = vtanh.f32 %v1102_v56 }
 0x30c   :  { %v4457_v25 = vpop.eup %4456 }
 0x30d   :  { %v4459_v44 = vpop.eup %4458  ;;  %v1110_v8 = vadd.f32 1.0, %v4457_v25  ;;  %v3279_v25 = vld [vmem:[%s6236_s2 + $0xa8] sm:$0xff] }
 0x30e   :  { %v1116_v28 = vadd.f32 1.0, %v4459_v44  ;;  %v4461_v16 = vpop.eup %4460 }
 0x30f   :  { %4464 = vrcp.f32 %v1110_v8  ;;  %v4463_v59 = vpop.eup %4462  ;;  %v1123_v31 = vadd.f32 1.0, %v4461_v16 }
 0x310   :  { %4466 = vrcp.f32 %v1116_v28 }
 0x311   :  { %4468 = vrcp.f32 %v1123_v31  ;;  %v3280_v31 = vld [vmem:[%s6236_s2 + $0xb0] sm:$0xff] }
 0x319   :  { %v4465_v63 = vpop.eup %4464 }
 0x31a   :  { %v4467_v51 = vpop.eup %4466  ;;  %v1127_v33 = vmul.f32 %v4465_v63, %v4463_v59 }
 0x31b   :  { %v1126_v43 = vmul.f32 %v4467_v51, %v5468_v47  ;;  %v3281_v51 = vld [vmem:[%s6236_s2 + $0xb8] sm:$0xff] }
 0x31d   :  { %v1128_v56 = vadd.f32 %v1127_v33, %v1126_v43  ;;  %v1211_v1 = vpop.f32.mrb[10].mxu0  ;;  %v1282_v50 = vpop.f32.mrb[10].mxu1 }
 0x31e   :  { %v1287_v19 = vadd.f32 %v3278_v39, %v1211_v1  ;;  %v1213_v44 = vpop.f32.mrb[11].mxu0  ;;  %v1284_v8 = vpop.f32.mrb[11].mxu1  ;;  %v1289_v1 = vadd.f32 %v3280_v31, %v1282_v50 }
 0x31f   :  { %v1288_v28 = vadd.f32 %v3279_v25, %v1213_v44  ;;  %4470 = vtanh.f32 %v1128_v56  ;;  %v5599_v16 = vsel %vm1106_vm4, %v1128_v56, %v5468_v47  ;;  %v1290_v33 = vadd.f32 %v3281_v51, %v1284_v8  ;;  %v4469_v43 = vpop.eup %4468 }
 0x320   :  { %v3282_v59 = vmul.f32 -1.442695, %v1287_v19 }
 0x321   :  { %v3283_v63 = vmul.f32 -1.442695, %v1288_v28  ;;  %v3284_v25 = vmul.f32 -1.442695, %v1290_v33 }
 0x322   :  { %4472 = vpow2.f32 %v3282_v59 }
 0x323   :  { %4474 = vpow2.f32 %v3283_v63 }
 0x324   :  { %4476 = vpow2.f32 %v3284_v25 }
 0x325   :  { %4478 = vtanh.f32 %v1289_v1 }
 0x329   :  { %v4471_v39 = vpop.eup %4470 }
 0x32a   :  { %v1130_v44 = vmul.f32 %v4471_v39, %v4469_v43 }
 0x32c   :  { %v4473_v47 = vpop.eup %4472  ;;  %v5610_v56 = vsel %vm1106_vm4, %v1130_v44, %v5479_v53  ;;  %v1133_v19 = vsel %vm1106_vm4, %v1130_v44, 0.0 }
 0x32d   :  { %v4475_v28 = vpop.eup %4474  ;;  %v1297_v8 = vadd.f32 1.0, %v4473_v47  ;;  %3277 = vst [vmem:[%s6237_s5 + $0x10] sm:$0xff] %v1133_v19  ;;  %1397 = vmatmul.mubr.f32.vlgmr.msra.gmra.mrb[12].mxu0 %v5610_v56  ;;  %1468 = vmatmul.mubr.f32.vlgmr.msra.gmra.mrb[12].mxu1 %v5610_v56 }
 0x32e   :  { %v1303_v50 = vadd.f32 1.0, %v4475_v28  ;;  %3816 = vmatpush1.bf16.msra.mxu0 %v5006_v61  ;;  %3848 = vmatpush1.bf16.msra.mxu1 %v5059_v32  ;;  %v4477_v53 = vpop.eup %4476  ;;  %v6371_v28 = vld [vmem:[#allocation9_spill] sm:$0xff] }
 0x32f   :  { %4480 = vrcp.f32 %v1297_v8  ;;  %3818 = vmatprep.subr.bf16.mxu0 %v5009_v62  ;;  %3850 = vmatprep.subr.bf16.mxu1 %v5065_v37  ;;  %v4479_v59 = vpop.eup %4478  ;;  %v1310_v31 = vadd.f32 1.0, %v4477_v53  ;;  %v6372_v8 = vld [vmem:[#allocation7_spill] sm:$0xff]  ;;  %v6374_v53 = vld [vmem:[#allocation8_spill] sm:$0xff] }
 0x330   :  { %4482 = vrcp.f32 %v1303_v50  ;;  %1583 = vmatprep.mubr.f32.mxu0 %v6330_v24  ;;  %1654 = vmatprep.mubr.f32.mxu1 %v6330_v24  ;;  %v6373_v50 = vld [vmem:[#allocation12_spill] sm:$0xff] }
 0x331   :  { %4484 = vrcp.f32 %v1310_v31  ;;  %v6379_v31 = vld [vmem:[#allocation17_spill] sm:$0xff] }
 0x332   :  { %3820 = vmatpush1.bf16.msra.mxu0 %v5043_v21  ;;  %3852 = vmatpush1.bf16.msra.mxu1 %v5099_v60 }
 0x333   :  { %3822 = vmatprep.subr.bf16.mxu0 %v5047_v22  ;;  %3854 = vmatprep.subr.bf16.mxu1 %v5102_v0 }
 0x336   :  { %3824 = vmatpush1.bf16.msra.mxu0 %v5080_v48  ;;  %3856 = vmatpush1.bf16.msra.mxu1 %v5136_v35 }
 0x337   :  { %3826 = vmatprep.subr.bf16.mxu0 %v5087_v52  ;;  %3858 = vmatprep.subr.bf16.mxu1 %v5142_v40 }
 0x339   :  { %v4481_v63 = vpop.eup %4480 }
 0x33a   :  { %v4483_v51 = vpop.eup %4482  ;;  %v1314_v33 = vmul.f32 %v4481_v63, %v4479_v59  ;;  %3828 = vmatpush1.bf16.msra.mxu0 %v5121_v17  ;;  %3860 = vmatpush1.bf16.msra.mxu1 %v6331_v54  ;;  %v6375_v59 = vld [vmem:[#allocation13_spill] sm:$0xff]  ;;  %v6376_v63 = vld [vmem:[#allocation10_spill] sm:$0xff] }
 0x33b   :  { %v1313_v43 = vmul.f32 %v4483_v51, %v5516_v57  ;;  %3830 = vmatprep.subr.bf16.mxu0 %v6332_v36  ;;  %3862 = vmatprep.subr.bf16.mxu1 %v6333_v12  ;;  %v4485_v1 = vpop.eup %4484  ;;  %v6377_v51 = vld [vmem:[#allocation16_spill] sm:$0xff] }
 0x33d   :  { %v1315_v39 = vadd.f32 %v1314_v33, %v1313_v43  ;;  %v6378_v33 = vld [vmem:[#allocation11_spill] sm:$0xff]  ;;  %v6380_v43 = vld [vmem:[#allocation14_spill] sm:$0xff] }
 0x33e   :  { %3832 = vmatpush1.bf16.msra.mxu0 %v6334_v55  ;;  %3864 = vmatpush1.bf16.msra.mxu1 %v5208_v2 }
 0x33f   :  { %3834 = vmatprep.subr.bf16.mxu0 %v6335_v11  ;;  %3866 = vmatprep.subr.bf16.mxu1 %v5214_v7  ;;  %4486 = vtanh.f32 %v1315_v39  ;;  %v5646_v25 = vsel %vm1293_vm5, %v1315_v39, %v5516_v57  ;;  %v6381_v39 = vld [vmem:[#allocation20_spill] sm:$0xff] }
 0x342   :  { %3836 = vmatpush1.bf16.msra.mxu0 %v5193_v45  ;;  %3868 = vmatpush1.bf16.msra.mxu1 %v5241_v13 }
 0x343   :  { %3838 = vmatprep.subr.bf16.mxu0 %v6336_v5  ;;  %3870 = vmatprep.subr.bf16.mxu1 %v5244_v3 }
 0x346   :  { %3840 = vmatpush1.bf16.msra.mxu0 %v6337_v42  ;;  %3872 = vmatpush1.bf16.msra.mxu1 %v5263_v29 }
 0x347   :  { %3842 = vmatprep.subr.bf16.mxu0 %v5232_v41  ;;  %3874 = vmatprep.subr.bf16.mxu1 %v5266_v30 }
 0x349   :  { %v4487_v44 = vpop.eup %4486 }
 0x34a   :  { %3844 = vmatpush1.bf16.msra.mxu0 %v5259_v14  ;;  %3876 = vmatpush1.bf16.msra.mxu1 %v5276_v20  ;;  %v1317_v57 = vmul.f32 %v4487_v44, %v4485_v1  ;;  %v6382_v1 = vld [vmem:[#allocation15_spill] sm:$0xff]  ;;  %v6383_v44 = vld [vmem:[#allocation21_spill] sm:$0xff] }
 0x34b   :  { %3878 = vmatprep.subr.bf16.mxu0 %v4706_v4  ;;  %3910 = vmatprep.subr.bf16.mxu1 %v4758_v23 }
 0x34c   :  { %v5663_v47 = vsel %vm1293_vm5, %v1317_v57, %v5533_v58  ;;  %v1320_v19 = vsel %vm1293_vm5, %v1317_v57, 0.0  ;;  %v6370_v58 = vld [vmem:[#allocation6_spill] sm:$0xff] }
 0x34d   :  { %3285 = vst [vmem:[%s6238_s6 + $0x28] sm:$0xff] %v1320_v19  ;;  %1584 = vmatmul.mubr.f32.vlgmr.msra.gmra.mrb[14].mxu0 %v5663_v47  ;;  %1655 = vmatmul.mubr.f32.vlgmr.msra.gmra.mrb[14].mxu1 %v5663_v47  ;;  %v6384_v57 = vld [vmem:[#allocation18_spill] sm:$0xff]  ;;  %v6385_v19 = vld [vmem:[#allocation24_spill] sm:$0xff] }
 0x34e   :  { %3880 = vmatpush1.bf16.msra.mxu0 %v4717_v9  ;;  %3912 = vmatpush1.bf16.msra.mxu1 %v4766_v26 }
 0x34f   :  { %3882 = vmatprep.subr.bf16.mxu0 %v4719_v10  ;;  %3914 = vmatprep.subr.bf16.mxu1 %v4791_v34 }
 0x350   :  { %1770 = vmatprep.mubr.f32.mxu0 %v6330_v24  ;;  %1841 = vmatprep.mubr.f32.mxu1 %v6330_v24 }
 0x352   :  { %3884 = vmatpush1.bf16.msra.mxu0 %v4735_v15  ;;  %3916 = vmatpush1.bf16.msra.mxu1 %v4802_v38 }
 0x353   :  { %3886 = vmatprep.subr.bf16.mxu0 %v4744_v18  ;;  %3918 = vmatprep.subr.bf16.mxu1 %v4826_v46 }
 0x356   :  { %3888 = vmatpush1.bf16.msra.mxu0 %v4769_v27  ;;  %3920 = vmatpush1.bf16.msra.mxu1 %v4835_v49 }
 0x357   :  { %3890 = vmatprep.subr.bf16.mxu0 %v6370_v58  ;;  %3922 = vmatprep.subr.bf16.mxu1 %v6371_v28 }
 0x35a   :  { %3892 = vmatpush1.bf16.msra.mxu0 %v6372_v8  ;;  %3924 = vmatpush1.bf16.msra.mxu1 %v6373_v50  ;;  %v3288_v50 = vld [vmem:[%s6235_s1 + $0x70] sm:$0xff] }
 0x35b   :  { %3894 = vmatprep.subr.bf16.mxu0 %v6374_v53  ;;  %3926 = vmatprep.subr.bf16.mxu1 %v6375_v59  ;;  %v6386_v59 = vld [vmem:[#allocation19_spill] sm:$0xff] }
 0x35e   :  { %3896 = vmatpush1.bf16.msra.mxu0 %v6376_v63  ;;  %3928 = vmatpush1.bf16.msra.mxu1 %v6377_v51  ;;  %v6387_v63 = vld [vmem:[#allocation25_spill] sm:$0xff]  ;;  %v6388_v51 = vld [vmem:[#allocation22_spill] sm:$0xff] }
 0x35f   :  { %3898 = vmatprep.subr.bf16.mxu0 %v6378_v33  ;;  %3930 = vmatprep.subr.bf16.mxu1 %v6379_v31  ;;  %v6389_v33 = vld [vmem:[#allocation26_spill] sm:$0xff]  ;;  %v6390_v31 = vld [vmem:[#allocation23_spill] sm:$0xff] }
 0x362   :  { %3900 = vmatpush1.bf16.msra.mxu0 %v6380_v43  ;;  %3932 = vmatpush1.bf16.msra.mxu1 %v6381_v39  ;;  %v6391_v43 = vld [vmem:[#allocation27_spill] sm:$0xff] }
 0x363   :  { %3902 = vmatprep.subr.bf16.mxu0 %v6382_v1  ;;  %3934 = vmatprep.subr.bf16.mxu1 %v6383_v44  ;;  %v3286_v44 = vld [vmem:[%s6235_s1 + $0x60] sm:$0xff] }
 0x366   :  { %3904 = vmatpush1.bf16.msra.mxu0 %v6384_v57  ;;  %3936 = vmatpush1.bf16.msra.mxu1 %v6385_v19  ;;  %v3287_v19 = vld [vmem:[%s6235_s1 + $0x68] sm:$0xff] }
 0x367   :  { %3906 = vmatprep.subr.bf16.mxu0 %v6386_v59  ;;  %3938 = vmatprep.subr.bf16.mxu1 %v6387_v63 }
 0x36a   :  { %3908 = vmatpush1.bf16.msra.mxu0 %v6388_v51  ;;  %3940 = vmatpush1.bf16.msra.mxu1 %v6389_v33 }
 0x36b   :  { %3942 = vmatprep.subr.bf16.mxu0 %v6390_v31  ;;  %3974 = vmatprep.subr.bf16.mxu1 %v6391_v43  ;;  %v3289_v43 = vld [vmem:[%s6235_s1 + $0x78] sm:$0xff] }
 0x400   :  { %v1398_v57 = vpop.f32.mrb[12].mxu0  ;;  %v1469_v59 = vpop.f32.mrb[12].mxu1 }
 0x401   :  { %v1474_v1 = vadd.f32 %v3286_v44, %v1398_v57  ;;  %v1400_v63 = vpop.f32.mrb[13].mxu0  ;;  %v1471_v39 = vpop.f32.mrb[13].mxu1  ;;  %v1476_v28 = vadd.f32 %v3288_v50, %v1469_v59  ;;  %v3294_v50 = vld [vmem:[%s6236_s2 + $0x80] sm:$0xff] }
 0x402   :  { %v1475_v51 = vadd.f32 %v3287_v19, %v1400_v63  ;;  %v1477_v31 = vadd.f32 %v3289_v43, %v1471_v39 }
 0x403   :  { %v3290_v53 = vmul.f32 -1.442695, %v1474_v1 }
 0x404   :  { %v3291_v33 = vmul.f32 -1.442695, %v1475_v51  ;;  %v3292_v8 = vmul.f32 -1.442695, %v1477_v31 }
 0x405   :  { %4488 = vpow2.f32 %v3290_v53 }
 0x406   :  { %4490 = vpow2.f32 %v3291_v33 }
 0x407   :  { %4492 = vpow2.f32 %v3292_v8 }
 0x408   :  { %4494 = vtanh.f32 %v1476_v28 }
 0x40f   :  { %v4489_v58 = vpop.eup %4488 }
 0x410   :  { %v4491_v44 = vpop.eup %4490  ;;  %v1484_v57 = vadd.f32 1.0, %v4489_v58  ;;  %v3295_v58 = vld [vmem:[%s6236_s2 + $0x88] sm:$0xff] }
 0x411   :  { %v1490_v63 = vadd.f32 1.0, %v4491_v44  ;;  %v4493_v53 = vpop.eup %4492 }
 0x412   :  { %4496 = vrcp.f32 %v1484_v57  ;;  %v4495_v51 = vpop.eup %4494  ;;  %v1497_v43 = vadd.f32 1.0, %v4493_v53 }
 0x413   :  { %4498 = vrcp.f32 %v1490_v63 }
 0x414   :  { %4500 = vrcp.f32 %v1497_v43  ;;  %v3296_v43 = vld [vmem:[%s6236_s2 + $0x90] sm:$0xff] }
 0x41c   :  { %v4497_v1 = vpop.eup %4496 }
 0x41d   :  { %v4499_v19 = vpop.eup %4498  ;;  %v1501_v33 = vmul.f32 %v4497_v1, %v4495_v51 }
 0x41e   :  { %v1500_v39 = vmul.f32 %v4499_v19, %v5599_v16  ;;  %v3297_v19 = vld [vmem:[%s6236_s2 + $0x98] sm:$0xff] }
 0x420   :  { %v1502_v28 = vadd.f32 %v1501_v33, %v1500_v39  ;;  %v1585_v8 = vpop.f32.mrb[14].mxu0  ;;  %v1656_v59 = vpop.f32.mrb[14].mxu1 }
 0x421   :  { %v1661_v31 = vadd.f32 %v3294_v50, %v1585_v8  ;;  %v1587_v44 = vpop.f32.mrb[15].mxu0  ;;  %v1658_v57 = vpop.f32.mrb[15].mxu1  ;;  %v1663_v8 = vadd.f32 %v3296_v43, %v1656_v59 }
 0x422   :  { %v1662_v63 = vadd.f32 %v3295_v58, %v1587_v44  ;;  %4502 = vtanh.f32 %v1502_v28  ;;  %v5729_v53 = vsel %vm1480_vm6, %v1502_v28, %v5599_v16  ;;  %v1664_v33 = vadd.f32 %v3297_v19, %v1658_v57  ;;  %v4501_v39 = vpop.eup %4500 }
 0x423   :  { %v3298_v51 = vmul.f32 -1.442695, %v1661_v31 }
 0x424   :  { %v3299_v1 = vmul.f32 -1.442695, %v1662_v63  ;;  %v3300_v58 = vmul.f32 -1.442695, %v1664_v33 }
 0x425   :  { %4504 = vpow2.f32 %v3298_v51 }
 0x426   :  { %4506 = vpow2.f32 %v3299_v1 }
 0x427   :  { %4508 = vpow2.f32 %v3300_v58 }
 0x428   :  { %4510 = vtanh.f32 %v1663_v8 }
 0x42c   :  { %v4503_v50 = vpop.eup %4502 }
 0x42d   :  { %v1504_v44 = vmul.f32 %v4503_v50, %v4501_v39 }
 0x42f   :  { %v4505_v16 = vpop.eup %4504  ;;  %v5740_v28 = vsel %vm1480_vm6, %v1504_v44, %v5610_v56  ;;  %v1507_v31 = vsel %vm1480_vm6, %v1504_v44, 0.0 }
 0x430   :  { %v4507_v63 = vpop.eup %4506  ;;  %v1671_v57 = vadd.f32 1.0, %v4505_v16  ;;  %3293 = vst [vmem:[%s6237_s5 + $0x18] sm:$0xff] %v1507_v31  ;;  %1771 = vmatmul.mubr.f32.vlgmr.msra.gmra.mrb[16].mxu0 %v5740_v28  ;;  %1842 = vmatmul.mubr.f32.vlgmr.msra.gmra.mrb[16].mxu1 %v5740_v28 }
 0x431   :  { %v1677_v59 = vadd.f32 1.0, %v4507_v63  ;;  %3944 = vmatpush1.bf16.msra.mxu0 %v5006_v61  ;;  %3976 = vmatpush1.bf16.msra.mxu1 %v5059_v32  ;;  %v4509_v56 = vpop.eup %4508  ;;  %v6393_v63 = vld [vmem:[#allocation9_spill] sm:$0xff] }
 0x432   :  { %4512 = vrcp.f32 %v1671_v57  ;;  %3946 = vmatprep.subr.bf16.mxu0 %v5009_v62  ;;  %3978 = vmatprep.subr.bf16.mxu1 %v5065_v37  ;;  %v4511_v51 = vpop.eup %4510  ;;  %v1684_v43 = vadd.f32 1.0, %v4509_v56  ;;  %v6394_v57 = vld [vmem:[#allocation7_spill] sm:$0xff]  ;;  %v6396_v56 = vld [vmem:[#allocation8_spill] sm:$0xff] }
 0x433   :  { %4514 = vrcp.f32 %v1677_v59  ;;  %1957 = vmatprep.mubr.f32.mxu0 %v6330_v24  ;;  %2028 = vmatprep.mubr.f32.mxu1 %v6330_v24  ;;  %v6395_v59 = vld [vmem:[#allocation12_spill] sm:$0xff] }
 0x434   :  { %4516 = vrcp.f32 %v1684_v43  ;;  %v6401_v43 = vld [vmem:[#allocation17_spill] sm:$0xff] }
 0x435   :  { %3948 = vmatpush1.bf16.msra.mxu0 %v5043_v21  ;;  %3980 = vmatpush1.bf16.msra.mxu1 %v5099_v60 }
 0x436   :  { %3950 = vmatprep.subr.bf16.mxu0 %v5047_v22  ;;  %3982 = vmatprep.subr.bf16.mxu1 %v5102_v0 }
 0x439   :  { %3952 = vmatpush1.bf16.msra.mxu0 %v5080_v48  ;;  %3984 = vmatpush1.bf16.msra.mxu1 %v5136_v35 }
 0x43a   :  { %3954 = vmatprep.subr.bf16.mxu0 %v5087_v52  ;;  %3986 = vmatprep.subr.bf16.mxu1 %v5142_v40 }
 0x43c   :  { %v4513_v1 = vpop.eup %4512 }
 0x43d   :  { %v4515_v19 = vpop.eup %4514  ;;  %v1688_v33 = vmul.f32 %v4513_v1, %v4511_v51  ;;  %3956 = vmatpush1.bf16.msra.mxu0 %v5121_v17  ;;  %3988 = vmatpush1.bf16.msra.mxu1 %v6331_v54  ;;  %v6397_v51 = vld [vmem:[#allocation13_spill] sm:$0xff]  ;;  %v6398_v1 = vld [vmem:[#allocation10_spill] sm:$0xff] }
 0x43e   :  { %v1687_v39 = vmul.f32 %v4515_v19, %v5646_v25  ;;  %3958 = vmatprep.subr.bf16.mxu0 %v6332_v36  ;;  %3990 = vmatprep.subr.bf16.mxu1 %v6333_v12  ;;  %v4517_v8 = vpop.eup %4516  ;;  %v6399_v19 = vld [vmem:[#allocation16_spill] sm:$0xff] }
 0x440   :  { %v1689_v50 = vadd.f32 %v1688_v33, %v1687_v39  ;;  %v6400_v33 = vld [vmem:[#allocation11_spill] sm:$0xff]  ;;  %v6402_v39 = vld [vmem:[#allocation14_spill] sm:$0xff] }
 0x441   :  { %3960 = vmatpush1.bf16.msra.mxu0 %v6334_v55  ;;  %3992 = vmatpush1.bf16.msra.mxu1 %v5208_v2 }
 0x442   :  { %3962 = vmatprep.subr.bf16.mxu0 %v6335_v11  ;;  %3994 = vmatprep.subr.bf16.mxu1 %v5214_v7  ;;  %4518 = vtanh.f32 %v1689_v50  ;;  %v5776_v58 = vsel %vm1667_vm7, %v1689_v50, %v5646_v25  ;;  %v6403_v50 = vld [vmem:[#allocation20_spill] sm:$0xff] }
 0x445   :  { %3964 = vmatpush1.bf16.msra.mxu0 %v5193_v45  ;;  %3996 = vmatpush1.bf16.msra.mxu1 %v5241_v13 }
 0x446   :  { %3966 = vmatprep.subr.bf16.mxu0 %v6336_v5  ;;  %3998 = vmatprep.subr.bf16.mxu1 %v5244_v3 }
 0x449   :  { %3968 = vmatpush1.bf16.msra.mxu0 %v6337_v42  ;;  %4000 = vmatpush1.bf16.msra.mxu1 %v5263_v29 }
 0x44a   :  { %3970 = vmatprep.subr.bf16.mxu0 %v5232_v41  ;;  %4002 = vmatprep.subr.bf16.mxu1 %v5266_v30 }
 0x44c   :  { %v4519_v44 = vpop.eup %4518 }
 0x44d   :  { %3972 = vmatpush1.bf16.msra.mxu0 %v5259_v14  ;;  %4004 = vmatpush1.bf16.msra.mxu1 %v5276_v20  ;;  %v1691_v25 = vmul.f32 %v4519_v44, %v4517_v8  ;;  %v6404_v8 = vld [vmem:[#allocation15_spill] sm:$0xff]  ;;  %v6405_v44 = vld [vmem:[#allocation21_spill] sm:$0xff] }
 0x44e   :  { %4006 = vmatprep.subr.bf16.mxu0 %v4706_v4  ;;  %4038 = vmatprep.subr.bf16.mxu1 %v4758_v23 }
 0x44f   :  { %v5793_v16 = vsel %vm1667_vm7, %v1691_v25, %v5663_v47  ;;  %v1694_v31 = vsel %vm1667_vm7, %v1691_v25, 0.0  ;;  %v6392_v47 = vld [vmem:[#allocation6_spill] sm:$0xff] }
 0x450   :  { %3301 = vst [vmem:[%s6238_s6 + $0x20] sm:$0xff] %v1694_v31  ;;  %1958 = vmatmul.mubr.f32.vlgmr.msra.gmra.mrb[18].mxu0 %v5793_v16  ;;  %2029 = vmatmul.mubr.f32.vlgmr.msra.gmra.mrb[18].mxu1 %v5793_v16  ;;  %v6406_v25 = vld [vmem:[#allocation18_spill] sm:$0xff]  ;;  %v6407_v31 = vld [vmem:[#allocation24_spill] sm:$0xff] }
 0x451   :  { %4008 = vmatpush1.bf16.msra.mxu0 %v4717_v9  ;;  %4040 = vmatpush1.bf16.msra.mxu1 %v4766_v26 }
 0x452   :  { %4010 = vmatprep.subr.bf16.mxu0 %v4719_v10  ;;  %4042 = vmatprep.subr.bf16.mxu1 %v4791_v34 }
 0x453   :  { %2144 = vmatprep.mubr.f32.mxu0 %v6330_v24  ;;  %2215 = vmatprep.mubr.f32.mxu1 %v6330_v24 }
 0x455   :  { %4012 = vmatpush1.bf16.msra.mxu0 %v4735_v15  ;;  %4044 = vmatpush1.bf16.msra.mxu1 %v4802_v38 }
 0x456   :  { %4014 = vmatprep.subr.bf16.mxu0 %v4744_v18  ;;  %4046 = vmatprep.subr.bf16.mxu1 %v4826_v46 }
 0x459   :  { %4016 = vmatpush1.bf16.msra.mxu0 %v4769_v27  ;;  %4048 = vmatpush1.bf16.msra.mxu1 %v4835_v49 }
 0x45a   :  { %4018 = vmatprep.subr.bf16.mxu0 %v6392_v47  ;;  %4050 = vmatprep.subr.bf16.mxu1 %v6393_v63 }
 0x45d   :  { %4020 = vmatpush1.bf16.msra.mxu0 %v6394_v57  ;;  %4052 = vmatpush1.bf16.msra.mxu1 %v6395_v59  ;;  %v3304_v59 = vld [vmem:[%s6235_s1 + $0x90] sm:$0xff] }
 0x45e   :  { %4022 = vmatprep.subr.bf16.mxu0 %v6396_v56  ;;  %4054 = vmatprep.subr.bf16.mxu1 %v6397_v51  ;;  %v6408_v51 = vld [vmem:[#allocation19_spill] sm:$0xff] }
 0x461   :  { %4024 = vmatpush1.bf16.msra.mxu0 %v6398_v1  ;;  %4056 = vmatpush1.bf16.msra.mxu1 %v6399_v19  ;;  %v6409_v1 = vld [vmem:[#allocation25_spill] sm:$0xff]  ;;  %v6410_v19 = vld [vmem:[#allocation22_spill] sm:$0xff] }
 0x462   :  { %4026 = vmatprep.subr.bf16.mxu0 %v6400_v33  ;;  %4058 = vmatprep.subr.bf16.mxu1 %v6401_v43  ;;  %v6411_v33 = vld [vmem:[#allocation26_spill] sm:$0xff]  ;;  %v6412_v43 = vld [vmem:[#allocation23_spill] sm:$0xff] }
 0x465   :  { %4028 = vmatpush1.bf16.msra.mxu0 %v6402_v39  ;;  %4060 = vmatpush1.bf16.msra.mxu1 %v6403_v50  ;;  %v6413_v39 = vld [vmem:[#allocation27_spill] sm:$0xff] }
 0x466   :  { %4030 = vmatprep.subr.bf16.mxu0 %v6404_v8  ;;  %4062 = vmatprep.subr.bf16.mxu1 %v6405_v44  ;;  %v3302_v44 = vld [vmem:[%s6235_s1 + $0x80] sm:$0xff] }
 0x469   :  { %4032 = vmatpush1.bf16.msra.mxu0 %v6406_v25  ;;  %4064 = vmatpush1.bf16.msra.mxu1 %v6407_v31  ;;  %v3303_v31 = vld [vmem:[%s6235_s1 + $0x88] sm:$0xff] }
 0x46a   :  { %4034 = vmatprep.subr.bf16.mxu0 %v6408_v51  ;;  %4066 = vmatprep.subr.bf16.mxu1 %v6409_v1 }
 0x46d   :  { %4036 = vmatpush1.bf16.msra.mxu0 %v6410_v19  ;;  %4068 = vmatpush1.bf16.msra.mxu1 %v6411_v33 }
 0x46e   :  { %4070 = vmatprep.subr.bf16.mxu0 %v6412_v43  ;;  %4102 = vmatprep.subr.bf16.mxu1 %v6413_v39  ;;  %v3305_v39 = vld [vmem:[%s6235_s1 + $0x98] sm:$0xff] }
 0x503   :  { %v1772_v25 = vpop.f32.mrb[16].mxu0  ;;  %v1843_v51 = vpop.f32.mrb[16].mxu1 }
 0x504   :  { %v1848_v8 = vadd.f32 %v3302_v44, %v1772_v25  ;;  %v1774_v1 = vpop.f32.mrb[17].mxu0  ;;  %v1845_v50 = vpop.f32.mrb[17].mxu1  ;;  %v1850_v63 = vadd.f32 %v3304_v59, %v1843_v51  ;;  %v3310_v59 = vld [vmem:[%s6236_s2 + $0x60] sm:$0xff] }
 0x505   :  { %v1849_v19 = vadd.f32 %v3303_v31, %v1774_v1  ;;  %v1851_v43 = vadd.f32 %v3305_v39, %v1845_v50 }
 0x506   :  { %v3306_v56 = vmul.f32 -1.442695, %v1848_v8 }
 0x507   :  { %v3307_v33 = vmul.f32 -1.442695, %v1849_v19  ;;  %v3308_v57 = vmul.f32 -1.442695, %v1851_v43 }
 0x508   :  { %4520 = vpow2.f32 %v3306_v56 }
 0x509   :  { %4522 = vpow2.f32 %v3307_v33 }
 0x50a   :  { %4524 = vpow2.f32 %v3308_v57 }
 0x50b   :  { %4526 = vtanh.f32 %v1850_v63 }
 0x512   :  { %v4521_v47 = vpop.eup %4520 }
 0x513   :  { %v4523_v44 = vpop.eup %4522  ;;  %v1858_v25 = vadd.f32 1.0, %v4521_v47  ;;  %v3311_v47 = vld [vmem:[%s6236_s2 + $0x68] sm:$0xff] }
 0x514   :  { %v1864_v1 = vadd.f32 1.0, %v4523_v44  ;;  %v4525_v56 = vpop.eup %4524 }
 0x515   :  { %4528 = vrcp.f32 %v1858_v25  ;;  %v4527_v19 = vpop.eup %4526  ;;  %v1871_v39 = vadd.f32 1.0, %v4525_v56 }
 0x516   :  { %4530 = vrcp.f32 %v1864_v1 }
 0x517   :  { %4532 = vrcp.f32 %v1871_v39  ;;  %v3312_v39 = vld [vmem:[%s6236_s2 + $0x70] sm:$0xff] }
 0x51f   :  { %v4529_v8 = vpop.eup %4528 }
 0x520   :  { %v4531_v31 = vpop.eup %4530  ;;  %v1875_v33 = vmul.f32 %v4529_v8, %v4527_v19 }
 0x521   :  { %v1874_v50 = vmul.f32 %v4531_v31, %v5729_v53  ;;  %v3313_v31 = vld [vmem:[%s6236_s2 + $0x78] sm:$0xff] }
 0x523   :  { %v1876_v63 = vadd.f32 %v1875_v33, %v1874_v50  ;;  %v1959_v57 = vpop.f32.mrb[18].mxu0  ;;  %v2030_v51 = vpop.f32.mrb[18].mxu1 }
 0x524   :  { %v2035_v43 = vadd.f32 %v3310_v59, %v1959_v57  ;;  %v1961_v44 = vpop.f32.mrb[19].mxu0  ;;  %v2032_v25 = vpop.f32.mrb[19].mxu1  ;;  %v2037_v57 = vadd.f32 %v3312_v39, %v2030_v51 }
 0x525   :  { %v2036_v1 = vadd.f32 %v3311_v47, %v1961_v44  ;;  %4534 = vtanh.f32 %v1876_v63  ;;  %v5858_v56 = vsel %vm1667_vm7, %v1876_v63, %v5729_v53  ;;  %v2038_v33 = vadd.f32 %v3313_v31, %v2032_v25  ;;  %v4533_v50 = vpop.eup %4532 }
 0x526   :  { %v3314_v19 = vmul.f32 -1.442695, %v2035_v43 }
 0x527   :  { %v3315_v8 = vmul.f32 -1.442695, %v2036_v1  ;;  %v3316_v47 = vmul.f32 -1.442695, %v2038_v33 }
 0x528   :  { %4536 = vpow2.f32 %v3314_v19 }
 0x529   :  { %4538 = vpow2.f32 %v3315_v8 }
 0x52a   :  { %4540 = vpow2.f32 %v3316_v47 }
 0x52b   :  { %4542 = vtanh.f32 %v2037_v57 }
 0x52f   :  { %v4535_v59 = vpop.eup %4534 }
 0x530   :  { %v1878_v44 = vmul.f32 %v4535_v59, %v4533_v50 }
 0x532   :  { %v4537_v53 = vpop.eup %4536  ;;  %v5869_v63 = vsel %vm1667_vm7, %v1878_v44, %v5740_v28  ;;  %v1881_v43 = vsel %vm1667_vm7, %v1878_v44, 0.0 }
 0x533   :  { %v4539_v1 = vpop.eup %4538  ;;  %v2045_v25 = vadd.f32 1.0, %v4537_v53  ;;  %3309 = vst [vmem:[%s6237_s5 + $0x20] sm:$0xff] %v1881_v43  ;;  %2145 = vmatmul.mubr.f32.vlgmr.msra.gmra.mrb[20].mxu0 %v5869_v63  ;;  %2216 = vmatmul.mubr.f32.vlgmr.msra.gmra.mrb[20].mxu1 %v5869_v63 }
 0x534   :  { %v2051_v51 = vadd.f32 1.0, %v4539_v1  ;;  %4072 = vmatpush1.bf16.msra.mxu0 %v5006_v61  ;;  %4104 = vmatpush1.bf16.msra.mxu1 %v5059_v32  ;;  %v4541_v28 = vpop.eup %4540  ;;  %v6415_v1 = vld [vmem:[#allocation9_spill] sm:$0xff] }
 0x535   :  { %4544 = vrcp.f32 %v2045_v25  ;;  %4074 = vmatprep.subr.bf16.mxu0 %v5009_v62  ;;  %4106 = vmatprep.subr.bf16.mxu1 %v5065_v37  ;;  %v4543_v19 = vpop.eup %4542  ;;  %v2058_v39 = vadd.f32 1.0, %v4541_v28  ;;  %v6416_v25 = vld [vmem:[#allocation7_spill] sm:$0xff]  ;;  %v6418_v28 = vld [vmem:[#allocation8_spill] sm:$0xff] }
 0x536   :  { %4546 = vrcp.f32 %v2051_v51  ;;  %2331 = vmatprep.mubr.f32.mxu0 %v6330_v24  ;;  %2402 = vmatprep.mubr.f32.mxu1 %v6330_v24  ;;  %v6417_v51 = vld [vmem:[#allocation12_spill] sm:$0xff] }
 0x537   :  { %4548 = vrcp.f32 %v2058_v39  ;;  %v6423_v39 = vld [vmem:[#allocation17_spill] sm:$0xff] }
 0x538   :  { %4076 = vmatpush1.bf16.msra.mxu0 %v5043_v21  ;;  %4108 = vmatpush1.bf16.msra.mxu1 %v5099_v60 }
 0x539   :  { %4078 = vmatprep.subr.bf16.mxu0 %v5047_v22  ;;  %4110 = vmatprep.subr.bf16.mxu1 %v5102_v0 }
 0x53c   :  { %4080 = vmatpush1.bf16.msra.mxu0 %v5080_v48  ;;  %4112 = vmatpush1.bf16.msra.mxu1 %v5136_v35 }
 0x53d   :  { %4082 = vmatprep.subr.bf16.mxu0 %v5087_v52  ;;  %4114 = vmatprep.subr.bf16.mxu1 %v5142_v40 }
 0x53f   :  { %v4545_v8 = vpop.eup %4544 }
 0x540   :  { %v4547_v31 = vpop.eup %4546  ;;  %v2062_v33 = vmul.f32 %v4545_v8, %v4543_v19  ;;  %4084 = vmatpush1.bf16.msra.mxu0 %v5121_v17  ;;  %4116 = vmatpush1.bf16.msra.mxu1 %v6331_v54  ;;  %v6419_v19 = vld [vmem:[#allocation13_spill] sm:$0xff]  ;;  %v6420_v8 = vld [vmem:[#allocation10_spill] sm:$0xff] }
 0x541   :  { %v2061_v50 = vmul.f32 %v4547_v31, %v5776_v58  ;;  %4086 = vmatprep.subr.bf16.mxu0 %v6332_v36  ;;  %4118 = vmatprep.subr.bf16.mxu1 %v6333_v12  ;;  %v4549_v57 = vpop.eup %4548  ;;  %v6421_v31 = vld [vmem:[#allocation16_spill] sm:$0xff] }
 0x543   :  { %v2063_v59 = vadd.f32 %v2062_v33, %v2061_v50  ;;  %v6422_v33 = vld [vmem:[#allocation11_spill] sm:$0xff]  ;;  %v6424_v50 = vld [vmem:[#allocation14_spill] sm:$0xff] }
 0x544   :  { %4088 = vmatpush1.bf16.msra.mxu0 %v6334_v55  ;;  %4120 = vmatpush1.bf16.msra.mxu1 %v5208_v2 }
 0x545   :  { %4090 = vmatprep.subr.bf16.mxu0 %v6335_v11  ;;  %4122 = vmatprep.subr.bf16.mxu1 %v5214_v7  ;;  %4550 = vtanh.f32 %v2063_v59  ;;  %v5904_v47 = vsel %vm1480_vm6, %v2063_v59, %v5776_v58  ;;  %v6425_v59 = vld [vmem:[#allocation20_spill] sm:$0xff] }
 0x548   :  { %4092 = vmatpush1.bf16.msra.mxu0 %v5193_v45  ;;  %4124 = vmatpush1.bf16.msra.mxu1 %v5241_v13 }
 0x549   :  { %4094 = vmatprep.subr.bf16.mxu0 %v6336_v5  ;;  %4126 = vmatprep.subr.bf16.mxu1 %v5244_v3 }
 0x54c   :  { %4096 = vmatpush1.bf16.msra.mxu0 %v6337_v42  ;;  %4128 = vmatpush1.bf16.msra.mxu1 %v5263_v29 }
 0x54d   :  { %4098 = vmatprep.subr.bf16.mxu0 %v5232_v41  ;;  %4130 = vmatprep.subr.bf16.mxu1 %v5266_v30 }
 0x54f   :  { %v4551_v44 = vpop.eup %4550 }
 0x550   :  { %4100 = vmatpush1.bf16.msra.mxu0 %v5259_v14  ;;  %4132 = vmatpush1.bf16.msra.mxu1 %v5276_v20  ;;  %v2065_v58 = vmul.f32 %v4551_v44, %v4549_v57  ;;  %v6426_v57 = vld [vmem:[#allocation15_spill] sm:$0xff]  ;;  %v6427_v44 = vld [vmem:[#allocation21_spill] sm:$0xff] }
 0x551   :  { %4134 = vmatprep.subr.bf16.mxu0 %v4706_v4  ;;  %4166 = vmatprep.subr.bf16.mxu1 %v4758_v23 }
 0x552   :  { %v5921_v53 = vsel %vm1480_vm6, %v2065_v58, %v5793_v16  ;;  %v2068_v43 = vsel %vm1480_vm6, %v2065_v58, 0.0  ;;  %v6414_v16 = vld [vmem:[#allocation6_spill] sm:$0xff] }
 0x553   :  { %3317 = vst [vmem:[%s6238_s6 + $0x18] sm:$0xff] %v2068_v43  ;;  %2332 = vmatmul.mubr.f32.vlgmr.msra.gmra.mrb[22].mxu0 %v5921_v53  ;;  %2403 = vmatmul.mubr.f32.vlgmr.msra.gmra.mrb[22].mxu1 %v5921_v53  ;;  %v6428_v58 = vld [vmem:[#allocation18_spill] sm:$0xff]  ;;  %v6429_v43 = vld [vmem:[#allocation24_spill] sm:$0xff] }
 0x554   :  { %4136 = vmatpush1.bf16.msra.mxu0 %v4717_v9  ;;  %4168 = vmatpush1.bf16.msra.mxu1 %v4766_v26 }
 0x555   :  { %4138 = vmatprep.subr.bf16.mxu0 %v4719_v10  ;;  %4170 = vmatprep.subr.bf16.mxu1 %v4791_v34 }
 0x556   :  { %2518 = vmatprep.mubr.f32.mxu0 %v6330_v24  ;;  %2589 = vmatprep.mubr.f32.mxu1 %v6330_v24 }
 0x558   :  { %4140 = vmatpush1.bf16.msra.mxu0 %v4735_v15  ;;  %4172 = vmatpush1.bf16.msra.mxu1 %v4802_v38 }
 0x559   :  { %4142 = vmatprep.subr.bf16.mxu0 %v4744_v18  ;;  %4174 = vmatprep.subr.bf16.mxu1 %v4826_v46 }
 0x55c   :  { %4144 = vmatpush1.bf16.msra.mxu0 %v4769_v27  ;;  %4176 = vmatpush1.bf16.msra.mxu1 %v4835_v49 }
 0x55d   :  { %4146 = vmatprep.subr.bf16.mxu0 %v6414_v16  ;;  %4178 = vmatprep.subr.bf16.mxu1 %v6415_v1 }
 0x560   :  { %4148 = vmatpush1.bf16.msra.mxu0 %v6416_v25  ;;  %4180 = vmatpush1.bf16.msra.mxu1 %v6417_v51  ;;  %v3320_v51 = vld [vmem:[%s6235_s1 + $0xb0] sm:$0xff] }
 0x561   :  { %4150 = vmatprep.subr.bf16.mxu0 %v6418_v28  ;;  %4182 = vmatprep.subr.bf16.mxu1 %v6419_v19  ;;  %v6430_v19 = vld [vmem:[#allocation19_spill] sm:$0xff] }
 0x564   :  { %4152 = vmatpush1.bf16.msra.mxu0 %v6420_v8  ;;  %4184 = vmatpush1.bf16.msra.mxu1 %v6421_v31  ;;  %v6431_v8 = vld [vmem:[#allocation25_spill] sm:$0xff]  ;;  %v6432_v31 = vld [vmem:[#allocation22_spill] sm:$0xff] }
 0x565   :  { %4154 = vmatprep.subr.bf16.mxu0 %v6422_v33  ;;  %4186 = vmatprep.subr.bf16.mxu1 %v6423_v39  ;;  %v6433_v33 = vld [vmem:[#allocation26_spill] sm:$0xff]  ;;  %v6434_v39 = vld [vmem:[#allocation23_spill] sm:$0xff] }
 0x568   :  { %4156 = vmatpush1.bf16.msra.mxu0 %v6424_v50  ;;  %4188 = vmatpush1.bf16.msra.mxu1 %v6425_v59  ;;  %v6435_v50 = vld [vmem:[#allocation27_spill] sm:$0xff] }
 0x569   :  { %4158 = vmatprep.subr.bf16.mxu0 %v6426_v57  ;;  %4190 = vmatprep.subr.bf16.mxu1 %v6427_v44  ;;  %v3318_v44 = vld [vmem:[%s6235_s1 + $0xa0] sm:$0xff] }
 0x56c   :  { %4160 = vmatpush1.bf16.msra.mxu0 %v6428_v58  ;;  %4192 = vmatpush1.bf16.msra.mxu1 %v6429_v43  ;;  %v3319_v43 = vld [vmem:[%s6235_s1 + $0xa8] sm:$0xff] }
 0x56d   :  { %4162 = vmatprep.subr.bf16.mxu0 %v6430_v19  ;;  %4194 = vmatprep.subr.bf16.mxu1 %v6431_v8 }
 0x570   :  { %4164 = vmatpush1.bf16.msra.mxu0 %v6432_v31  ;;  %4196 = vmatpush1.bf16.msra.mxu1 %v6433_v33 }
 0x571   :  { %4198 = vmatprep.subr.bf16.mxu0 %v6434_v39  ;;  %4230 = vmatprep.subr.bf16.mxu1 %v6435_v50  ;;  %v3321_v50 = vld [vmem:[%s6235_s1 + $0xb8] sm:$0xff] }
 0x606   :  { %v2146_v58 = vpop.f32.mrb[20].mxu0  ;;  %v2217_v19 = vpop.f32.mrb[20].mxu1 }
 0x607   :  { %v2222_v57 = vadd.f32 %v3318_v44, %v2146_v58  ;;  %v2148_v8 = vpop.f32.mrb[21].mxu0  ;;  %v2219_v59 = vpop.f32.mrb[21].mxu1  ;;  %v2224_v1 = vadd.f32 %v3320_v51, %v2217_v19  ;;  %v3326_v51 = vld [vmem:[%s6236_s2 + $0x40] sm:$0xff] }
 0x608   :  { %v2223_v31 = vadd.f32 %v3319_v43, %v2148_v8  ;;  %v2225_v39 = vadd.f32 %v3321_v50, %v2219_v59 }
 0x609   :  { %v3322_v28 = vmul.f32 -1.442695, %v2222_v57 }
 0x60a   :  { %v3323_v33 = vmul.f32 -1.442695, %v2223_v31  ;;  %v3324_v25 = vmul.f32 -1.442695, %v2225_v39 }
 0x60b   :  { %4552 = vpow2.f32 %v3322_v28 }
 0x60c   :  { %4554 = vpow2.f32 %v3323_v33 }
 0x60d   :  { %4556 = vpow2.f32 %v3324_v25 }
 0x60e   :  { %4558 = vtanh.f32 %v2224_v1 }
 0x615   :  { %v4553_v16 = vpop.eup %4552 }
 0x616   :  { %v4555_v44 = vpop.eup %4554  ;;  %v2232_v58 = vadd.f32 1.0, %v4553_v16  ;;  %v3327_v16 = vld [vmem:[%s6236_s2 + $0x48] sm:$0xff] }
 0x617   :  { %v2238_v8 = vadd.f32 1.0, %v4555_v44  ;;  %v4557_v28 = vpop.eup %4556 }
 0x618   :  { %4560 = vrcp.f32 %v2232_v58  ;;  %v4559_v31 = vpop.eup %4558  ;;  %v2245_v50 = vadd.f32 1.0, %v4557_v28 }
 0x619   :  { %4562 = vrcp.f32 %v2238_v8 }
 0x61a   :  { %4564 = vrcp.f32 %v2245_v50  ;;  %v3328_v50 = vld [vmem:[%s6236_s2 + $0x50] sm:$0xff] }
 0x622   :  { %v4561_v57 = vpop.eup %4560 }
 0x623   :  { %v4563_v43 = vpop.eup %4562  ;;  %v2249_v33 = vmul.f32 %v4561_v57, %v4559_v31 }
 0x624   :  { %v2248_v59 = vmul.f32 %v4563_v43, %v5858_v56  ;;  %v3329_v43 = vld [vmem:[%s6236_s2 + $0x58] sm:$0xff] }
 0x626   :  { %v2250_v1 = vadd.f32 %v2249_v33, %v2248_v59  ;;  %v2333_v25 = vpop.f32.mrb[22].mxu0  ;;  %v2404_v19 = vpop.f32.mrb[22].mxu1 }
 0x627   :  { %v2409_v39 = vadd.f32 %v3326_v51, %v2333_v25  ;;  %v2335_v44 = vpop.f32.mrb[23].mxu0  ;;  %v2406_v58 = vpop.f32.mrb[23].mxu1  ;;  %v2411_v25 = vadd.f32 %v3328_v50, %v2404_v19 }
 0x628   :  { %v2410_v8 = vadd.f32 %v3327_v16, %v2335_v44  ;;  %4566 = vtanh.f32 %v2250_v1  ;;  %v5986_v28 = vsel %vm1293_vm5, %v2250_v1, %v5858_v56  ;;  %v2412_v33 = vadd.f32 %v3329_v43, %v2406_v58  ;;  %v4565_v59 = vpop.eup %4564 }
 0x629   :  { %v3330_v31 = vmul.f32 -1.442695, %v2409_v39 }
 0x62a   :  { %v3331_v57 = vmul.f32 -1.442695, %v2410_v8  ;;  %v3332_v16 = vmul.f32 -1.442695, %v2412_v33 }
 0x62b   :  { %4568 = vpow2.f32 %v3330_v31 }
 0x62c   :  { %4570 = vpow2.f32 %v3331_v57 }
 0x62d   :  { %4572 = vpow2.f32 %v3332_v16 }
 0x62e   :  { %4574 = vtanh.f32 %v2411_v25 }
 0x632   :  { %v4567_v51 = vpop.eup %4566 }
 0x633   :  { %v2252_v44 = vmul.f32 %v4567_v51, %v4565_v59 }
 0x635   :  { %v4569_v56 = vpop.eup %4568  ;;  %v5997_v1 = vsel %vm1293_vm5, %v2252_v44, %v5869_v63  ;;  %v2255_v39 = vsel %vm1293_vm5, %v2252_v44, 0.0 }
 0x636   :  { %v4571_v8 = vpop.eup %4570  ;;  %v2419_v58 = vadd.f32 1.0, %v4569_v56  ;;  %3325 = vst [vmem:[%s6237_s5 + $0x28] sm:$0xff] %v2255_v39  ;;  %2519 = vmatmul.mubr.f32.vlgmr.msra.gmra.mrb[24].mxu0 %v5997_v1  ;;  %2590 = vmatmul.mubr.f32.vlgmr.msra.gmra.mrb[24].mxu1 %v5997_v1 }
 0x637   :  { %v2425_v19 = vadd.f32 1.0, %v4571_v8  ;;  %4200 = vmatpush1.bf16.msra.mxu0 %v5006_v61  ;;  %4232 = vmatpush1.bf16.msra.mxu1 %v5059_v32  ;;  %v4573_v63 = vpop.eup %4572  ;;  %v6449_v8 = vld [vmem:[#allocation21_spill] sm:$0xff] }
 0x638   :  { %4576 = vrcp.f32 %v2419_v58  ;;  %4202 = vmatprep.subr.bf16.mxu0 %v5009_v62  ;;  %4234 = vmatprep.subr.bf16.mxu1 %v5065_v37  ;;  %v4575_v31 = vpop.eup %4574  ;;  %v2432_v50 = vadd.f32 1.0, %v4573_v63  ;;  %v6450_v58 = vld [vmem:[#allocation18_spill] sm:$0xff]  ;;  %v6452_v63 = vld [vmem:[#allocation19_spill] sm:$0xff] }
 0x639   :  { %4578 = vrcp.f32 %v2425_v19  ;;  %2705 = vmatprep.mubr.f32.mxu0 %v6330_v24  ;;  %2776 = vmatprep.mubr.f32.mxu1 %v6330_v24  ;;  %v6451_v19 = vld [vmem:[#allocation24_spill] sm:$0xff] }
 0x63a   :  { %4580 = vrcp.f32 %v2432_v50  ;;  %v6457_v50 = vld [vmem:[#allocation27_spill] sm:$0xff] }
 0x63b   :  { %4204 = vmatpush1.bf16.msra.mxu0 %v5043_v21  ;;  %4236 = vmatpush1.bf16.msra.mxu1 %v5099_v60 }
 0x63c   :  { %4206 = vmatprep.subr.bf16.mxu0 %v5047_v22  ;;  %4238 = vmatprep.subr.bf16.mxu1 %v5102_v0 }
 0x63f   :  { %4208 = vmatpush1.bf16.msra.mxu0 %v5080_v48  ;;  %4240 = vmatpush1.bf16.msra.mxu1 %v5136_v35 }
 0x640   :  { %4210 = vmatprep.subr.bf16.mxu0 %v5087_v52  ;;  %4242 = vmatprep.subr.bf16.mxu1 %v5142_v40 }
 0x642   :  { %v4577_v57 = vpop.eup %4576 }
 0x643   :  { %v4579_v43 = vpop.eup %4578  ;;  %v2436_v33 = vmul.f32 %v4577_v57, %v4575_v31  ;;  %4212 = vmatpush1.bf16.msra.mxu0 %v5121_v17  ;;  %4244 = vmatpush1.bf16.msra.mxu1 %v6331_v54  ;;  %v6453_v31 = vld [vmem:[#allocation25_spill] sm:$0xff]  ;;  %v6454_v57 = vld [vmem:[#allocation22_spill] sm:$0xff] }
 0x644   :  { %v2435_v59 = vmul.f32 %v4579_v43, %v5904_v47  ;;  %4214 = vmatprep.subr.bf16.mxu0 %v6332_v36  ;;  %4246 = vmatprep.subr.bf16.mxu1 %v6333_v12  ;;  %v4581_v25 = vpop.eup %4580  ;;  %v6455_v43 = vld [vmem:[#allocation26_spill] sm:$0xff] }
 0x646   :  { %v2437_v51 = vadd.f32 %v2436_v33, %v2435_v59  ;;  %v6456_v33 = vld [vmem:[#allocation23_spill] sm:$0xff]  ;;  %v3334_v59 = vld [vmem:[%s6235_s1 + $0xc0] sm:$0xff] }
 0x647   :  { %4216 = vmatpush1.bf16.msra.mxu0 %v6334_v55  ;;  %4248 = vmatpush1.bf16.msra.mxu1 %v5208_v2 }
 0x648   :  { %4218 = vmatprep.subr.bf16.mxu0 %v6335_v11  ;;  %4250 = vmatprep.subr.bf16.mxu1 %v5214_v7  ;;  %4582 = vtanh.f32 %v2437_v51  ;;  %v6032_v16 = vsel %vm1106_vm4, %v2437_v51, %v5904_v47  ;;  %v3335_v51 = vld [vmem:[%s6235_s1 + $0xc8] sm:$0xff] }
 0x64b   :  { %4220 = vmatpush1.bf16.msra.mxu0 %v5193_v45  ;;  %4252 = vmatpush1.bf16.msra.mxu1 %v5241_v13 }
 0x64c   :  { %4222 = vmatprep.subr.bf16.mxu0 %v6336_v5  ;;  %4254 = vmatprep.subr.bf16.mxu1 %v5244_v3 }
 0x64f   :  { %4224 = vmatpush1.bf16.msra.mxu0 %v6337_v42  ;;  %4256 = vmatpush1.bf16.msra.mxu1 %v5263_v29 }
 0x650   :  { %4226 = vmatprep.subr.bf16.mxu0 %v5232_v41  ;;  %4258 = vmatprep.subr.bf16.mxu1 %v5266_v30 }
 0x652   :  { %v4583_v44 = vpop.eup %4582 }
 0x653   :  { %4228 = vmatpush1.bf16.msra.mxu0 %v5259_v14  ;;  %4260 = vmatpush1.bf16.msra.mxu1 %v5276_v20  ;;  %v2439_v47 = vmul.f32 %v4583_v44, %v4581_v25 }
 0x654   :  { %4262 = vmatprep.subr.bf16.mxu0 %v4706_v4  ;;  %4294 = vmatprep.subr.bf16.mxu1 %v4758_v23  ;;  %v6436_v4 = vld [vmem:[#allocation6_spill] sm:$0xff]  ;;  %v6439_v23 = vld [vmem:[#allocation12_spill] sm:$0xff] }
 0x655   :  { %v6049_v56 = vsel %vm1106_vm4, %v2439_v47, %v5921_v53  ;;  %v2442_v39 = vsel %vm1106_vm4, %v2439_v47, 0.0  ;;  %v6448_v53 = vld [vmem:[#allocation15_spill] sm:$0xff] }
 0x656   :  { %3333 = vst [vmem:[%s6238_s6 + $0x10] sm:$0xff] %v2442_v39  ;;  %2706 = vmatmul.mubr.f32.vlgmr.msra.gmra.mrb[26].mxu0 %v6049_v56  ;;  %2777 = vmatmul.mubr.f32.vlgmr.msra.gmra.mrb[26].mxu1 %v6049_v56 }
 0x657   :  { %4264 = vmatpush1.bf16.msra.mxu0 %v4717_v9  ;;  %4296 = vmatpush1.bf16.msra.mxu1 %v4766_v26  ;;  %v6437_v9 = vld [vmem:[#allocation9_spill] sm:$0xff]  ;;  %v6440_v26 = vld [vmem:[#allocation8_spill] sm:$0xff] }
 0x658   :  { %4266 = vmatprep.subr.bf16.mxu0 %v4719_v10  ;;  %4298 = vmatprep.subr.bf16.mxu1 %v4791_v34  ;;  %v6438_v10 = vld [vmem:[#allocation7_spill] sm:$0xff]  ;;  %v6442_v34 = vld [vmem:[#allocation10_spill] sm:$0xff] }
 0x659   :  { %2892 = vmatprep.mubr.f32.mxu0 %v6330_v24  ;;  %2963 = vmatprep.mubr.f32.mxu1 %v6330_v24 }
 0x65b   :  { %4268 = vmatpush1.bf16.msra.mxu0 %v4735_v15  ;;  %4300 = vmatpush1.bf16.msra.mxu1 %v4802_v38  ;;  %v6441_v15 = vld [vmem:[#allocation13_spill] sm:$0xff]  ;;  %v6444_v38 = vld [vmem:[#allocation11_spill] sm:$0xff] }
 0x65c   :  { %4270 = vmatprep.subr.bf16.mxu0 %v4744_v18  ;;  %4302 = vmatprep.subr.bf16.mxu1 %v4826_v46  ;;  %v6443_v18 = vld [vmem:[#allocation16_spill] sm:$0xff]  ;;  %v6446_v46 = vld [vmem:[#allocation14_spill] sm:$0xff] }
 0x65f   :  { %4272 = vmatpush1.bf16.msra.mxu0 %v4769_v27  ;;  %4304 = vmatpush1.bf16.msra.mxu1 %v4835_v49  ;;  %v6445_v27 = vld [vmem:[#allocation17_spill] sm:$0xff]  ;;  %v6447_v49 = vld [vmem:[#allocation20_spill] sm:$0xff] }
 0x660   :  { %4274 = vmatprep.subr.bf16.mxu0 %v6436_v4  ;;  %4306 = vmatprep.subr.bf16.mxu1 %v6437_v9 }
 0x663   :  { %4276 = vmatpush1.bf16.msra.mxu0 %v6438_v10  ;;  %4308 = vmatpush1.bf16.msra.mxu1 %v6439_v23 }
 0x664   :  { %4278 = vmatprep.subr.bf16.mxu0 %v6440_v26  ;;  %4310 = vmatprep.subr.bf16.mxu1 %v6441_v15  ;;  %v3337_v26 = vld [vmem:[%s6235_s1 + $0xd8] sm:$0xff] }
 0x667   :  { %4280 = vmatpush1.bf16.msra.mxu0 %v6442_v34  ;;  %4312 = vmatpush1.bf16.msra.mxu1 %v6443_v18  ;;  %v3336_v34 = vld [vmem:[%s6235_s1 + $0xd0] sm:$0xff] }
 0x668   :  { %4282 = vmatprep.subr.bf16.mxu0 %v6444_v38  ;;  %4314 = vmatprep.subr.bf16.mxu1 %v6445_v27 }
 0x66b   :  { %4284 = vmatpush1.bf16.msra.mxu0 %v6446_v46  ;;  %4316 = vmatpush1.bf16.msra.mxu1 %v6447_v49 }
 0x66c   :  { %4286 = vmatprep.subr.bf16.mxu0 %v6448_v53  ;;  %4318 = vmatprep.subr.bf16.mxu1 %v6449_v8 }
 0x66f   :  { %4288 = vmatpush1.bf16.msra.mxu0 %v6450_v58  ;;  %4320 = vmatpush1.bf16.msra.mxu1 %v6451_v19 }
 0x670   :  { %4290 = vmatprep.subr.bf16.mxu0 %v6452_v63  ;;  %4322 = vmatprep.subr.bf16.mxu1 %v6453_v31 }
 0x673   :  { %4292 = vmatpush1.bf16.msra.mxu0 %v6454_v57  ;;  %4324 = vmatpush1.bf16.msra.mxu1 %v6455_v43 }
 0x674   :  { %4326 = vmatprep.subr.bf16.mxu0 %v6456_v33  ;;  %4358 = vmatprep.subr.bf16.mxu1 %v6457_v50  ;;  %v3342_v33 = vld [vmem:[%s6236_s2 + $0x20] sm:$0xff]  ;;  %v3343_v50 = vld [vmem:[%s6236_s2 + $0x28] sm:$0xff] }
 0x709   :  { %v2520_v25 = vpop.f32.mrb[24].mxu0  ;;  %v2591_v44 = vpop.f32.mrb[24].mxu1 }
 0x70a   :  { %v2596_v47 = vadd.f32 %v3334_v59, %v2520_v25  ;;  %v2522_v39 = vpop.f32.mrb[25].mxu0  ;;  %v2593_v4 = vpop.f32.mrb[25].mxu1  ;;  %v2598_v38 = vadd.f32 %v3336_v34, %v2591_v44  ;;  %v3344_v34 = vld [vmem:[%s6236_s2 + $0x30] sm:$0xff] }
 0x70b   :  { %v2597_v9 = vadd.f32 %v3335_v51, %v2522_v39  ;;  %v2599_v15 = vadd.f32 %v3337_v26, %v2593_v4  ;;  %v3345_v26 = vld [vmem:[%s6236_s2 + $0x38] sm:$0xff] }
 0x70c   :  { %v3338_v10 = vmul.f32 -1.442695, %v2596_v47 }
 0x70d   :  { %v3339_v23 = vmul.f32 -1.442695, %v2597_v9  ;;  %v3340_v18 = vmul.f32 -1.442695, %v2599_v15 }
 0x70e   :  { %4584 = vpow2.f32 %v3338_v10 }
 0x70f   :  { %4586 = vpow2.f32 %v3339_v23 }
 0x710   :  { %4588 = vpow2.f32 %v3340_v18 }
 0x711   :  { %4590 = vtanh.f32 %v2598_v38 }
 0x718   :  { %v4585_v27 = vpop.eup %4584 }
 0x719   :  { %v4587_v46 = vpop.eup %4586  ;;  %v2606_v49 = vadd.f32 1.0, %v4585_v27 }
 0x71a   :  { %v2612_v53 = vadd.f32 1.0, %v4587_v46  ;;  %v4589_v8 = vpop.eup %4588 }
 0x71b   :  { %4592 = vrcp.f32 %v2606_v49  ;;  %v4591_v58 = vpop.eup %4590  ;;  %v2619_v57 = vadd.f32 1.0, %v4589_v8 }
 0x71c   :  { %4594 = vrcp.f32 %v2612_v53 }
 0x71d   :  { %4596 = vrcp.f32 %v2619_v57 }
 0x725   :  { %v4593_v19 = vpop.eup %4592 }
 0x726   :  { %v4595_v63 = vpop.eup %4594  ;;  %v2623_v31 = vmul.f32 %v4593_v19, %v4591_v58 }
 0x727   :  { %v2622_v43 = vmul.f32 %v4595_v63, %v5986_v28  ;;  %v4597_v18 = vpop.eup %4596 }
 0x729   :  { %v2624_v59 = vadd.f32 %v2623_v31, %v2622_v43  ;;  %v2707_v51 = vpop.f32.mrb[26].mxu0  ;;  %v2778_v25 = vpop.f32.mrb[26].mxu1 }
 0x72a   :  { %v2783_v44 = vadd.f32 %v3342_v33, %v2707_v51  ;;  %v2709_v47 = vpop.f32.mrb[27].mxu0  ;;  %v2780_v39 = vpop.f32.mrb[27].mxu1  ;;  %v2785_v46 = vadd.f32 %v3344_v34, %v2778_v25  ;;  %v3008_v51 = vld [vmem:[%s6236_s2] sm:$0xff]  ;;  %v3009_v25 = vld [vmem:[%s6236_s2 + $0x8] sm:$0xff] }
 0x72b   :  { %v2784_v4 = vadd.f32 %v3343_v50, %v2709_v47  ;;  %4598 = vtanh.f32 %v2624_v59  ;;  %v6114_v9 = vsel %vm919_vm3, %v2624_v59, %v5986_v28  ;;  %v2786_v15 = vadd.f32 %v3345_v26, %v2780_v39 }
 0x72c   :  { %v3346_v10 = vmul.f32 -1.442695, %v2783_v44 }
 0x72d   :  { %v3347_v23 = vmul.f32 -1.442695, %v2784_v4  ;;  %v3348_v27 = vmul.f32 -1.442695, %v2786_v15 }
 0x72e   :  { %4600 = vpow2.f32 %v3346_v10 }
 0x72f   :  { %4602 = vpow2.f32 %v3347_v23 }
 0x730   :  { %4604 = vpow2.f32 %v3348_v27 }
 0x731   :  { %4606 = vtanh.f32 %v2785_v46 }
 0x735   :  { %v4599_v38 = vpop.eup %4598 }
 0x736   :  { %v2626_v49 = vmul.f32 %v4599_v38, %v4597_v18  ;;  %v3010_v38 = vld [vmem:[%s6236_s2 + $0x10] sm:$0xff] }
 0x738   :  { %v4601_v28 = vpop.eup %4600  ;;  %v6125_v53 = vsel %vm919_vm3, %v2626_v49, %v5997_v1  ;;  %v2629_v8 = vsel %vm919_vm3, %v2626_v49, 0.0 }
 0x739   :  { %v4603_v58 = vpop.eup %4602  ;;  %v2793_v19 = vadd.f32 1.0, %v4601_v28  ;;  %3341 = vst [vmem:[%s6237_s5 + $0x30] sm:$0xff] %v2629_v8  ;;  %2893 = vmatmul.mubr.f32.vlgmr.msra.gmra.mrb[28].mxu0 %v6125_v53  ;;  %2964 = vmatmul.mubr.f32.vlgmr.msra.gmra.mrb[28].mxu1 %v6125_v53 }
 0x73a   :  { %v2799_v63 = vadd.f32 1.0, %v4603_v58  ;;  %4328 = vmatpush1.bf16.msra.mxu0 %v5006_v61  ;;  %4360 = vmatpush1.bf16.msra.mxu1 %v5059_v32  ;;  %v4605_v61 = vpop.eup %4604 }
 0x73b   :  { %4608 = vrcp.f32 %v2793_v19  ;;  %4330 = vmatprep.subr.bf16.mxu0 %v5009_v62  ;;  %4362 = vmatprep.subr.bf16.mxu1 %v5065_v37  ;;  %v4607_v62 = vpop.eup %4606 }
 0x73c   :  { %4610 = vrcp.f32 %v2799_v63  ;;  %3077 = vmatprep.mubr.f32.mxu0 %v6330_v24  ;;  %3148 = vmatprep.mubr.f32.mxu1 %v6330_v24 }
 0x73e   :  { %4332 = vmatpush1.bf16.msra.mxu0 %v5043_v21  ;;  %4364 = vmatpush1.bf16.msra.mxu1 %v5099_v60  ;;  %v2806_v21 = vadd.f32 1.0, %v4605_v61 }
 0x73f   :  { %4334 = vmatprep.subr.bf16.mxu0 %v5047_v22  ;;  %4366 = vmatprep.subr.bf16.mxu1 %v5102_v0 }
 0x740   :  { %4612 = vrcp.f32 %v2806_v21 }
 0x742   :  { %4336 = vmatpush1.bf16.msra.mxu0 %v5080_v48  ;;  %4368 = vmatpush1.bf16.msra.mxu1 %v5136_v35 }
 0x743   :  { %4338 = vmatprep.subr.bf16.mxu0 %v5087_v52  ;;  %4370 = vmatprep.subr.bf16.mxu1 %v5142_v40 }
 0x745   :  { %v4609_v32 = vpop.eup %4608 }
 0x746   :  { %v4611_v37 = vpop.eup %4610  ;;  %v2810_v24 = vmul.f32 %v4609_v32, %v4607_v62  ;;  %4340 = vmatpush1.bf16.msra.mxu0 %v5121_v17  ;;  %4372 = vmatpush1.bf16.msra.mxu1 %v6331_v54  ;;  %v3353_v54 = vld [vmem:[%s6235_s1 + $0xf8] sm:$0xff] }
 0x747   :  { %v2809_v22 = vmul.f32 %v4611_v37, %v6032_v16  ;;  %4342 = vmatprep.subr.bf16.mxu0 %v6332_v36  ;;  %4374 = vmatprep.subr.bf16.mxu1 %v6333_v12  ;;  %v3352_v12 = vld [vmem:[%s6235_s1 + $0xf0] sm:$0xff] }
 0x749   :  { %v2811_v48 = vadd.f32 %v2810_v24, %v2809_v22 }
 0x74a   :  { %4344 = vmatpush1.bf16.msra.mxu0 %v6334_v55  ;;  %4376 = vmatpush1.bf16.msra.mxu1 %v5208_v2  ;;  %v4613_v60 = vpop.eup %4612 }
 0x74b   :  { %4346 = vmatprep.subr.bf16.mxu0 %v6335_v11  ;;  %4378 = vmatprep.subr.bf16.mxu1 %v5214_v7  ;;  %4614 = vtanh.f32 %v2811_v48  ;;  %v6160_v52 = vsel %vm732_vm2, %v2811_v48, %v6032_v16 }
 0x74e   :  { %4348 = vmatpush1.bf16.msra.mxu0 %v5193_v45  ;;  %4380 = vmatpush1.bf16.msra.mxu1 %v5241_v13  ;;  %v3350_v13 = vld [vmem:[%s6235_s1 + $0xe0] sm:$0xff]  ;;  %v3351_v45 = vld [vmem:[%s6235_s1 + $0xe8] sm:$0xff] }
 0x74f   :  { %4350 = vmatprep.subr.bf16.mxu0 %v6336_v5  ;;  %4382 = vmatprep.subr.bf16.mxu1 %v5244_v3 }
 0x752   :  { %4352 = vmatpush1.bf16.msra.mxu0 %v6337_v42  ;;  %4384 = vmatpush1.bf16.msra.mxu1 %v5263_v29 }
 0x753   :  { %4354 = vmatprep.subr.bf16.mxu0 %v5232_v41  ;;  %4386 = vmatprep.subr.bf16.mxu1 %v5266_v30 }
 0x755   :  { %v4615_v0 = vpop.eup %4614 }
 0x756   :  { %4356 = vmatpush1.bf16.msra.mxu0 %v5259_v14  ;;  %4388 = vmatpush1.bf16.msra.mxu1 %v5276_v20  ;;  %v2813_v17 = vmul.f32 %v4615_v0, %v4613_v60 }
 0x758   :  { %v6175_v35 = vsel %vm732_vm2, %v2813_v17, %v6049_v56  ;;  %v2816_v40 = vsel %vm732_vm2, %v2813_v17, 0.0 }
 0x759   :  { %3349 = vst [vmem:[%s6238_s6 + $0x8] sm:$0xff] %v2816_v40  ;;  %3078 = vmatmul.mubr.f32.vlgmr.msra.gmra.mrb[30].mxu0 %v6175_v35  ;;  %3149 = vmatmul.mubr.f32.vlgmr.msra.gmra.mrb[30].mxu1 %v6175_v35 }
 0x80c   :  { %v2894_v2 = vpop.f32.mrb[28].mxu0  ;;  %v2965_v7 = vpop.f32.mrb[28].mxu1 }
 0x80d   :  { %v2970_v41 = vadd.f32 %v3350_v13, %v2894_v2  ;;  %v2896_v3 = vpop.f32.mrb[29].mxu0  ;;  %v2967_v14 = vpop.f32.mrb[29].mxu1  ;;  %v2972_v11 = vadd.f32 %v3352_v12, %v2965_v7 }
 0x80e   :  { %v2971_v29 = vadd.f32 %v3351_v45, %v2896_v3  ;;  %v2973_v36 = vadd.f32 %v3353_v54, %v2967_v14 }
 0x80f   :  { %v3354_v30 = vmul.f32 -1.442695, %v2970_v41 }
 0x810   :  { %v3355_v20 = vmul.f32 -1.442695, %v2971_v29  ;;  %v3356_v55 = vmul.f32 -1.442695, %v2973_v36 }
 0x811   :  { %4616 = vpow2.f32 %v3354_v30 }
 0x812   :  { %4618 = vpow2.f32 %v3355_v20 }
 0x813   :  { %4620 = vpow2.f32 %v3356_v55 }
 0x814   :  { %4622 = vtanh.f32 %v2972_v11 }
 0x81b   :  { %v4617_v5 = vpop.eup %4616 }
 0x81c   :  { %v4619_v42 = vpop.eup %4618  ;;  %v2980_v1 = vadd.f32 1.0, %v4617_v5 }
 0x81d   :  { %v2986_v16 = vadd.f32 1.0, %v4619_v42  ;;  %v4621_v56 = vpop.eup %4620 }
 0x81e   :  { %4624 = vrcp.f32 %v2980_v1  ;;  %v4623_v31 = vpop.eup %4622  ;;  %v2993_v50 = vadd.f32 1.0, %v4621_v56 }
 0x81f   :  { %4626 = vrcp.f32 %v2986_v16 }
 0x820   :  { %4628 = vrcp.f32 %v2993_v50 }
 0x828   :  { %v4625_v57 = vpop.eup %4624 }
 0x829   :  { %v4627_v43 = vpop.eup %4626  ;;  %v2997_v33 = vmul.f32 %v4625_v57, %v4623_v31 }
 0x82a   :  { %v2996_v59 = vmul.f32 %v4627_v43, %v6114_v9  ;;  %v3011_v9 = vld [vmem:[%s6236_s2 + $0x18] sm:$0xff]  ;;  %v4629_v27 = vpop.eup %4628 }
 0x82c   :  { %v2998_v44 = vadd.f32 %v2997_v33, %v2996_v59  ;;  %v3079_v47 = vpop.f32.mrb[30].mxu0  ;;  %v3150_v39 = vpop.f32.mrb[30].mxu1 }
 0x82d   :  { %v3155_v4 = vadd.f32 %v3079_v47, %v3008_v51  ;;  %v3081_v10 = vpop.f32.mrb[31].mxu0  ;;  %v3152_v23 = vpop.f32.mrb[31].mxu1  ;;  %v3157_v8 = vadd.f32 %v3150_v39, %v3010_v38 }
 0x82e   :  { %4630 = vtanh.f32 %v2998_v44  ;;  %v3156_v26 = vadd.f32 %v3081_v10, %v3009_v25  ;;  %v3158_v18 = vadd.f32 %v3152_v23, %v3011_v9 }
 0x82f   :  { %v3358_v15 = vmul.f32 -1.442695, %v3155_v4 }
 0x830   :  { %v3359_v34 = vmul.f32 -1.442695, %v3156_v26  ;;  %v3360_v49 = vmul.f32 -1.442695, %v3158_v18 }
 0x831   :  { %4632 = vpow2.f32 %v3358_v15 }
 0x832   :  { %4634 = vpow2.f32 %v3359_v34 }
 0x833   :  { %4636 = vpow2.f32 %v3360_v49 }
 0x834   :  { %4638 = vtanh.f32 %v3157_v8 }
 0x838   :  { %v4631_v46 = vpop.eup %4630 }
 0x839   :  { %v3000_v28 = vmul.f32 %v4631_v46, %v4629_v27 }
 0x83b   :  { %v4633_v58 = vpop.eup %4632  ;;  %v3002_v19 = vsel %vm545_vm1, %v3000_v28, %v6125_v53  ;;  %v3003_v63 = vsel %vm545_vm1, %v3000_v28, 0.0 }
 0x83c   :  { %v4635_v61 = vpop.eup %4634  ;;  %3357 = vst [vmem:[%s6237_s5 + $0x38] sm:$0xff] %v3003_v63  ;;  %3196 = vst [vmem:[%s6239_s7] sm:$0xff] %v3002_v19  ;;  %v3165_v62 = vadd.f32 1.0, %v4633_v58 }
 0x83d   :  { %v3171_v32 = vadd.f32 1.0, %v4635_v61  ;;  %v4637_v37 = vpop.eup %4636 }
 0x83e   :  { %4640 = vrcp.f32 %v3165_v62  ;;  %v4639_v53 = vpop.eup %4638  ;;  %v3178_v48 = vadd.f32 1.0, %v4637_v37 }
 0x83f   :  { %4642 = vrcp.f32 %v3171_v32 }
 0x840   :  { %4644 = vrcp.f32 %v3178_v48 }
 0x848   :  { %v4641_v24 = vpop.eup %4640 }
 0x849   :  { %v4643_v21 = vpop.eup %4642  ;;  %v3182_v22 = vmul.f32 %v4641_v24, %v4639_v53 }
 0x84a   :  { %v3181_v60 = vmul.f32 %v4643_v21, %v6160_v52  ;;  %v4645_v17 = vpop.eup %4644 }
 0x84c   :  { %v3183_v0 = vadd.f32 %v3182_v22, %v3181_v60 }
 0x84e   :  { %4646 = vtanh.f32 %v3183_v0 }
 0x858   :  { %v4647_v40 = vpop.eup %4646 }
 0x859   :  { %v3185_v13 = vmul.f32 %v4647_v40, %v4645_v17 }
 0x85b   :  { %v3187_v45 = vsel %vm359_vm0, %v3185_v13, %v6175_v35  ;;  %v3188_v2 = vsel %vm359_vm0, %v3185_v13, 0.0 }
 0x85c   :  { %3191 = vst [vmem:[%s6238_s6] sm:$0xff] %v3188_v2  ;;  %3198 = vst [vmem:[%s6240_s8] sm:$0xff] %v3187_v45 }

</bundles_post_ra>
